<compile_context>
chip_gen: v7x
topology: tpu7x:2x2x1
jax: 0.10.0
libtpu: 0.0.40
codegen_flags: <defaults>
</compile_context>

<pallas_src>
import numpy as np
import jax
import jax.numpy as jnp
from jax.experimental import pallas as pl
from jax.experimental.pallas import tpu as pltpu

_CMAX = 8  # all layers have <= 8 channels; pad channels to 8 for uniformity


# ----------------------------------------------------------------------------
# Geometry helpers
# ----------------------------------------------------------------------------
def _canvas_dims(H, W):
    """Canvas with a 2-cell border on every side; per-image size % 128 == 0."""
    Hc = H + 4
    Wc = W + 4
    while (Hc * Wc) % 128 != 0:   # keep the lane axis a multiple of 128
        Wc += 1
    return Hc, Wc


def _pick_batch_tile(n, cap=16):
    # Single-TC chips (v5e/v6e): fewer, fatter steps amortize the ~0.35us
    # per-step overhead -> one step when the whole batch fits. The cap keeps
    # the (72, BT*P) im2col buffer comfortably inside VMEM; for larger N it
    # also gives an even step count (good for v7x megacore sharding).
    if n <= cap:
        return n
    for bt in range(cap, 0, -1):
        if n % bt == 0:
            return bt
    return 1


# ----------------------------------------------------------------------------
# Fused kernel: enc1 -> enc2 -> dec1 -> dec2, all resident in VMEM.
# ----------------------------------------------------------------------------
def _make_fused_kernel(shifts_all, L):
    def kernel(x_ref, w_ref, b_ref, m_ref, o_ref):
        # x_ref : (1, 8, L)   canvas-padded input, channel rows 1..7 are zero
        # w_ref : (4, 8, 72)  per-layer packed weights (rows=cout, cols=(tap,cin))
        # b_ref : (4, 8, 1)   per-layer bias columns
        # m_ref : (4, 1, L)   per-layer valid-output-region masks (0/1 f32)
        # o_ref : (1, 1, L)   output canvas (channel 0 of dec2)
        a = x_ref[0].astype(jnp.float32)                    # (8, L)
        for l in range(4):
            # im2col: stack the 9 tap-shifted activations along sublanes.
            taps = []
            for s in shifts_all[l]:
                r = (-s) % L                                # out[i] = a[i + s]
                taps.append(a if r == 0 else pltpu.roll(a, r, axis=1))
            A = jnp.concatenate(taps, axis=0)               # (72, L)
            # One MXU contraction per layer: (8, 72) x (72, L) -> (8, L)
            z = jax.lax.dot_general(
                w_ref[l], A,
                dimension_numbers=(((1,), (0,)), ((), ())),
                preferred_element_type=jnp.float32)
            # bias + ReLU on full-width vregs, then zero outside valid region
            a = jnp.maximum(z + b_ref[l], 0.0) * m_ref[l]
        o_ref[0] = a[0:1, :].astype(o_ref.dtype)            # dec2 has cout == 1
    return kernel


# ----------------------------------------------------------------------------
# One-time parameter packing (hoisted out of the forward path).
# ----------------------------------------------------------------------------
def prepare_params(params):
    """Pack PyTorch-layout params into (4, 8, 72) weights and (4, 8, 1) biases.

    W[l][o, (kh*3+kw)*8 + c] = conv-equivalent weight; ConvTranspose layers are
    converted to full convolutions (channel swap + spatial flip) first.
    Channels are zero-padded to 8 so all four layers share one layout.
    """
    def pack(w_oihw, b):                                    # Conv2d (O, I, 3, 3)
        cout, cin = int(w_oihw.shape[0]), int(w_oihw.shape[1])
        w = jnp.transpose(w_oihw, (2, 3, 1, 0))             # (3, 3, cin, cout)
        w = jnp.pad(w, ((0, 0), (0, 0), (0, _CMAX - cin), (0, _CMAX - cout)))
        w = w.reshape(9 * _CMAX, _CMAX).T                   # (8, 72)
        b8 = jnp.pad(b, (0, _CMAX - cout)).reshape(_CMAX, 1)
        return w.astype(jnp.float32), b8.astype(jnp.float32)

    def pack_t(w_iohw, b):                                  # ConvTranspose2d (I, O, 3, 3)
        w_conv = jnp.transpose(w_iohw[:, :, ::-1, ::-1], (1, 0, 2, 3))
        return pack(w_conv, b)

    w1, b1 = pack(params["enc1_w"], params["enc1_b"])
    w2, b2 = pack(params["enc2_w"], params["enc2_b"])
    w3, b3 = pack_t(params["dec1_w"], params["dec1_b"])
    w4, b4 = pack_t(params["dec2_w"], params["dec2_b"])
    return {"W": jnp.stack([w1, w2, w3, w4]),               # (4, 8, 72)
            "B": jnp.stack([b1, b2, b3, b4])}               # (4, 8, 1)


# ----------------------------------------------------------------------------
# Forward pass: a single fused pallas_call.
# ----------------------------------------------------------------------------
def autoencoder_forward(x_nchw, packed):
    N, C, H, W = x_nchw.shape
    assert C == 1, "Autoencoder expects in_channels == 1"
    Hc, Wc = _canvas_dims(H, W)
    P = Hc * Wc
    BT = _pick_batch_tile(N)
    G = N // BT
    L = BT * P                                              # lane extent per block

    # Per-layer tap shifts (canvas-flattened) and valid-region masks.
    # Layers 0/1 are valid convs (forward shifts); layers 2/3 are full convs
    # (backward shifts, canvas zeros provide the implicit 2-padding).
    geoms = [(H - 2, W - 2, False), (H - 4, W - 4, False),
             (H - 2, W - 2, True), (H, W, True)]
    shifts_all = []
    masks = np.zeros((4, 1, L), np.float32)
    for l, (Ho, Wo, transposed) in enumerate(geoms):
        if transposed:
            shifts = [(kh - 2) * Wc + (kw - 2) for kh in range(3) for kw in range(3)]
        else:
            shifts = [kh * Wc + kw for kh in range(3) for kw in range(3)]
        shifts_all.append(shifts)
        m2d = np.zeros((Hc, Wc), np.float32)
        m2d[2:2 + Ho, 2:2 + Wo] = 1.0
        masks[l, 0, :] = np.tile(m2d.reshape(-1), BT)
    masks = jnp.asarray(masks)                              # (4, 1, L) trace-time const

    # Canvas-pad + flatten input (lane-dense: last dim L is a multiple of 128).
    x_img = x_nchw.reshape(N, H, W).astype(jnp.float32)
    xc = jnp.pad(x_img, ((0, 0), (2, Hc - 2 - H), (2, Wc - 2 - W)))   # (N, Hc, Wc)
    xc = xc.reshape(G, 1, L)
    x_in = jnp.pad(xc, ((0, 0), (0, _CMAX - 1), (0, 0)))              # (G, 8, L)

    out = pl.pallas_call(
        _make_fused_kernel(shifts_all, L),
        out_shape=jax.ShapeDtypeStruct((G, 1, L), x_nchw.dtype),
        grid=(G,),
        in_specs=[
            pl.BlockSpec((1, _CMAX, L), lambda g: (g, 0, 0)),
            pl.BlockSpec((4, _CMAX, 9 * _CMAX), lambda g: (0, 0, 0)),
            pl.BlockSpec((4, _CMAX, 1), lambda g: (0, 0, 0)),
            pl.BlockSpec((4, 1, L), lambda g: (0, 0, 0)),
        ],
        out_specs=pl.BlockSpec((1, 1, L), lambda g: (g, 0, 0)),
        compiler_params=pltpu.CompilerParams(
            dimension_semantics=("parallel",)),
    )(x_in, packed["W"], packed["B"], masks)

    # Extract the (H, W) window from the output canvas (cheap XLA slice/reshape).
    out = out.reshape(N, Hc, Wc)[:, 2:2 + H, 2:2 + W]
    return out.reshape(N, 1, H, W)


# ----------------------------------------------------------------------------
# Deterministic parameter init (PyTorch-like uniform bounds).
# ----------------------------------------------------------------------------
def init_params(key):
    def uinit(k, shape, fan_in):
        bound = 1.0 / np.sqrt(fan_in)
        return jax.random.uniform(k, shape, jnp.float32, -bound, bound)

    ks = jax.random.split(key, 8)
    return {
        "enc1_w": uinit(ks[0], (8, 1, 3, 3), 1 * 9),
        "enc1_b": uinit(ks[1], (8,), 1 * 9),
        "enc2_w": uinit(ks[2], (4, 8, 3, 3), 8 * 9),
        "enc2_b": uinit(ks[3], (4,), 8 * 9),
        "dec1_w": uinit(ks[4], (4, 8, 3, 3), 8 * 9),
        "dec1_b": uinit(ks[5], (8,), 8 * 9),
        "dec2_w": uinit(ks[6], (8, 1, 3, 3), 1 * 9),
        "dec2_b": uinit(ks[7], (1,), 1 * 9),
    }


# ----------------------------------------------------------------------------
# Pure-JAX reference of the PyTorch semantics (correctness check only).
# ----------------------------------------------------------------------------
def _ref_conv2d(x, w, b):  # x: NCHW, w: (O, I, 3, 3)
    N, Cin, H, W = x.shape
    Ho, Wo = H - 2, W - 2
    out = jnp.zeros((N, w.shape[0], Ho, Wo), jnp.float32)
    for kh in range(3):
        for kw in range(3):
            patch = x[:, :, kh:kh + Ho, kw:kw + Wo]
            out = out + jnp.einsum("nchw,oc->nohw", patch, w[:, :, kh, kw])
    return out + b[None, :, None, None]


def _ref_convtranspose2d(x, w, b):  # x: NCHW, w: (I, O, 3, 3)
    N, Cin, H, W = x.shape
    out = jnp.zeros((N, w.shape[1], H + 2, W + 2), jnp.float32)
    for kh in range(3):
        for kw in range(3):
            out = out.at[:, :, kh:kh + H, kw:kw + W].add(
                jnp.einsum("nchw,co->nohw", x, w[:, :, kh, kw]))
    return out + b[None, :, None, None]


def reference_forward(x, p):
    x = jax.nn.relu(_ref_conv2d(x, p["enc1_w"], p["enc1_b"]))
    x = jax.nn.relu(_ref_conv2d(x, p["enc2_w"], p["enc2_b"]))
    x = jax.nn.relu(_ref_convtranspose2d(x, p["dec1_w"], p["dec1_b"]))
    x = jax.nn.relu(_ref_convtranspose2d(x, p["dec2_w"], p["dec2_b"]))
    return x


# ----------------------------------------------------------------------------
if __name__ == "__main__":
    key = jax.random.PRNGKey(0)
    kx, kp = jax.random.split(key)

    # Small NCHW input consistent with in_channels=1.
    x = jax.random.normal(kx, (4, 1, 16, 16), jnp.float32)
    params = init_params(kp)
    packed = prepare_params(params)      # one-time weight packing (hoisted)

    fwd = jax.jit(autoencoder_forward)
    out = jax.block_until_ready(fwd(x, packed))

    assert out.shape == (4, 1, 16, 16), out.shape

    ref = reference_forward(x, params)
    np.testing.assert_allclose(np.asarray(out), np.asarray(ref), atol=1e-4, rtol=1e-4)

    print("KERNEL_OK")
</pallas_src>

<mosaic_0001>
module attributes {stable_mosaic.version = 11 : i64} {
  func.func @kernel(%arg0: i32, %arg1: memref<1x8x2560xf32, #tpu.memory_space<vmem>>, %arg2: memref<4x8x72xf32, #tpu.memory_space<vmem>>, %arg3: memref<4x8x1xf32, #tpu.memory_space<vmem>>, %arg4: memref<4x1x2560xf32, #tpu.memory_space<vmem>>, %arg5: memref<1x1x2560xf32, #tpu.memory_space<vmem>>) attributes {dimension_semantics = [#tpu.dimension_semantics<parallel>], iteration_bounds = array<i64: 1>, scalar_prefetch = 0 : i64, scratch_operands = 0 : i64, tpu.core_type = #tpu.core_type<tc>, window_params = [{transform_indices = @transform_0, window_bounds = array<i64: 1, 8, 2560>}, {pipeline_mode = #tpu.pipeline_mode<synchronous>, transform_indices = @transform_1, window_bounds = array<i64: 4, 8, 72>}, {pipeline_mode = #tpu.pipeline_mode<synchronous>, transform_indices = @transform_2, window_bounds = array<i64: 4, 8, 1>}, {pipeline_mode = #tpu.pipeline_mode<synchronous>, transform_indices = @transform_3, window_bounds = array<i64: 4, 1, 2560>}, {transform_indices = @transform_4, window_bounds = array<i64: 1, 1, 2560>}]} {
    %c0 = arith.constant 0 : index
    %c0_0 = arith.constant 0 : index
    %c0_1 = arith.constant 0 : index
    %0 = vector.load %arg1[%c0, %c0_0, %c0_1] : memref<1x8x2560xf32, #tpu.memory_space<vmem>>, vector<1x8x2560xf32>
    %1 = vector.shape_cast %0 : vector<1x8x2560xf32> to vector<8x2560xf32>
    %c2559_i32 = arith.constant 2559 : i32
    %2 = tpu.dynamic_rotate %1 by %c2559_i32 dim 1 : vector<8x2560xf32>, i32 -> vector<8x2560xf32>
    %c2558_i32 = arith.constant 2558 : i32
    %3 = tpu.dynamic_rotate %1 by %c2558_i32 dim 1 : vector<8x2560xf32>, i32 -> vector<8x2560xf32>
    %c2528_i32 = arith.constant 2528 : i32
    %4 = tpu.dynamic_rotate %1 by %c2528_i32 dim 1 : vector<8x2560xf32>, i32 -> vector<8x2560xf32>
    %c2527_i32 = arith.constant 2527 : i32
    %5 = tpu.dynamic_rotate %1 by %c2527_i32 dim 1 : vector<8x2560xf32>, i32 -> vector<8x2560xf32>
    %c2526_i32 = arith.constant 2526 : i32
    %6 = tpu.dynamic_rotate %1 by %c2526_i32 dim 1 : vector<8x2560xf32>, i32 -> vector<8x2560xf32>
    %c2496_i32 = arith.constant 2496 : i32
    %7 = tpu.dynamic_rotate %1 by %c2496_i32 dim 1 : vector<8x2560xf32>, i32 -> vector<8x2560xf32>
    %c2495_i32 = arith.constant 2495 : i32
    %8 = tpu.dynamic_rotate %1 by %c2495_i32 dim 1 : vector<8x2560xf32>, i32 -> vector<8x2560xf32>
    %c2494_i32 = arith.constant 2494 : i32
    %9 = tpu.dynamic_rotate %1 by %c2494_i32 dim 1 : vector<8x2560xf32>, i32 -> vector<8x2560xf32>
    %10 = tpu.concatenate %1, %2, %3, %4, %5, %6, %7, %8, %9 in 0 : vector<8x2560xf32>, vector<8x2560xf32>, vector<8x2560xf32>, vector<8x2560xf32>, vector<8x2560xf32>, vector<8x2560xf32>, vector<8x2560xf32>, vector<8x2560xf32>, vector<8x2560xf32> -> vector<72x2560xf32>
    %c0_2 = arith.constant 0 : index
    %c0_3 = arith.constant 0 : index
    %c0_4 = arith.constant 0 : index
    %11 = vector.load %arg2[%c0_2, %c0_3, %c0_4] : memref<4x8x72xf32, #tpu.memory_space<vmem>>, vector<1x8x72xf32>
    %12 = vector.shape_cast %11 : vector<1x8x72xf32> to vector<8x72xf32>
    %cst = arith.constant dense<0.000000e+00> : vector<8x2560xf32>
    %13 = tpu.matmul %12, %10, %cst {dimension_numbers = #tpu.dot_dimension_numbers<[1], [0], [0], [1], [0, 0, 1, 1], [], []>} : vector<8x72xf32>, vector<72x2560xf32>, vector<8x2560xf32> -> vector<8x2560xf32>
    %c0_5 = arith.constant 0 : index
    %c0_6 = arith.constant 0 : index
    %c0_7 = arith.constant 0 : index
    %14 = vector.load %arg3[%c0_5, %c0_6, %c0_7] : memref<4x8x1xf32, #tpu.memory_space<vmem>>, vector<1x8x1xf32>
    %15 = vector.shape_cast %14 : vector<1x8x1xf32> to vector<8x1xf32>
    %16 = vector.broadcast %15 : vector<8x1xf32> to vector<8x2560xf32>
    %17 = arith.addf %13, %16 : vector<8x2560xf32>
    %cst_8 = arith.constant 0.000000e+00 : f32
    %18 = vector.broadcast %cst_8 : f32 to vector<8x2560xf32>
    %19 = arith.maximumf %17, %18 : vector<8x2560xf32>
    %c0_9 = arith.constant 0 : index
    %c0_10 = arith.constant 0 : index
    %c0_11 = arith.constant 0 : index
    %20 = vector.load %arg4[%c0_9, %c0_10, %c0_11] : memref<4x1x2560xf32, #tpu.memory_space<vmem>>, vector<1x1x2560xf32>
    %21 = vector.shape_cast %20 : vector<1x1x2560xf32> to vector<1x2560xf32>
    %22 = vector.broadcast %21 : vector<1x2560xf32> to vector<8x2560xf32>
    %23 = arith.mulf %19, %22 : vector<8x2560xf32>
    %c2559_i32_12 = arith.constant 2559 : i32
    %24 = tpu.dynamic_rotate %23 by %c2559_i32_12 dim 1 : vector<8x2560xf32>, i32 -> vector<8x2560xf32>
    %c2558_i32_13 = arith.constant 2558 : i32
    %25 = tpu.dynamic_rotate %23 by %c2558_i32_13 dim 1 : vector<8x2560xf32>, i32 -> vector<8x2560xf32>
    %c2528_i32_14 = arith.constant 2528 : i32
    %26 = tpu.dynamic_rotate %23 by %c2528_i32_14 dim 1 : vector<8x2560xf32>, i32 -> vector<8x2560xf32>
    %c2527_i32_15 = arith.constant 2527 : i32
    %27 = tpu.dynamic_rotate %23 by %c2527_i32_15 dim 1 : vector<8x2560xf32>, i32 -> vector<8x2560xf32>
    %c2526_i32_16 = arith.constant 2526 : i32
    %28 = tpu.dynamic_rotate %23 by %c2526_i32_16 dim 1 : vector<8x2560xf32>, i32 -> vector<8x2560xf32>
    %c2496_i32_17 = arith.constant 2496 : i32
    %29 = tpu.dynamic_rotate %23 by %c2496_i32_17 dim 1 : vector<8x2560xf32>, i32 -> vector<8x2560xf32>
    %c2495_i32_18 = arith.constant 2495 : i32
    %30 = tpu.dynamic_rotate %23 by %c2495_i32_18 dim 1 : vector<8x2560xf32>, i32 -> vector<8x2560xf32>
    %c2494_i32_19 = arith.constant 2494 : i32
    %31 = tpu.dynamic_rotate %23 by %c2494_i32_19 dim 1 : vector<8x2560xf32>, i32 -> vector<8x2560xf32>
    %32 = tpu.concatenate %23, %24, %25, %26, %27, %28, %29, %30, %31 in 0 : vector<8x2560xf32>, vector<8x2560xf32>, vector<8x2560xf32>, vector<8x2560xf32>, vector<8x2560xf32>, vector<8x2560xf32>, vector<8x2560xf32>, vector<8x2560xf32>, vector<8x2560xf32> -> vector<72x2560xf32>
    %c1 = arith.constant 1 : index
    %c0_20 = arith.constant 0 : index
    %c0_21 = arith.constant 0 : index
    %33 = vector.load %arg2[%c1, %c0_20, %c0_21] : memref<4x8x72xf32, #tpu.memory_space<vmem>>, vector<1x8x72xf32>
    %34 = vector.shape_cast %33 : vector<1x8x72xf32> to vector<8x72xf32>
    %cst_22 = arith.constant dense<0.000000e+00> : vector<8x2560xf32>
    %35 = tpu.matmul %34, %32, %cst_22 {dimension_numbers = #tpu.dot_dimension_numbers<[1], [0], [0], [1], [0, 0, 1, 1], [], []>} : vector<8x72xf32>, vector<72x2560xf32>, vector<8x2560xf32> -> vector<8x2560xf32>
    %c1_23 = arith.constant 1 : index
    %c0_24 = arith.constant 0 : index
    %c0_25 = arith.constant 0 : index
    %36 = vector.load %arg3[%c1_23, %c0_24, %c0_25] : memref<4x8x1xf32, #tpu.memory_space<vmem>>, vector<1x8x1xf32>
    %37 = vector.shape_cast %36 : vector<1x8x1xf32> to vector<8x1xf32>
    %38 = vector.broadcast %37 : vector<8x1xf32> to vector<8x2560xf32>
    %39 = arith.addf %35, %38 : vector<8x2560xf32>
    %cst_26 = arith.constant 0.000000e+00 : f32
    %40 = vector.broadcast %cst_26 : f32 to vector<8x2560xf32>
    %41 = arith.maximumf %39, %40 : vector<8x2560xf32>
    %c1_27 = arith.constant 1 : index
    %c0_28 = arith.constant 0 : index
    %c0_29 = arith.constant 0 : index
    %42 = vector.load %arg4[%c1_27, %c0_28, %c0_29] : memref<4x1x2560xf32, #tpu.memory_space<vmem>>, vector<1x1x2560xf32>
    %43 = vector.shape_cast %42 : vector<1x1x2560xf32> to vector<1x2560xf32>
    %44 = vector.broadcast %43 : vector<1x2560xf32> to vector<8x2560xf32>
    %45 = arith.mulf %41, %44 : vector<8x2560xf32>
    %c66_i32 = arith.constant 66 : i32
    %46 = tpu.dynamic_rotate %45 by %c66_i32 dim 1 : vector<8x2560xf32>, i32 -> vector<8x2560xf32>
    %c65_i32 = arith.constant 65 : i32
    %47 = tpu.dynamic_rotate %45 by %c65_i32 dim 1 : vector<8x2560xf32>, i32 -> vector<8x2560xf32>
    %c64_i32 = arith.constant 64 : i32
    %48 = tpu.dynamic_rotate %45 by %c64_i32 dim 1 : vector<8x2560xf32>, i32 -> vector<8x2560xf32>
    %c34_i32 = arith.constant 34 : i32
    %49 = tpu.dynamic_rotate %45 by %c34_i32 dim 1 : vector<8x2560xf32>, i32 -> vector<8x2560xf32>
    %c33_i32 = arith.constant 33 : i32
    %50 = tpu.dynamic_rotate %45 by %c33_i32 dim 1 : vector<8x2560xf32>, i32 -> vector<8x2560xf32>
    %c32_i32 = arith.constant 32 : i32
    %51 = tpu.dynamic_rotate %45 by %c32_i32 dim 1 : vector<8x2560xf32>, i32 -> vector<8x2560xf32>
    %c2_i32 = arith.constant 2 : i32
    %52 = tpu.dynamic_rotate %45 by %c2_i32 dim 1 : vector<8x2560xf32>, i32 -> vector<8x2560xf32>
    %c1_i32 = arith.constant 1 : i32
    %53 = tpu.dynamic_rotate %45 by %c1_i32 dim 1 : vector<8x2560xf32>, i32 -> vector<8x2560xf32>
    %54 = tpu.concatenate %46, %47, %48, %49, %50, %51, %52, %53, %45 in 0 : vector<8x2560xf32>, vector<8x2560xf32>, vector<8x2560xf32>, vector<8x2560xf32>, vector<8x2560xf32>, vector<8x2560xf32>, vector<8x2560xf32>, vector<8x2560xf32>, vector<8x2560xf32> -> vector<72x2560xf32>
    %c2 = arith.constant 2 : index
    %c0_30 = arith.constant 0 : index
    %c0_31 = arith.constant 0 : index
    %55 = vector.load %arg2[%c2, %c0_30, %c0_31] : memref<4x8x72xf32, #tpu.memory_space<vmem>>, vector<1x8x72xf32>
    %56 = vector.shape_cast %55 : vector<1x8x72xf32> to vector<8x72xf32>
    %cst_32 = arith.constant dense<0.000000e+00> : vector<8x2560xf32>
    %57 = tpu.matmul %56, %54, %cst_32 {dimension_numbers = #tpu.dot_dimension_numbers<[1], [0], [0], [1], [0, 0, 1, 1], [], []>} : vector<8x72xf32>, vector<72x2560xf32>, vector<8x2560xf32> -> vector<8x2560xf32>
    %c2_33 = arith.constant 2 : index
    %c0_34 = arith.constant 0 : index
    %c0_35 = arith.constant 0 : index
    %58 = vector.load %arg3[%c2_33, %c0_34, %c0_35] : memref<4x8x1xf32, #tpu.memory_space<vmem>>, vector<1x8x1xf32>
    %59 = vector.shape_cast %58 : vector<1x8x1xf32> to vector<8x1xf32>
    %60 = vector.broadcast %59 : vector<8x1xf32> to vector<8x2560xf32>
    %61 = arith.addf %57, %60 : vector<8x2560xf32>
    %cst_36 = arith.constant 0.000000e+00 : f32
    %62 = vector.broadcast %cst_36 : f32 to vector<8x2560xf32>
    %63 = arith.maximumf %61, %62 : vector<8x2560xf32>
    %c2_37 = arith.constant 2 : index
    %c0_38 = arith.constant 0 : index
    %c0_39 = arith.constant 0 : index
    %64 = vector.load %arg4[%c2_37, %c0_38, %c0_39] : memref<4x1x2560xf32, #tpu.memory_space<vmem>>, vector<1x1x2560xf32>
    %65 = vector.shape_cast %64 : vector<1x1x2560xf32> to vector<1x2560xf32>
    %66 = vector.broadcast %65 : vector<1x2560xf32> to vector<8x2560xf32>
    %67 = arith.mulf %63, %66 : vector<8x2560xf32>
    %c66_i32_40 = arith.constant 66 : i32
    %68 = tpu.dynamic_rotate %67 by %c66_i32_40 dim 1 : vector<8x2560xf32>, i32 -> vector<8x2560xf32>
    %c65_i32_41 = arith.constant 65 : i32
    %69 = tpu.dynamic_rotate %67 by %c65_i32_41 dim 1 : vector<8x2560xf32>, i32 -> vector<8x2560xf32>
    %c64_i32_42 = arith.constant 64 : i32
    %70 = tpu.dynamic_rotate %67 by %c64_i32_42 dim 1 : vector<8x2560xf32>, i32 -> vector<8x2560xf32>
    %c34_i32_43 = arith.constant 34 : i32
    %71 = tpu.dynamic_rotate %67 by %c34_i32_43 dim 1 : vector<8x2560xf32>, i32 -> vector<8x2560xf32>
    %c33_i32_44 = arith.constant 33 : i32
    %72 = tpu.dynamic_rotate %67 by %c33_i32_44 dim 1 : vector<8x2560xf32>, i32 -> vector<8x2560xf32>
    %c32_i32_45 = arith.constant 32 : i32
    %73 = tpu.dynamic_rotate %67 by %c32_i32_45 dim 1 : vector<8x2560xf32>, i32 -> vector<8x2560xf32>
    %c2_i32_46 = arith.constant 2 : i32
    %74 = tpu.dynamic_rotate %67 by %c2_i32_46 dim 1 : vector<8x2560xf32>, i32 -> vector<8x2560xf32>
    %c1_i32_47 = arith.constant 1 : i32
    %75 = tpu.dynamic_rotate %67 by %c1_i32_47 dim 1 : vector<8x2560xf32>, i32 -> vector<8x2560xf32>
    %76 = tpu.concatenate %68, %69, %70, %71, %72, %73, %74, %75, %67 in 0 : vector<8x2560xf32>, vector<8x2560xf32>, vector<8x2560xf32>, vector<8x2560xf32>, vector<8x2560xf32>, vector<8x2560xf32>, vector<8x2560xf32>, vector<8x2560xf32>, vector<8x2560xf32> -> vector<72x2560xf32>
    %c3 = arith.constant 3 : index
    %c0_48 = arith.constant 0 : index
    %c0_49 = arith.constant 0 : index
    %77 = vector.load %arg2[%c3, %c0_48, %c0_49] : memref<4x8x72xf32, #tpu.memory_space<vmem>>, vector<1x8x72xf32>
    %78 = vector.shape_cast %77 : vector<1x8x72xf32> to vector<8x72xf32>
    %cst_50 = arith.constant dense<0.000000e+00> : vector<8x2560xf32>
    %79 = tpu.matmul %78, %76, %cst_50 {dimension_numbers = #tpu.dot_dimension_numbers<[1], [0], [0], [1], [0, 0, 1, 1], [], []>} : vector<8x72xf32>, vector<72x2560xf32>, vector<8x2560xf32> -> vector<8x2560xf32>
    %c3_51 = arith.constant 3 : index
    %c0_52 = arith.constant 0 : index
    %c0_53 = arith.constant 0 : index
    %80 = vector.load %arg3[%c3_51, %c0_52, %c0_53] : memref<4x8x1xf32, #tpu.memory_space<vmem>>, vector<1x8x1xf32>
    %81 = vector.shape_cast %80 : vector<1x8x1xf32> to vector<8x1xf32>
    %82 = vector.broadcast %81 : vector<8x1xf32> to vector<8x2560xf32>
    %83 = arith.addf %79, %82 : vector<8x2560xf32>
    %cst_54 = arith.constant 0.000000e+00 : f32
    %84 = vector.broadcast %cst_54 : f32 to vector<8x2560xf32>
    %85 = arith.maximumf %83, %84 : vector<8x2560xf32>
    %c3_55 = arith.constant 3 : index
    %c0_56 = arith.constant 0 : index
    %c0_57 = arith.constant 0 : index
    %86 = vector.load %arg4[%c3_55, %c0_56, %c0_57] : memref<4x1x2560xf32, #tpu.memory_space<vmem>>, vector<1x1x2560xf32>
    %87 = vector.shape_cast %86 : vector<1x1x2560xf32> to vector<1x2560xf32>
    %88 = vector.broadcast %87 : vector<1x2560xf32> to vector<8x2560xf32>
    %89 = arith.mulf %85, %88 : vector<8x2560xf32>
    %90 = vector.extract_strided_slice %89 {offsets = [0, 0], sizes = [1, 2560], strides = [1, 1]} : vector<8x2560xf32> to vector<1x2560xf32>
    %c0_58 = arith.constant 0 : index
    %c0_59 = arith.constant 0 : index
    %c0_60 = arith.constant 0 : index
    %91 = vector.load %arg5[%c0_58, %c0_59, %c0_60] : memref<1x1x2560xf32, #tpu.memory_space<vmem>>, vector<1x1x2560xf32>
    %92 = vector.shape_cast %91 : vector<1x1x2560xf32> to vector<1x2560xf32>
    %93 = vector.shape_cast %90 : vector<1x2560xf32> to vector<1x1x2560xf32>
    tpu.vector_store %arg5[%c0_58, %c0_59, %c0_60], %93 {strides = array<i32>} : memref<1x1x2560xf32, #tpu.memory_space<vmem>>, vector<1x1x2560xf32>,
    return
  }
  func.func @transform_0(%arg0: i32) -> (i32, i32, i32) {
    %c0_i32 = arith.constant 0 : i32
    %c0_i32_0 = arith.constant 0 : i32
    %c0_i32_1 = arith.constant 0 : i32
    return %arg0, %c0_i32, %c0_i32_0 : i32, i32, i32
  }
  func.func @transform_1(%arg0: i32) -> (i32, i32, i32) {
    %c0_i32 = arith.constant 0 : i32
    %c0_i32_0 = arith.constant 0 : i32
    %c0_i32_1 = arith.constant 0 : i32
    %c0_i32_2 = arith.constant 0 : i32
    return %c0_i32, %c0_i32_0, %c0_i32_1 : i32, i32, i32
  }
  func.func @transform_2(%arg0: i32) -> (i32, i32, i32) {
    %c0_i32 = arith.constant 0 : i32
    %c0_i32_0 = arith.constant 0 : i32
    %c0_i32_1 = arith.constant 0 : i32
    %c0_i32_2 = arith.constant 0 : i32
    return %c0_i32, %c0_i32_0, %c0_i32_1 : i32, i32, i32
  }
  func.func @transform_3(%arg0: i32) -> (i32, i32, i32) {
    %c0_i32 = arith.constant 0 : i32
    %c0_i32_0 = arith.constant 0 : i32
    %c0_i32_1 = arith.constant 0 : i32
    %c0_i32_2 = arith.constant 0 : i32
    return %c0_i32, %c0_i32_0, %c0_i32_1 : i32, i32, i32
  }
  func.func @transform_4(%arg0: i32) -> (i32, i32, i32) {
    %c0_i32 = arith.constant 0 : i32
    %c0_i32_0 = arith.constant 0 : i32
    %c0_i32_1 = arith.constant 0 : i32
    return %arg0, %c0_i32, %c0_i32_0 : i32, i32, i32
  }
}

</mosaic_0001>

<bundles_post_ra>
// kernel: autoencoder_forward.1
= control target key start
LH: loop header
LB: loop body
LE: loop exit
PB: predicated region body
PF: predicated region fallthrough
CT: control target
= control target key end

     0   :  { %s7796_s23 = smov 126   ;;  %s7797_s24 = smov 127   ;;  %v12442_v12 = vmov 0.0   ;;  %v12437_v25 = vlaneseq  ;;  %vm534_vm8 = vcmask 588800   ;;  %s12432_s0 = inlined_call_operand.vmem [shape: f32[1,8,2560], index: 0, kind: input, shape index: {}]   ;;  %s12433_s1 = inlined_call_operand.vmem [shape: f32[4,8,72], index: 1, kind: input, shape index: {}]   ;;  %s12434_s2 = inlined_call_operand.vmem [shape: f32[4,8,1], index: 2, kind: input, shape index: {}]   ;;  %s12435_s3 = inlined_call_operand.vmem [shape: f32[4,1,2560], index: 3, kind: input, shape index: {}]   ;;  %s12436_s4 = inlined_call_operand.vmem [shape: f32[1,1,2560], index: 4, kind: output, shape index: {}]  }
   0x1   :  { %v7842_v0 = vld [vmem:[%s12432_s0 + $0x8] sm:$0xff]  ;;  %v7847_v1 = vld [vmem:[%s12432_s0 + $0x10] sm:$0xff]  ;;  %v7852_v2 = vld [vmem:[%s12432_s0] sm:$0xff]  ;;  %s7798_s25 = smov 96   ;;  %s7799_s26 = smov 94   ;;  %602 = vmatprep.mubr.f32.mxu0 %v12442_v12  ;;  %673 = vmatprep.mubr.f32.mxu1 %v12442_v12 }
   0x2   :  { %v6327_v3 = vpack.i.bf16 %v7847_v1, %v7842_v0  ;;  %v7859_v4 = vld [vmem:[%s12432_s0 + $0x18] sm:$0xff]  ;;  %s7800_s27 = smov 95   ;;  %s7801_s28 = smov 63   ;;  %v7878_v6 = vld [vmem:[%s12432_s0 + $0x30] sm:$0xff]  ;;  %v7888_v8 = vld [vmem:[%s12432_s0 + $0x20] sm:$0xff]  ;;  %v8012_v26 = vand.u32 127, %v12437_v25 }
   0x3   :  { %v6322_v5 = vpack.i.bf16 %v7859_v4, %v7852_v2  ;;  %s7802_s29 = smov 64   ;;  %v7883_v7 = vld [vmem:[%s12432_s0 + $0x38] sm:$0xff]  ;;  %v7893_v9 = vld [vmem:[%s12432_s0 + $0x28] sm:$0xff]  ;;  %s7804_s12 = smov 62   ;;  %v7923_v13 = vld [vmem:[%s12432_s0 + $0x40] sm:$0xff] }
   0x4   :  { %6328 = vrot.lane.b32.xlu1 %v6327_v3, %s7796_s23  ;;  %6318 = vrot.lane.b32.xlu0 %v6327_v3, %s7797_s24  ;;  %v6392_v10 = vpack.i.bf16 %v7883_v7, %v7878_v6  ;;  %v6387_v11 = vpack.i.bf16 %v7893_v9, %v7888_v8  ;;  %v7928_v14 = vld [vmem:[%s12432_s0 + $0x48] sm:$0xff]  ;;  %v7939_v16 = vld [vmem:[%s12432_s0 + $0x50] sm:$0xff]  ;;  %vm79_vm0 = vcmp.lt.s32.totalorder %v8012_v26, 127  ;;  %vm140_vm1 = vcmp.lt.s32.totalorder %v8012_v26, 126  ;;  %s7807_s22 = smov 66   ;;  %s7808_s30 = smov 34  }
   0x5   :  { %v6457_v15 = vpack.i.bf16 %v7928_v14, %v7923_v13  ;;  %v7944_v17 = vld [vmem:[%s12432_s0 + $0x58] sm:$0xff]  ;;  %v7969_v19 = vld [vmem:[%s12432_s0 + $0x60] sm:$0xff]  ;;  %v7974_v20 = vld [vmem:[%s12432_s0 + $0x68] sm:$0xff]  ;;  %vm201_vm2 = vcmp.lt.s32.totalorder %v8012_v26, 96  ;;  %vm262_vm3 = vcmp.lt.s32.totalorder %v8012_v26, 95  ;;  %vm323_vm4 = vcmp.lt.s32.totalorder %v8012_v26, 94 }
   0x6   :  { %v6462_v18 = vpack.i.bf16 %v7944_v17, %v7939_v16  ;;  %v7980_v21 = vpack.i.bf16 %v7974_v20, %v7969_v19  ;;  %v7988_v22 = vld [vmem:[%s12432_s0 + $0x70] sm:$0xff]  ;;  %v7993_v23 = vld [vmem:[%s12432_s0 + $0x78] sm:$0xff]  ;;  %v8083_v51 = vld [vmem:[%s12432_s0 + $0x80] sm:$0xff]  ;;  %vm384_vm5 = vcmp.lt.s32.totalorder %v8012_v26, 64  ;;  %vm445_vm6 = vcmp.lt.s32.totalorder %v8012_v26, 63  ;;  %s7809_s5 = smov 32  }
   0x7   :  { %v8001_v24 = vpack.i.bf16 %v7993_v23, %v7988_v22  ;;  %v8088_v52 = vld [vmem:[%s12432_s0 + $0x88] sm:$0xff]  ;;  %vm506_vm7 = vcmp.lt.s32.totalorder %v8012_v26, 62  ;;  %s7810_s6 = smov 33   ;;  %s7811_s7 = smov 1   ;;  %vm2844_vm9 = vcmp.lt.s32.totalorder %v8012_v26, 65  ;;  %vm2783_vm10 = vcmp.lt.s32.totalorder %v8012_v26, 66 }
   0x8   :  { %6333 = vrot.lane.b32.xlu1 %v6327_v3, %s7798_s25  ;;  %6323 = vrot.lane.b32.xlu0 %v6322_v5, %s7797_s24  ;;  %v8104_v60 = vpack.i.bf16 %v8088_v52, %v8083_v51  ;;  %s7812_s8 = smov 2   ;;  %vm2965_vm11 = vcmp.lt.s32.totalorder %v8012_v26, 34  ;;  %vm3087_vm12 = vcmp.lt.s32.totalorder %v8012_v26, 32  ;;  %vm3026_vm13 = vcmp.lt.s32.totalorder %v8012_v26, 33 }
   0x9   :  { %vm3209_vm14 = vcmp.lt.s32.totalorder %v8012_v26, 1  ;;  %vm3148_vm15 = vcmp.lt.s32.totalorder %v8012_v26, 2  ;;  %v5656_v26 = vld [vmem:[%s12435_s3 + $0x3c] sm:$0xff] }
   0xc   :  { %6343 = vrot.lane.b32.xlu1 %v6322_v5, %s7798_s25  ;;  %6338 = vrot.lane.b32.xlu0 %v6322_v5, %s7796_s23 }
  0x10   :  { %6353 = vrot.lane.b32.xlu1 %v6327_v3, %s7799_s26  ;;  %6348 = vrot.lane.b32.xlu0 %v6327_v3, %s7800_s27 }
  0x14   :  { %6363 = vrot.lane.b32.xlu1 %v6322_v5, %s7799_s26  ;;  %6358 = vrot.lane.b32.xlu0 %v6322_v5, %s7800_s27 }
  0x18   :  { %6373 = vrot.lane.b32.xlu1 %v6327_v3, %s7801_s28  ;;  %6368 = vrot.lane.b32.xlu0 %v6327_v3, %s7802_s29 }
  0x1c   :  { %6383 = vrot.lane.b32.xlu1 %v6322_v5, %s7801_s28  ;;  %6378 = vrot.lane.b32.xlu0 %v6322_v5, %s7802_s29 }
  0x20   :  { %6393 = vrot.lane.b32.xlu1 %v6392_v10, %s7797_s24  ;;  %6388 = vrot.lane.b32.xlu0 %v6387_v11, %s7797_s24 }
  0x24   :  { %470 = vrot.lane.b32.xlu1 %v7847_v1, %s7804_s12  ;;  %468 = vrot.lane.b32.xlu0 %v7842_v0, %s7804_s12 }
  0x28   :  { %6398 = vrot.lane.b32.xlu1 %v6387_v11, %s7796_s23  ;;  %466 = vrot.lane.b32.xlu0 %v7852_v2, %s7804_s12 }
  0x2c   :  { %6408 = vrot.lane.b32.xlu1 %v6392_v10, %s7796_s23  ;;  %6403 = vrot.lane.b32.xlu0 %v6387_v11, %s7798_s25 }
  0x30   :  { %6418 = vrot.lane.b32.xlu1 %v6387_v11, %s7800_s27  ;;  %6413 = vrot.lane.b32.xlu0 %v6392_v10, %s7798_s25 }
  0x34   :  { %6428 = vrot.lane.b32.xlu1 %v6392_v10, %s7800_s27  ;;  %6423 = vrot.lane.b32.xlu0 %v6387_v11, %s7799_s26 }
  0x38   :  { %6438 = vrot.lane.b32.xlu1 %v6387_v11, %s7802_s29  ;;  %6433 = vrot.lane.b32.xlu0 %v6392_v10, %s7799_s26 }
  0x3c   :  { %6448 = vrot.lane.b32.xlu1 %v6392_v10, %s7802_s29  ;;  %6443 = vrot.lane.b32.xlu0 %v6387_v11, %s7801_s28 }
  0x40   :  { %6458 = vrot.lane.b32.xlu1 %v6457_v15, %s7797_s24  ;;  %6453 = vrot.lane.b32.xlu0 %v6392_v10, %s7801_s28 }
  0x44   :  { %474 = vrot.lane.b32.xlu1 %v7888_v8, %s7804_s12  ;;  %472 = vrot.lane.b32.xlu0 %v7859_v4, %s7804_s12 }
  0x48   :  { %476 = vrot.lane.b32.xlu1 %v7893_v9, %s7804_s12  ;;  %6463 = vrot.lane.b32.xlu0 %v6462_v18, %s7797_s24 }
  0x4c   :  { %6468 = vrot.lane.b32.xlu1 %v6457_v15, %s7796_s23  ;;  %478 = vrot.lane.b32.xlu0 %v7878_v6, %s7804_s12 }
  0x50   :  { %6478 = vrot.lane.b32.xlu1 %v6462_v18, %s7796_s23  ;;  %6473 = vrot.lane.b32.xlu0 %v6457_v15, %s7798_s25 }
  0x54   :  { %6488 = vrot.lane.b32.xlu1 %v6457_v15, %s7800_s27  ;;  %6483 = vrot.lane.b32.xlu0 %v6462_v18, %s7798_s25 }
  0x58   :  { %6498 = vrot.lane.b32.xlu1 %v6462_v18, %s7800_s27  ;;  %6493 = vrot.lane.b32.xlu0 %v6457_v15, %s7799_s26 }
  0x5c   :  { %6508 = vrot.lane.b32.xlu1 %v6457_v15, %s7802_s29  ;;  %6503 = vrot.lane.b32.xlu0 %v6462_v18, %s7799_s26 }
  0x60   :  { %6518 = vrot.lane.b32.xlu1 %v6462_v18, %s7802_s29  ;;  %6513 = vrot.lane.b32.xlu0 %v6457_v15, %s7801_s28 }
  0x64   :  { %6528 = vrot.lane.b32.xlu1 %v7980_v21, %s7797_s24  ;;  %6523 = vrot.lane.b32.xlu0 %v6462_v18, %s7801_s28 }
  0x68   :  { %482 = vrot.lane.b32.xlu1 %v7923_v13, %s7804_s12  ;;  %480 = vrot.lane.b32.xlu0 %v7883_v7, %s7804_s12 }
  0x6c   :  { %484 = vrot.lane.b32.xlu1 %v7928_v14, %s7804_s12  ;;  %6533 = vrot.lane.b32.xlu0 %v8001_v24, %s7797_s24 }
  0x70   :  { %6538 = vrot.lane.b32.xlu1 %v7980_v21, %s7796_s23  ;;  %486 = vrot.lane.b32.xlu0 %v7939_v16, %s7804_s12 }
  0x74   :  { %6548 = vrot.lane.b32.xlu1 %v8001_v24, %s7796_s23  ;;  %6543 = vrot.lane.b32.xlu0 %v7980_v21, %s7798_s25 }
  0x76   :  { %v8018_v27 = vpop.permute.xlu1 %6328  ;;  %v8020_v28 = vpop.permute.xlu0 %6318 }
  0x77   :  { %v6321_v29 = vunpack.i.h.bf16 %v8020_v28  ;;  %v6320_v30 = vunpack.i.l.bf16 %v8020_v28  ;;  %v6331_v31 = vunpack.i.h.bf16 %v8018_v27  ;;  %v6330_v32 = vunpack.i.l.bf16 %v8018_v27 }
  0x78   :  { %6558 = vrot.lane.b32.xlu1 %v7980_v21, %s7800_s27  ;;  %6553 = vrot.lane.b32.xlu0 %v8001_v24, %s7798_s25 }
  0x79   :  { %v97_v33 = vsel %vm79_vm0, %v6320_v30, %v6321_v29  ;;  %v158_v41 = vsel %vm140_vm1, %v6330_v32, %v6331_v31 }
  0x7a   :  { %v8035_v34 = vpop.permute.xlu1 %6333  ;;  %v8037_v35 = vpop.permute.xlu0 %6323  ;;  %v5659_v36 = vpack.c.bf16 %v97_v33, %v7842_v0 }
  0x7b   :  { %v6336_v37 = vunpack.i.h.bf16 %v8035_v34  ;;  %v6335_v38 = vunpack.i.l.bf16 %v8035_v34  ;;  %v6325_v39 = vunpack.i.l.bf16 %v8037_v35 }
  0x7c   :  { %5660 = vmatprep.subr.bf16.mxu0 %v5659_v36  ;;  %6568 = vrot.lane.b32.xlu1 %v8001_v24, %s7800_s27 }
  0x7d   :  { %6563 = vrot.lane.b32.xlu0 %v7980_v21, %s7799_s26  ;;  %v98_v40 = vsel %vm79_vm0, %v6325_v39, %v6320_v30  ;;  %v219_v42 = vsel %vm201_vm2, %v6335_v38, %v6336_v37  ;;  %v8147_v30 = vld [vmem:[%s12432_s0 + $0x98] sm:$0xff] }
  0x7e   :  { %v8061_v43 = vpop.permute.xlu1 %6343  ;;  %v8063_v44 = vpop.permute.xlu0 %6338  ;;  %v5661_v45 = vpack.c.bf16 %v98_v40, %v7852_v2  ;;  %v5663_v46 = vpack.c.bf16 %v219_v42, %v158_v41 }
  0x7f   :  { %v6345_v47 = vunpack.i.l.bf16 %v8061_v43  ;;  %v6340_v48 = vunpack.i.l.bf16 %v8063_v44 }
  0x80   :  { %6578 = vrot.lane.b32.xlu1 %v7980_v21, %s7802_s29  ;;  %5662 = vmatpush1.bf16.msra.mxu0 %v5661_v45  ;;  %v7805_v45 = vmov 0  }
  0x81   :  { %6573 = vrot.lane.b32.xlu0 %v8001_v24, %s7799_s26  ;;  %5664 = vmatprep.subr.bf16.mxu0 %v5663_v46  ;;  %v159_v49 = vsel %vm140_vm1, %v6340_v48, %v6330_v32  ;;  %v220_v50 = vsel %vm201_vm2, %v6345_v47, %v6335_v38 }
  0x82   :  { %v8090_v53 = vpop.permute.xlu1 %6353  ;;  %v8092_v54 = vpop.permute.xlu0 %6348  ;;  %v5665_v55 = vpack.c.bf16 %v220_v50, %v159_v49  ;;  %7003 = vset.pattern.permute.xlu1 %v7805_v45  ;;  %6667 = vset.pattern.permute.xlu0 %v7805_v45 }
  0x83   :  { %v6356_v56 = vunpack.i.h.bf16 %v8090_v53  ;;  %v6355_v57 = vunpack.i.l.bf16 %v8090_v53  ;;  %v6351_v58 = vunpack.i.h.bf16 %v8092_v54  ;;  %v6350_v59 = vunpack.i.l.bf16 %v8092_v54 }
  0x84   :  { %6588 = vrot.lane.b32.xlu1 %v8001_v24, %s7802_s29  ;;  %5666 = vmatpush1.bf16.msra.mxu0 %v5665_v55 }
  0x85   :  { %6583 = vrot.lane.b32.xlu0 %v7980_v21, %s7801_s28  ;;  %v280_v61 = vsel %vm262_vm3, %v6350_v59, %v6351_v58  ;;  %v341_v62 = vsel %vm323_vm4, %v6355_v57, %v6356_v56 }
  0x86   :  { %v8116_v63 = vpop.permute.xlu1 %6363  ;;  %v8118_v0 = vpop.permute.xlu0 %6358  ;;  %v5667_v2 = vpack.c.bf16 %v341_v62, %v280_v61 }
  0x87   :  { %v6365_v3 = vunpack.i.l.bf16 %v8116_v63  ;;  %v6360_v5 = vunpack.i.l.bf16 %v8118_v0  ;;  %v6361_v25 = vunpack.i.h.bf16 %v8118_v0 }
  0x88   :  { %6598 = vrot.lane.b32.xlu1 %v8104_v60, %s7797_s24  ;;  %5668 = vmatprep.subr.bf16.mxu0 %v5667_v2 }
  0x89   :  { %6593 = vrot.lane.b32.xlu0 %v8001_v24, %s7801_s28  ;;  %v281_v10 = vsel %vm262_vm3, %v6360_v5, %v6350_v59  ;;  %v342_v11 = vsel %vm323_vm4, %v6365_v3, %v6355_v57  ;;  %v8142_v24 = vld [vmem:[%s12432_s0 + $0x90] sm:$0xff]  ;;  %v6326_v59 = vunpack.i.h.bf16 %v8037_v35 }
  0x8a   :  { %v8135_v15 = vpop.permute.xlu1 %6373  ;;  %v8137_v18 = vpop.permute.xlu0 %6368  ;;  %v5669_v21 = vpack.c.bf16 %v342_v11, %v281_v10  ;;  %v8160_v40 = vpack.i.bf16 %v8147_v30, %v8142_v24 }
  0x8b   :  { %v6376_v32 = vunpack.i.h.bf16 %v8135_v15  ;;  %v6375_v33 = vunpack.i.l.bf16 %v8135_v15  ;;  %v6371_v36 = vunpack.i.h.bf16 %v8137_v18  ;;  %v6370_v38 = vunpack.i.l.bf16 %v8137_v18 }
  0x8c   :  { %490 = vrot.lane.b32.xlu1 %v7969_v19, %s7804_s12  ;;  %5670 = vmatpush1.bf16.msra.mxu0 %v5669_v21 }
  0x8d   :  { %488 = vrot.lane.b32.xlu0 %v7944_v17, %s7804_s12  ;;  %v402_v41 = vsel %vm384_vm5, %v6370_v38, %v6371_v36  ;;  %v463_v42 = vsel %vm445_vm6, %v6375_v33, %v6376_v32 }
  0x8e   :  { %v8170_v46 = vpop.permute.xlu1 %6383  ;;  %v8172_v49 = vpop.permute.xlu0 %6378  ;;  %v5671_v50 = vpack.c.bf16 %v463_v42, %v402_v41 }
  0x8f   :  { %v12440_v55 = vunpack.i.l.bf16 %v8170_v46  ;;  %v12439_v57 = vunpack.i.l.bf16 %v8172_v49  ;;  %v12628_v0 = vunpack.i.l.bf16 %v8170_v46 }
  0x90   :  { %492 = vrot.lane.b32.xlu1 %v7974_v20, %s7804_s12  ;;  %5672 = vmatprep.subr.bf16.mxu0 %v5671_v50 }
  0x91   :  { %6603 = vrot.lane.b32.xlu0 %v8160_v40, %s7797_s24  ;;  %v403_v61 = vsel %vm384_vm5, %v12439_v57, %v6370_v38  ;;  %v464_v62 = vsel %vm445_vm6, %v12440_v55, %v6375_v33  ;;  %v96_v38 = vsel %vm79_vm0, %v6321_v29, %v6326_v59  ;;  %v279_v55 = vsel %vm262_vm3, %v6351_v58, %v6361_v25 }
  0x92   :  { %v8189_v2 = vpop.permute.xlu1 %6393  ;;  %v6389_v10 = vpop.permute.xlu0 %6388  ;;  %v5673_v11 = vpack.c.bf16 %v464_v62, %v403_v61 }
  0x93   :  { %v6390_v21 = vunpack.i.l.bf16 %v6389_v10  ;;  %v6395_v41 = vunpack.i.l.bf16 %v8189_v2  ;;  %v6391_v42 = vunpack.i.h.bf16 %v6389_v10 }
  0x94   :  { %6608 = vrot.lane.b32.xlu1 %v8104_v60, %s7796_s23  ;;  %5674 = vmatpush1.bf16.msra.mxu0 %v5673_v11  ;;  %v8229_v11 = vld [vmem:[%s12433_s1] sm:$0xff] }
  0x95   :  { %494 = vrot.lane.b32.xlu0 %v7988_v22, %s7804_s12  ;;  %v95_v33 = vsel %vm79_vm0, %v6326_v59, %v6390_v21  ;;  %v5677_v22 = vpack.c.bf16 %v96_v38, %v7847_v1  ;;  %v93_v28 = vsel %vm79_vm0, %v6391_v42, %v6395_v41 }
  0x96   :  { %v8203_v45 = vpop.permute.xlu1 %470  ;;  %v469_v50 = vpop.permute.xlu0 %468  ;;  %v5675_v61 = vpack.c.bf16 %v95_v33, %v7859_v4  ;;  %v94_v4 = vsel %vm79_vm0, %v6390_v21, %v6391_v42  ;;  %v5691_v10 = vpack.c.bf16 %v93_v28, %v7893_v9  ;;  %v6346_v33 = vunpack.i.h.bf16 %v8061_v43 }
  0x97   :  { %v524_v62 = vsel %vm506_vm7, %v469_v50, %v8203_v45  ;;  %v6341_v21 = vunpack.i.h.bf16 %v8063_v44  ;;  %v5693_v9 = vpack.c.bf16 %v94_v4, %v7888_v8 }
  0x98   :  { %6618 = vrot.lane.b32.xlu1 %v8160_v40, %s7796_s23  ;;  %554 = vmatprep.subr.mxu0 %v524_v62  ;;  %v218_v8 = vsel %vm201_vm2, %v6336_v37, %v6346_v33  ;;  %v6366_v37 = vunpack.i.h.bf16 %v8116_v63 }
  0x99   :  { %6613 = vrot.lane.b32.xlu0 %v8104_v60, %s7798_s25  ;;  %5676 = vmatprep.subr.bf16.mxu1 %v5675_v61 }
  0x9a   :  { %5678 = vmatpush1.bf16.msra.mxu1 %v5677_v22  ;;  %v6399_v29 = vpop.permute.xlu1 %6398  ;;  %v8220_v59 = vpop.permute.xlu0 %466  ;;  %v157_v22 = vsel %vm140_vm1, %v6331_v31, %v6341_v21 }
  0x9b   :  { %v525_v1 = vsel %vm506_vm7, %v8220_v59, %v469_v50  ;;  %v6400_v42 = vunpack.i.l.bf16 %v6399_v29  ;;  %v6401_v27 = vunpack.i.h.bf16 %v6399_v29 }
  0x9c   :  { %6628 = vrot.lane.b32.xlu1 %v8104_v60, %s7800_s27  ;;  %555 = vmatpush1.msra.mxu0 %v525_v1 }
  0x9d   :  { %6623 = vrot.lane.b32.xlu0 %v8160_v40, %s7798_s25  ;;  %5692 = vmatprep.subr.bf16.mxu0 %v5691_v10  ;;  %v156_v4 = vsel %vm140_vm1, %v6341_v21, %v6400_v42 }
  0x9e   :  { %v8238_v38 = vpop.permute.xlu1 %6408  ;;  %v6404_v50 = vpop.permute.xlu0 %6403  ;;  %5604 = vmatmul.mubr.msk.f32.vlgmr.msra.gmra.mrb[0].mxu0 %vm534_vm8, %v8229_v11 }
  0x9f   :  { %v6405_v61 = vunpack.i.l.bf16 %v6404_v50  ;;  %5694 = vmatpush1.bf16.msra.mxu0 %v5693_v9  ;;  %744 = vmatprep.mubr.f32.mxu0 %v12442_v12  ;;  %v6406_v62 = vunpack.i.h.bf16 %v6404_v50  ;;  %v6410_v28 = vunpack.i.l.bf16 %v8238_v38  ;;  %v5681_v50 = vpack.c.bf16 %v218_v8, %v157_v22 }
  0xa0   :  { %6638 = vrot.lane.b32.xlu1 %v8160_v40, %s7800_s27 }
  0xa1   :  { %6633 = vrot.lane.b32.xlu0 %v8104_v60, %s7799_s26  ;;  %v217_v1 = vsel %vm201_vm2, %v6346_v33, %v6405_v61  ;;  %v216_v57 = vsel %vm201_vm2, %v6405_v61, %v6406_v62  ;;  %v154_v29 = vsel %vm140_vm1, %v6401_v27, %v6410_v28  ;;  %v155_v61 = vsel %vm140_vm1, %v6400_v42, %v6401_v27 }
  0xa2   :  { %v6419_v10 = vpop.permute.xlu1 %6418  ;;  %v8260_v9 = vpop.permute.xlu0 %6413  ;;  %v5679_v31 = vpack.c.bf16 %v217_v1, %v156_v4  ;;  %v340_v42 = vsel %vm323_vm4, %v6356_v56, %v6366_v37 }
  0xa3   :  { %v6415_v34 = vunpack.i.l.bf16 %v8260_v9  ;;  %v6420_v33 = vunpack.i.l.bf16 %v6419_v10  ;;  %v6421_v27 = vunpack.i.h.bf16 %v6419_v10  ;;  %v5685_v56 = vpack.c.bf16 %v340_v42, %v279_v55 }
  0xa4   :  { %6648 = vrot.lane.b32.xlu1 %v8104_v60, %s7802_s29  ;;  %5680 = vmatprep.subr.bf16.mxu1 %v5679_v31  ;;  %v5697_v31 = vpack.c.bf16 %v216_v57, %v155_v61  ;;  %v6386_v61 = vunpack.i.h.bf16 %v8170_v46 }
  0xa5   :  { %6643 = vrot.lane.b32.xlu0 %v8160_v40, %s7799_s26  ;;  %5682 = vmatpush1.bf16.msra.mxu1 %v5681_v50  ;;  %v215_v21 = vsel %vm201_vm2, %v6406_v62, %v6415_v34  ;;  %v278_v57 = vsel %vm262_vm3, %v6361_v25, %v6420_v33 }
  0xa6   :  { %v8281_v22 = vpop.permute.xlu1 %6428  ;;  %v6424_v8 = vpop.permute.xlu0 %6423  ;;  %v5695_v4 = vpack.c.bf16 %v215_v21, %v154_v29 }
  0xa7   :  { %v6425_v1 = vunpack.i.l.bf16 %v6424_v8  ;;  %v6426_v50 = vunpack.i.h.bf16 %v6424_v8  ;;  %v6430_v62 = vunpack.i.l.bf16 %v8281_v22  ;;  %v6381_v8 = vunpack.i.h.bf16 %v8172_v49 }
  0xa8   :  { %6658 = vrot.lane.b32.xlu1 %v8160_v40, %s7802_s29  ;;  %5696 = vmatprep.subr.bf16.mxu0 %v5695_v4 }
  0xa9   :  { %6653 = vrot.lane.b32.xlu0 %v8104_v60, %s7801_s28  ;;  %5698 = vmatpush1.bf16.msra.mxu0 %v5697_v31  ;;  %v339_v54 = vsel %vm323_vm4, %v6366_v37, %v6425_v1  ;;  %v338_v60 = vsel %vm323_vm4, %v6425_v1, %v6426_v50  ;;  %v276_v55 = vsel %vm262_vm3, %v6421_v27, %v6430_v62 }
  0xaa   :  { %v6439_v29 = vpop.permute.xlu1 %6438  ;;  %v8300_v58 = vpop.permute.xlu0 %6433  ;;  %v5683_v53 = vpack.c.bf16 %v339_v54, %v278_v57  ;;  %v277_v37 = vsel %vm262_vm3, %v6420_v33, %v6421_v27  ;;  %v401_v57 = vsel %vm384_vm5, %v6371_v36, %v6381_v8  ;;  %v462_v33 = vsel %vm445_vm6, %v6376_v32, %v6386_v61 }
  0xab   :  { %v6435_v21 = vunpack.i.l.bf16 %v8300_v58  ;;  %v6440_v25 = vunpack.i.l.bf16 %v6439_v29  ;;  %v6396_v27 = vunpack.i.h.bf16 %v8189_v2  ;;  %v6441_v36 = vunpack.i.h.bf16 %v6439_v29 }
  0xac   :  { %496 = vrot.lane.b32.xlu1 %v7993_v23, %s7804_s12  ;;  %5684 = vmatprep.subr.bf16.mxu1 %v5683_v53 }
  0xad   :  { %6663 = vrot.lane.b32.xlu0 %v8160_v40, %s7801_s28  ;;  %5686 = vmatpush1.bf16.msra.mxu1 %v5685_v56  ;;  %v337_v10 = vsel %vm323_vm4, %v6426_v50, %v6435_v21  ;;  %v5701_v40 = vpack.c.bf16 %v338_v60, %v277_v37  ;;  %v400_v54 = vsel %vm384_vm5, %v6381_v8, %v6440_v25 }
  0xae   :  { %v8321_v23 = vpop.permute.xlu1 %6448  ;;  %v6444_v4 = vpop.permute.xlu0 %6443  ;;  %v5699_v1 = vpack.c.bf16 %v337_v10, %v276_v55  ;;  %v5689_v55 = vpack.c.bf16 %v462_v33, %v401_v57  ;;  %v399_v8 = vsel %vm384_vm5, %v6440_v25, %v6441_v36 }
  0xaf   :  { %v6445_v31 = vunpack.i.l.bf16 %v6444_v4  ;;  %v6446_v42 = vunpack.i.h.bf16 %v6444_v4  ;;  %v6450_v50 = vunpack.i.l.bf16 %v8321_v23 }
  0xb0   :  { %500 = vrot.lane.b32.xlu1 %v8088_v52, %s7804_s12  ;;  %5700 = vmatprep.subr.bf16.mxu0 %v5699_v1 }
  0xb1   :  { %498 = vrot.lane.b32.xlu0 %v8083_v51, %s7804_s12  ;;  %5702 = vmatpush1.bf16.msra.mxu0 %v5701_v40  ;;  %v461_v18 = vsel %vm445_vm6, %v6386_v61, %v6445_v31  ;;  %v460_v10 = vsel %vm445_vm6, %v6445_v31, %v6446_v42  ;;  %v398_v29 = vsel %vm384_vm5, %v6441_v36, %v6450_v50 }
  0xb2   :  { %v6459_v53 = vpop.permute.xlu1 %6458  ;;  %v8341_v15 = vpop.permute.xlu0 %6453  ;;  %v5687_v56 = vpack.c.bf16 %v461_v18, %v400_v54  ;;  %v5705_v2 = vpack.c.bf16 %v460_v10, %v399_v8 }
  0xb3   :  { %v6460_v32 = vunpack.i.l.bf16 %v6459_v53  ;;  %v6455_v60 = vunpack.i.l.bf16 %v8341_v15  ;;  %v6461_v57 = vunpack.i.h.bf16 %v6459_v53  ;;  %v6416_v53 = vunpack.i.h.bf16 %v8260_v9 }
  0xb4   :  { %504 = vrot.lane.b32.xlu1 %v8147_v30, %s7804_s12  ;;  %5688 = vmatprep.subr.bf16.mxu1 %v5687_v56  ;;  %v92_v30 = vsel %vm79_vm0, %v6395_v41, %v6396_v27 }
  0xb5   :  { %502 = vrot.lane.b32.xlu0 %v8142_v24, %s7804_s12  ;;  %5690 = vmatpush1.bf16.msra.mxu1 %v5689_v55  ;;  %v459_v61 = vsel %vm445_vm6, %v6446_v42, %v6455_v60  ;;  %v91_v1 = vsel %vm79_vm0, %v6396_v27, %v6460_v32  ;;  %v5709_v25 = vpack.c.bf16 %v92_v30, %v7878_v6  ;;  %v528_v42 = vld [vmem:[%s12434_s2] sm:$0xff] }
  0xb6   :  { %v475_v24 = vpop.permute.xlu1 %474  ;;  %v473_v37 = vpop.permute.xlu0 %472  ;;  %v5703_v4 = vpack.c.bf16 %v459_v61, %v398_v29  ;;  %v5707_v41 = vpack.c.bf16 %v91_v1, %v7883_v7  ;;  %v90_v7 = vsel %vm79_vm0, %v6460_v32, %v6461_v57  ;;  %v6411_v32 = vunpack.i.h.bf16 %v8238_v38 }
  0xb7   :  { %v522_v31 = vsel %vm506_vm7, %v473_v37, %v475_v24  ;;  %v523_v40 = vsel %vm506_vm7, %v8203_v45, %v473_v37  ;;  %v5725_v29 = vpack.c.bf16 %v90_v7, %v7923_v13 }
  0xb8   :  { %625 = vmatprep.subr.mxu1 %v522_v31  ;;  %5704 = vmatprep.subr.bf16.mxu0 %v5703_v4  ;;  %v153_v1 = vsel %vm140_vm1, %v6410_v28, %v6411_v32 }
  0xb9   :  { %626 = vmatpush1.msra.mxu1 %v523_v40  ;;  %5706 = vmatpush1.bf16.msra.mxu0 %v5705_v2 }
  0xba   :  { %v477_v33 = vpop.permute.xlu1 %476  ;;  %v8376_v54 = vpop.permute.xlu0 %6463  ;;  %5605 = vmatmul.mubr.msk.f32.vlgmr.msra.gmra.mrb[0].mxu1 %vm534_vm8, %v8229_v11  ;;  %5708 = vmatprep.subr.bf16.mxu1 %v5707_v41 }
  0xbb   :  { %v6465_v45 = vunpack.i.l.bf16 %v8376_v54  ;;  %5710 = vmatpush1.bf16.msra.mxu1 %v5709_v25  ;;  %815 = vmatprep.mubr.f32.mxu1 %v12442_v12  ;;  %v521_v56 = vsel %vm506_vm7, %v475_v24, %v477_v33  ;;  %v6436_v25 = vunpack.i.h.bf16 %v8300_v58 }
  0xbc   :  { %531 = vperm.xlu0 %6667, %v528_v42  }
  0xbd   :  { %v89_v6 = vsel %vm79_vm0, %v6461_v57, %v6465_v45 }
  0xbe   :  { %v6469_v18 = vpop.permute.xlu1 %6468  ;;  %v8388_v27 = vpop.permute.xlu0 %478  ;;  %v5723_v55 = vpack.c.bf16 %v89_v6, %v7928_v14  ;;  %v214_v14 = vsel %vm201_vm2, %v6415_v34, %v6416_v53 }
  0xbf   :  { %v520_v36 = vsel %vm506_vm7, %v477_v33, %v8388_v27  ;;  %v6470_v10 = vunpack.i.l.bf16 %v6469_v18  ;;  %v6471_v31 = vunpack.i.h.bf16 %v6469_v18  ;;  %v5713_v41 = vpack.c.bf16 %v214_v14, %v153_v1 }
  0xc0   :  { %696 = vmatprep.subr.mxu0 %v520_v36  ;;  %v6431_v33 = vunpack.i.h.bf16 %v8281_v22  ;;  %v6456_v1 = vunpack.i.h.bf16 %v8341_v15  ;;  %v6466_v15 = vunpack.i.h.bf16 %v8376_v54 }
  0xc1   :  { %697 = vmatpush1.msra.mxu0 %v521_v56  ;;  %v152_v37 = vsel %vm140_vm1, %v6411_v32, %v6470_v10  ;;  %v151_v6 = vsel %vm140_vm1, %v6470_v10, %v6471_v31 }
  0xc2   :  { %v8399_v61 = vpop.permute.xlu1 %6478  ;;  %v6474_v30 = vpop.permute.xlu0 %6473  ;;  %5606 = vmatmul.mubr.msk.f32.vlgmr.msra.gmra.mrb[2].mxu0 %vm534_vm8, %v8229_v11  ;;  %5724 = vmatprep.subr.bf16.mxu0 %v5723_v55  ;;  %v336_v55 = vsel %vm323_vm4, %v6435_v21, %v6436_v25 }
  0xc3   :  { %v6475_v8 = vunpack.i.l.bf16 %v6474_v30  ;;  %5726 = vmatpush1.bf16.msra.mxu0 %v5725_v29  ;;  %886 = vmatprep.mubr.f32.mxu0 %v12442_v12  ;;  %v6476_v24 = vunpack.i.h.bf16 %v6474_v30  ;;  %v6480_v13 = vunpack.i.l.bf16 %v8399_v61 }
  0xc5   :  { %v213_v4 = vsel %vm201_vm2, %v6416_v53, %v6475_v8  ;;  %v212_v42 = vsel %vm201_vm2, %v6475_v8, %v6476_v24  ;;  %v150_v38 = vsel %vm140_vm1, %v6471_v31, %v6480_v13  ;;  %v275_v8 = vsel %vm262_vm3, %v6430_v62, %v6431_v33 }
  0xc6   :  { %v6489_v40 = vpop.permute.xlu1 %6488  ;;  %v8417_v9 = vpop.permute.xlu0 %6483  ;;  %v5711_v2 = vpack.c.bf16 %v213_v4, %v152_v37  ;;  %v5729_v56 = vpack.c.bf16 %v212_v42, %v151_v6  ;;  %v5717_v4 = vpack.c.bf16 %v336_v55, %v275_v8  ;;  %v458_v6 = vsel %vm445_vm6, %v6455_v60, %v6456_v1 }
  0xc7   :  { %v6485_v34 = vunpack.i.l.bf16 %v8417_v9  ;;  %v6490_v57 = vunpack.i.l.bf16 %v6489_v40  ;;  %v6491_v58 = vunpack.i.h.bf16 %v6489_v40  ;;  %v6451_v40 = vunpack.i.h.bf16 %v8321_v23 }
  0xc8   :  { %5712 = vmatprep.subr.bf16.mxu1 %v5711_v2 }
  0xc9   :  { %5714 = vmatpush1.bf16.msra.mxu1 %v5713_v41  ;;  %v211_v28 = vsel %vm201_vm2, %v6476_v24, %v6485_v34  ;;  %v274_v30 = vsel %vm262_vm3, %v6431_v33, %v6490_v57  ;;  %v273_v41 = vsel %vm262_vm3, %v6490_v57, %v6491_v58 }
  0xca   :  { %v8434_v7 = vpop.permute.xlu1 %6498  ;;  %v6494_v18 = vpop.permute.xlu0 %6493  ;;  %v5727_v36 = vpack.c.bf16 %v211_v28, %v150_v38 }
  0xcb   :  { %v6495_v53 = vunpack.i.l.bf16 %v6494_v18  ;;  %v6496_v29 = vunpack.i.h.bf16 %v6494_v18  ;;  %v6500_v32 = vunpack.i.l.bf16 %v8434_v7 }
  0xcc   :  { %5728 = vmatprep.subr.bf16.mxu0 %v5727_v36 }
  0xcd   :  { %5730 = vmatpush1.bf16.msra.mxu0 %v5729_v56  ;;  %v335_v10 = vsel %vm323_vm4, %v6436_v25, %v6495_v53  ;;  %v334_v31 = vsel %vm323_vm4, %v6495_v53, %v6496_v29  ;;  %v272_v22 = vsel %vm262_vm3, %v6491_v58, %v6500_v32  ;;  %v397_v56 = vsel %vm384_vm5, %v6450_v50, %v6451_v40 }
  0xce   :  { %v6509_v14 = vpop.permute.xlu1 %6508  ;;  %v8449_v24 = vpop.permute.xlu0 %6503  ;;  %v5715_v21 = vpack.c.bf16 %v335_v10, %v274_v30  ;;  %v5733_v33 = vpack.c.bf16 %v334_v31, %v273_v41  ;;  %v5721_v58 = vpack.c.bf16 %v458_v6, %v397_v56 }
  0xcf   :  { %v6505_v37 = vunpack.i.l.bf16 %v8449_v24  ;;  %v6510_v2 = vunpack.i.l.bf16 %v6509_v14  ;;  %v6511_v55 = vunpack.i.h.bf16 %v6509_v14 }
  0xd0   :  { %5716 = vmatprep.subr.bf16.mxu1 %v5715_v21 }
  0xd1   :  { %5718 = vmatpush1.bf16.msra.mxu1 %v5717_v4  ;;  %v333_v62 = vsel %vm323_vm4, %v6496_v29, %v6505_v37  ;;  %v396_v53 = vsel %vm384_vm5, %v6451_v40, %v6510_v2  ;;  %v88_v4 = vsel %vm79_vm0, %v6465_v45, %v6466_v15 }
  0xd2   :  { %v8466_v25 = vpop.permute.xlu1 %6518  ;;  %v6514_v42 = vpop.permute.xlu0 %6513  ;;  %v5731_v38 = vpack.c.bf16 %v333_v62, %v272_v22  ;;  %v5741_v45 = vpack.c.bf16 %v88_v4, %v7939_v16 }
  0xd3   :  { %v6515_v28 = vunpack.i.l.bf16 %v6514_v42  ;;  %v6516_v18 = vunpack.i.h.bf16 %v6514_v42  ;;  %v6520_v36 = vunpack.i.l.bf16 %v8466_v25 }
  0xd4   :  { %5732 = vmatprep.subr.bf16.mxu0 %v5731_v38 }
  0xd5   :  { %5734 = vmatpush1.bf16.msra.mxu0 %v5733_v33  ;;  %v457_v57 = vsel %vm445_vm6, %v6456_v1, %v6515_v28  ;;  %v456_v21 = vsel %vm445_vm6, %v6515_v28, %v6516_v18  ;;  %v394_v23 = vsel %vm384_vm5, %v6511_v55, %v6520_v36  ;;  %v395_v1 = vsel %vm384_vm5, %v6510_v2, %v6511_v55 }
  0xd6   :  { %v6529_v60 = vpop.permute.xlu1 %6528  ;;  %v8482_v29 = vpop.permute.xlu0 %6523  ;;  %v5719_v30 = vpack.c.bf16 %v457_v57, %v396_v53  ;;  %v5737_v42 = vpack.c.bf16 %v456_v21, %v395_v1  ;;  %v6486_v53 = vunpack.i.h.bf16 %v8417_v9 }
  0xd7   :  { %v6530_v10 = vunpack.i.l.bf16 %v6529_v60  ;;  %v6525_v8 = vunpack.i.l.bf16 %v8482_v29  ;;  %v6531_v2 = vunpack.i.h.bf16 %v6529_v60  ;;  %v6481_v60 = vunpack.i.h.bf16 %v8399_v61 }
  0xd8   :  { %5720 = vmatprep.subr.bf16.mxu1 %v5719_v30 }
  0xd9   :  { %5722 = vmatpush1.bf16.msra.mxu1 %v5721_v58  ;;  %v455_v50 = vsel %vm445_vm6, %v6516_v18, %v6525_v8  ;;  %v87_v14 = vsel %vm79_vm0, %v6466_v15, %v6530_v10  ;;  %v86_v16 = vsel %vm79_vm0, %v6530_v10, %v6531_v2 }
  0xda   :  { %v483_v31 = vpop.permute.xlu1 %482  ;;  %v481_v22 = vpop.permute.xlu0 %480  ;;  %v5735_v62 = vpack.c.bf16 %v455_v50, %v394_v23  ;;  %v5739_v54 = vpack.c.bf16 %v87_v14, %v7944_v17  ;;  %v5757_v55 = vpack.c.bf16 %v86_v16, %v7969_v19  ;;  %v149_v14 = vsel %vm140_vm1, %v6480_v13, %v6481_v60 }
  0xdb   :  { %v518_v40 = vsel %vm506_vm7, %v481_v22, %v483_v31  ;;  %v519_v41 = vsel %vm506_vm7, %v8388_v27, %v481_v22 }
  0xdc   :  { %767 = vmatprep.subr.mxu1 %v518_v40  ;;  %5736 = vmatprep.subr.bf16.mxu0 %v5735_v62  ;;  %v6506_v40 = vunpack.i.h.bf16 %v8449_v24 }
  0xdd   :  { %768 = vmatpush1.msra.mxu1 %v519_v41  ;;  %5738 = vmatpush1.bf16.msra.mxu0 %v5737_v42 }
  0xde   :  { %v485_v38 = vpop.permute.xlu1 %484  ;;  %v8510_v28 = vpop.permute.xlu0 %6533  ;;  %5607 = vmatmul.mubr.msk.f32.vlgmr.msra.gmra.mrb[2].mxu1 %vm534_vm8, %v8229_v11  ;;  %5740 = vmatprep.subr.bf16.mxu1 %v5739_v54 }
  0xdf   :  { %v6535_v33 = vunpack.i.l.bf16 %v8510_v28  ;;  %5742 = vmatpush1.bf16.msra.mxu1 %v5741_v45  ;;  %957 = vmatprep.mubr.f32.mxu1 %v12442_v12  ;;  %v517_v57 = vsel %vm506_vm7, %v483_v31, %v485_v38 }
  0xe1   :  { %v85_v17 = vsel %vm79_vm0, %v6531_v2, %v6535_v33  ;;  %v6501_v2 = vunpack.i.h.bf16 %v8434_v7 }
  0xe2   :  { %v6539_v27 = vpop.permute.xlu1 %6538  ;;  %v8522_v6 = vpop.permute.xlu0 %486  ;;  %v5755_v56 = vpack.c.bf16 %v85_v17, %v7974_v20  ;;  %v210_v20 = vsel %vm201_vm2, %v6485_v34, %v6486_v53 }
  0xe3   :  { %v516_v18 = vsel %vm506_vm7, %v485_v38, %v8522_v6  ;;  %v6540_v15 = vunpack.i.l.bf16 %v6539_v27  ;;  %v6541_v4 = vunpack.i.h.bf16 %v6539_v27  ;;  %v5745_v22 = vpack.c.bf16 %v210_v20, %v149_v14 }
  0xe4   :  { %838 = vmatprep.subr.mxu0 %v516_v18  ;;  %v332_v27 = vsel %vm323_vm4, %v6505_v37, %v6506_v40  ;;  %v6526_v20 = vunpack.i.h.bf16 %v8482_v29 }
  0xe5   :  { %839 = vmatpush1.msra.mxu0 %v517_v57  ;;  %v148_v23 = vsel %vm140_vm1, %v6481_v60, %v6540_v15  ;;  %v147_v41 = vsel %vm140_vm1, %v6540_v15, %v6541_v4 }
  0xe6   :  { %v8533_v30 = vpop.permute.xlu1 %6548  ;;  %v6544_v10 = vpop.permute.xlu0 %6543  ;;  %5608 = vmatmul.mubr.msk.f32.vlgmr.msra.gmra.mrb[4].mxu0 %vm534_vm8, %v8229_v11  ;;  %5756 = vmatprep.subr.bf16.mxu0 %v5755_v56 }
  0xe7   :  { %v6545_v58 = vunpack.i.l.bf16 %v6544_v10  ;;  %5758 = vmatpush1.bf16.msra.mxu0 %v5757_v55  ;;  %1028 = vmatprep.mubr.f32.mxu0 %v12442_v12  ;;  %v6546_v21 = vunpack.i.h.bf16 %v6544_v10  ;;  %v6550_v19 = vunpack.i.l.bf16 %v8533_v30  ;;  %v271_v55 = vsel %vm262_vm3, %v6500_v32, %v6501_v2 }
  0xe9   :  { %v209_v50 = vsel %vm201_vm2, %v6486_v53, %v6545_v58  ;;  %v208_v62 = vsel %vm201_vm2, %v6545_v58, %v6546_v21  ;;  %v146_v61 = vsel %vm140_vm1, %v6541_v4, %v6550_v19  ;;  %v5749_v58 = vpack.c.bf16 %v332_v27, %v271_v55 }
  0xea   :  { %v6559_v1 = vpop.permute.xlu1 %6558  ;;  %v8551_v9 = vpop.permute.xlu0 %6553  ;;  %v5743_v31 = vpack.c.bf16 %v209_v50, %v148_v23  ;;  %v5761_v17 = vpack.c.bf16 %v208_v62, %v147_v41  ;;  %v6521_v23 = vunpack.i.h.bf16 %v8466_v25 }
  0xeb   :  { %v6555_v34 = vunpack.i.l.bf16 %v8551_v9  ;;  %v6560_v42 = vunpack.i.l.bf16 %v6559_v1  ;;  %v6561_v24 = vunpack.i.h.bf16 %v6559_v1 }
  0xec   :  { %5744 = vmatprep.subr.bf16.mxu1 %v5743_v31 }
  0xed   :  { %5746 = vmatpush1.bf16.msra.mxu1 %v5745_v22  ;;  %v207_v13 = vsel %vm201_vm2, %v6546_v21, %v6555_v34  ;;  %v270_v56 = vsel %vm262_vm3, %v6501_v2, %v6560_v42  ;;  %v269_v4 = vsel %vm262_vm3, %v6560_v42, %v6561_v24  ;;  %v6536_v2 = vunpack.i.h.bf16 %v8510_v28  ;;  %v7789_v28 = vld [vmem:[%s12432_s0 + $0x78] sm:$0xff] }
  0xee   :  { %v8567_v54 = vpop.permute.xlu1 %6568  ;;  %v5759_v45 = vpack.c.bf16 %v207_v13, %v146_v61  ;;  %v393_v13 = vsel %vm384_vm5, %v6520_v36, %v6521_v23 }
  0xef   :  { %v6564_v38 = vpop.permute.xlu0 %6563  ;;  %v6570_v53 = vunpack.i.l.bf16 %v8567_v54  ;;  %v84_v55 = vsel %vm79_vm0, %v6535_v33, %v6536_v2 }
  0xf0   :  { %v6565_v16 = vunpack.i.l.bf16 %v6564_v38  ;;  %5760 = vmatprep.subr.bf16.mxu0 %v5759_v45  ;;  %v6566_v18 = vunpack.i.h.bf16 %v6564_v38 }
  0xf1   :  { %5762 = vmatpush1.bf16.msra.mxu0 %v5761_v17  ;;  %v268_v32 = vsel %vm262_vm3, %v6561_v24, %v6570_v53 }
  0xf2   :  { %v6579_v57 = vpop.permute.xlu1 %6578  ;;  %v331_v15 = vsel %vm323_vm4, %v6506_v40, %v6565_v16  ;;  %v330_v21 = vsel %vm323_vm4, %v6565_v16, %v6566_v18  ;;  %v454_v40 = vsel %vm445_vm6, %v6525_v8, %v6526_v20 }
  0xf3   :  { %v8583_v60 = vpop.permute.xlu0 %6573  ;;  %v5747_v37 = vpack.c.bf16 %v331_v15, %v270_v56  ;;  %v6580_v50 = vunpack.i.l.bf16 %v6579_v57  ;;  %v5765_v62 = vpack.c.bf16 %v330_v21, %v269_v4  ;;  %v6581_v8 = vunpack.i.h.bf16 %v6579_v57 }
  0xf4   :  { %v6575_v10 = vunpack.i.l.bf16 %v8583_v60  ;;  %v5753_v36 = vpack.c.bf16 %v454_v40, %v393_v13  ;;  %v6556_v13 = vunpack.i.h.bf16 %v8551_v9 }
  0xf5   :  { %5748 = vmatprep.subr.bf16.mxu1 %v5747_v37  ;;  %v392_v45 = vsel %vm384_vm5, %v6521_v23, %v6580_v50  ;;  %v391_v24 = vsel %vm384_vm5, %v6580_v50, %v6581_v8 }
  0xf6   :  { %5750 = vmatpush1.bf16.msra.mxu1 %v5749_v58  ;;  %v8590_v7 = vpop.permute.xlu1 %6588  ;;  %v329_v14 = vsel %vm323_vm4, %v6566_v18, %v6575_v10 }
  0xf7   :  { %v6584_v1 = vpop.permute.xlu0 %6583  ;;  %v5763_v31 = vpack.c.bf16 %v329_v14, %v268_v32  ;;  %v6590_v41 = vunpack.i.l.bf16 %v8590_v7  ;;  %v7790_v32 = vld [vmem:[%s12432_s0 + $0x70] sm:$0xff] }
  0xf8   :  { %v6585_v22 = vunpack.i.l.bf16 %v6584_v1  ;;  %v6586_v61 = vunpack.i.h.bf16 %v6584_v1  ;;  %v5773_v14 = vpack.c.bf16 %v84_v55, %v7790_v32 }
  0xf9   :  { %5764 = vmatprep.subr.bf16.mxu0 %v5763_v31  ;;  %v390_v56 = vsel %vm384_vm5, %v6581_v8, %v6590_v41 }
  0xfa   :  { %5766 = vmatpush1.bf16.msra.mxu0 %v5765_v62  ;;  %v6599_v42 = vpop.permute.xlu1 %6598  ;;  %v453_v29 = vsel %vm445_vm6, %v6526_v20, %v6585_v22  ;;  %v452_v27 = vsel %vm445_vm6, %v6585_v22, %v6586_v61 }
  0xfb   :  { %v6600_v38 = vunpack.i.l.bf16 %v6599_v42  ;;  %v8616_v17 = vpop.permute.xlu0 %6593  ;;  %v5751_v25 = vpack.c.bf16 %v453_v29, %v392_v45  ;;  %v5769_v23 = vpack.c.bf16 %v452_v27, %v391_v24  ;;  %v6601_v4 = vunpack.i.h.bf16 %v6599_v42 }
  0xfc   :  { %v6595_v16 = vunpack.i.l.bf16 %v8616_v17 }
  0xfd   :  { %5752 = vmatprep.subr.bf16.mxu1 %v5751_v25  ;;  %v83_v15 = vsel %vm79_vm0, %v6536_v2, %v6600_v38  ;;  %v82_v62 = vsel %vm79_vm0, %v6600_v38, %v6601_v4  ;;  %v6551_v38 = vunpack.i.h.bf16 %v8533_v30 }
  0xfe   :  { %5754 = vmatpush1.bf16.msra.mxu1 %v5753_v36  ;;  %v491_v18 = vpop.permute.xlu1 %490  ;;  %v451_v57 = vsel %vm445_vm6, %v6586_v61, %v6595_v16  ;;  %v5771_v33 = vpack.c.bf16 %v83_v15, %v7789_v28  ;;  %v5789_v8 = vpack.c.bf16 %v82_v62, %v8083_v51  ;;  %v206_v51 = vsel %vm201_vm2, %v6555_v34, %v6556_v13 }
  0xff   :  { %v489_v37 = vpop.permute.xlu0 %488  ;;  %v5767_v58 = vpack.c.bf16 %v451_v57, %v390_v56  ;;  %v145_v55 = vsel %vm140_vm1, %v6550_v19, %v6551_v38 }
 0x100   :  { %v514_v20 = vsel %vm506_vm7, %v489_v37, %v491_v18  ;;  %v515_v21 = vsel %vm506_vm7, %v8522_v6, %v489_v37 }
 0x101   :  { %909 = vmatprep.subr.mxu1 %v514_v20  ;;  %5768 = vmatprep.subr.bf16.mxu0 %v5767_v58  ;;  %v5777_v20 = vpack.c.bf16 %v206_v51, %v145_v55 }
 0x102   :  { %910 = vmatpush1.msra.mxu1 %v515_v21  ;;  %5770 = vmatpush1.bf16.msra.mxu0 %v5769_v23  ;;  %v493_v50 = vpop.permute.xlu1 %492  ;;  %v6576_v21 = vunpack.i.h.bf16 %v8583_v60 }
 0x103   :  { %v8648_v1 = vpop.permute.xlu0 %6603  ;;  %5609 = vmatmul.mubr.msk.f32.vlgmr.msra.gmra.mrb[4].mxu1 %vm534_vm8, %v8229_v11  ;;  %5772 = vmatprep.subr.bf16.mxu1 %v5771_v33  ;;  %v513_v42 = vsel %vm506_vm7, %v491_v18, %v493_v50 }
 0x104   :  { %v6605_v6 = vunpack.i.l.bf16 %v8648_v1  ;;  %5774 = vmatpush1.bf16.msra.mxu1 %v5773_v14  ;;  %1099 = vmatprep.mubr.f32.mxu1 %v12442_v12 }
 0x106   :  { %v6609_v31 = vpop.permute.xlu1 %6608  ;;  %v81_v22 = vsel %vm79_vm0, %v6601_v4, %v6605_v6 }
 0x107   :  { %v8660_v40 = vpop.permute.xlu0 %494  ;;  %v5787_v45 = vpack.c.bf16 %v81_v22, %v8088_v52  ;;  %v6610_v29 = vunpack.i.l.bf16 %v6609_v31  ;;  %v6611_v25 = vunpack.i.h.bf16 %v6609_v31 }
 0x108   :  { %v512_v61 = vsel %vm506_vm7, %v493_v50, %v8660_v40  ;;  %v6571_v50 = vunpack.i.h.bf16 %v8567_v54 }
 0x109   :  { %980 = vmatprep.subr.mxu0 %v512_v61  ;;  %v144_v57 = vsel %vm140_vm1, %v6551_v38, %v6610_v29  ;;  %v143_v24 = vsel %vm140_vm1, %v6610_v29, %v6611_v25  ;;  %v328_v61 = vsel %vm323_vm4, %v6575_v10, %v6576_v21 }
 0x10a   :  { %981 = vmatpush1.msra.mxu0 %v513_v42  ;;  %v8669_v2 = vpop.permute.xlu1 %6618  ;;  %v267_v29 = vsel %vm262_vm3, %v6570_v53, %v6571_v50 }
 0x10b   :  { %v6614_v36 = vpop.permute.xlu0 %6613  ;;  %5610 = vmatmul.mubr.msk.f32.vlgmr.msra.gmra.mrb[6].mxu0 %vm534_vm8, %v8229_v11  ;;  %5788 = vmatprep.subr.bf16.mxu0 %v5787_v45  ;;  %v6620_v27 = vunpack.i.l.bf16 %v8669_v2 }
 0x10c   :  { %v6616_v56 = vunpack.i.h.bf16 %v6614_v36  ;;  %v6615_v18 = vunpack.i.l.bf16 %v6614_v36  ;;  %5790 = vmatpush1.bf16.msra.mxu0 %v5789_v8  ;;  %1170 = vmatprep.mubr.f32.mxu0 %v12442_v12  ;;  %v5781_v36 = vpack.c.bf16 %v328_v61, %v267_v29 }
 0x10d   :  { %v142_v30 = vsel %vm140_vm1, %v6611_v25, %v6620_v27 }
 0x10e   :  { %v6629_v52 = vpop.permute.xlu1 %6628  ;;  %v205_v15 = vsel %vm201_vm2, %v6556_v13, %v6615_v18  ;;  %v204_v9 = vsel %vm201_vm2, %v6615_v18, %v6616_v56 }
 0x10f   :  { %v8693_v37 = vpop.permute.xlu0 %6623  ;;  %v5775_v34 = vpack.c.bf16 %v205_v15, %v144_v57  ;;  %v6630_v19 = vunpack.i.l.bf16 %v6629_v52  ;;  %v5793_v33 = vpack.c.bf16 %v204_v9, %v143_v24  ;;  %v6631_v32 = vunpack.i.h.bf16 %v6629_v52 }
 0x110   :  { %v6625_v58 = vunpack.i.l.bf16 %v8693_v37  ;;  %v6591_v57 = vunpack.i.h.bf16 %v8590_v7 }
 0x111   :  { %5776 = vmatprep.subr.bf16.mxu1 %v5775_v34  ;;  %v266_v42 = vsel %vm262_vm3, %v6571_v50, %v6630_v19  ;;  %v265_v60 = vsel %vm262_vm3, %v6630_v19, %v6631_v32 }
 0x112   :  { %5778 = vmatpush1.bf16.msra.mxu1 %v5777_v20  ;;  %v8701_v23 = vpop.permute.xlu1 %6638  ;;  %v203_v28 = vsel %vm201_vm2, %v6616_v56, %v6625_v58  ;;  %v6596_v56 = vunpack.i.h.bf16 %v8616_v17 }
 0x113   :  { %v6634_v14 = vpop.permute.xlu0 %6633  ;;  %v5791_v4 = vpack.c.bf16 %v203_v28, %v142_v30  ;;  %v6640_v31 = vunpack.i.l.bf16 %v8701_v23  ;;  %v6641_v43 = vunpack.i.h.bf16 %v8701_v23 }
 0x114   :  { %v6636_v22 = vunpack.i.h.bf16 %v6634_v14  ;;  %v6635_v62 = vunpack.i.l.bf16 %v6634_v14  ;;  %v450_v30 = vsel %vm445_vm6, %v6595_v16, %v6596_v56  ;;  %v6626_v14 = vunpack.i.h.bf16 %v8693_v37 }
 0x115   :  { %5792 = vmatprep.subr.bf16.mxu0 %v5791_v4  ;;  %v264_v54 = vsel %vm262_vm3, %v6631_v32, %v6640_v31  ;;  %v263_v63 = vsel %vm262_vm3, %v6640_v31, %v6641_v43  ;;  %v12629_v31 = vunpack.i.l.bf16 %v8172_v49 }
 0x116   :  { %v6649_v13 = vpop.permute.xlu1 %6648  ;;  %5794 = vmatpush1.bf16.msra.mxu0 %v5793_v33  ;;  %v327_v45 = vsel %vm323_vm4, %v6576_v21, %v6635_v62  ;;  %v326_v10 = vsel %vm323_vm4, %v6635_v62, %v6636_v22  ;;  %v6606_v21 = vunpack.i.h.bf16 %v8648_v1  ;;  %v389_v33 = vsel %vm384_vm5, %v6590_v41, %v6591_v57  ;;  %v7791_v1 = vld [vmem:[%s12432_s0 + $0x98] sm:$0xff] }
 0x117   :  { %v8725_v8 = vpop.permute.xlu0 %6643  ;;  %v5779_v38 = vpack.c.bf16 %v327_v45, %v266_v42  ;;  %v6650_v53 = vunpack.i.l.bf16 %v6649_v13  ;;  %v5797_v52 = vpack.c.bf16 %v326_v10, %v265_v60  ;;  %v6651_v15 = vunpack.i.h.bf16 %v6649_v13 }
 0x118   :  { %v6645_v25 = vunpack.i.l.bf16 %v8725_v8  ;;  %v5785_v62 = vpack.c.bf16 %v450_v30, %v389_v33  ;;  %v6621_v41 = vunpack.i.h.bf16 %v8669_v2  ;;  %v99_v42 = vsel %vm79_vm0, %v6606_v21, %v6325_v39 }
 0x119   :  { %5780 = vmatprep.subr.bf16.mxu1 %v5779_v38  ;;  %v388_v19 = vsel %vm384_vm5, %v6591_v57, %v6650_v53  ;;  %v387_v17 = vsel %vm384_vm5, %v6650_v53, %v6651_v15  ;;  %v80_v45 = vsel %vm79_vm0, %v6605_v6, %v6606_v21  ;;  %v6646_v10 = vunpack.i.h.bf16 %v8725_v8  ;;  %v8865_v21 = vld [vmem:[%s12435_s3] sm:$0xff] }
 0x11a   :  { %5782 = vmatpush1.bf16.msra.mxu1 %v5781_v36  ;;  %v8733_v18 = vpop.permute.xlu1 %6658  ;;  %v325_v51 = vsel %vm323_vm4, %v6636_v22, %v6645_v25  ;;  %v221_v35 = vsel %vm201_vm2, %v6626_v14, %v6345_v47  ;;  %v5803_v6 = vpack.c.bf16 %v99_v42, %v7791_v1  ;;  %v141_v36 = vsel %vm140_vm1, %v6620_v27, %v6621_v41  ;;  %v7792_v47 = vld [vmem:[%s12432_s0 + $0x90] sm:$0xff] }
 0x11b   :  { %v6654_v55 = vpop.permute.xlu0 %6653  ;;  %v5795_v24 = vpack.c.bf16 %v325_v51, %v264_v54  ;;  %v6660_v9 = vunpack.i.l.bf16 %v8733_v18  ;;  %v202_v2 = vsel %vm201_vm2, %v6625_v58, %v6626_v14  ;;  %v6661_v37 = vunpack.i.h.bf16 %v8733_v18 }
 0x11c   :  { %v6656_v34 = vunpack.i.h.bf16 %v6654_v55  ;;  %v6655_v20 = vunpack.i.l.bf16 %v6654_v55  ;;  %v5809_v58 = vpack.c.bf16 %v202_v2, %v141_v36  ;;  %v282_v57 = vsel %vm262_vm3, %v6641_v43, %v6360_v5 }
 0x11d   :  { %5796 = vmatprep.subr.bf16.mxu0 %v5795_v24  ;;  %v386_v7 = vsel %vm384_vm5, %v6651_v15, %v6660_v9  ;;  %v404_v8 = vsel %vm384_vm5, %v6661_v37, %v12629_v31 }
 0x11e   :  { %5798 = vmatpush1.bf16.msra.mxu0 %v5797_v52  ;;  %v449_v28 = vsel %vm445_vm6, %v6596_v56, %v6655_v20  ;;  %v448_v16 = vsel %vm445_vm6, %v6655_v20, %v6656_v34  ;;  %v497_v4 = vpop.permute.xlu1 %496  ;;  %v160_v56 = vsel %vm140_vm1, %v6621_v41, %v6340_v48  ;;  %v343_v48 = vsel %vm323_vm4, %v6646_v10, %v6365_v3 }
 0x11f   :  { %v6664_v50 = vpop.permute.xlu0 %6663  ;;  %v5783_v32 = vpack.c.bf16 %v449_v28, %v388_v19  ;;  %v5801_v13 = vpack.c.bf16 %v448_v16, %v387_v17  ;;  %v511_v39 = vsel %vm506_vm7, %v8660_v40, %v497_v4  ;;  %v5805_v40 = vpack.c.bf16 %v80_v45, %v7792_v47 }
 0x120   :  { %v6665_v22 = vunpack.i.l.bf16 %v6664_v50  ;;  %v5807_v53 = vpack.c.bf16 %v221_v35, %v160_v56  ;;  %v6666_v52 = vunpack.i.h.bf16 %v6664_v50  ;;  %v324_v3 = vsel %vm323_vm4, %v6645_v25, %v6646_v10 }
 0x121   :  { %5784 = vmatprep.subr.bf16.mxu1 %v5783_v32  ;;  %v5811_v15 = vpack.c.bf16 %v343_v48, %v282_v57  ;;  %v5813_v23 = vpack.c.bf16 %v324_v3, %v263_v63 }
 0x122   :  { %5786 = vmatpush1.bf16.msra.mxu1 %v5785_v62  ;;  %v447_v61 = vsel %vm445_vm6, %v6656_v34, %v6665_v22  ;;  %v501_v54 = vpop.permute.xlu1 %500  ;;  %v465_v5 = vsel %vm445_vm6, %v6666_v52, %v12628_v0  ;;  %v446_v46 = vsel %vm445_vm6, %v6665_v22, %v6666_v52  ;;  %v12630_v34 = vlaneseq }
 0x123   :  { %v499_v29 = vpop.permute.xlu0 %498  ;;  %v5799_v60 = vpack.c.bf16 %v447_v61, %v386_v7  ;;  %v5815_v25 = vpack.c.bf16 %v465_v5, %v404_v8 }
 0x124   :  { %v510_v38 = vsel %vm506_vm7, %v497_v4, %v499_v29  ;;  %v509_v51 = vsel %vm506_vm7, %v499_v29, %v501_v54  ;;  %v8855_v20 = vshrl.u32 %v12630_v34, 7 }
 0x125   :  { %1051 = vmatprep.subr.mxu1 %v510_v38  ;;  %5800 = vmatprep.subr.bf16.mxu0 %v5799_v60 }
 0x126   :  { %1052 = vmatpush1.msra.mxu1 %v511_v39  ;;  %5802 = vmatpush1.bf16.msra.mxu0 %v5801_v13  ;;  %v505_v55 = vpop.permute.xlu1 %504  ;;  %12631 = vst [vmem:[#allocation2_spill] sm:$0xff] %v8855_v20  ;;  %v8858_v30 = vsub.s32 0, %v8855_v20  ;;  %v8876_v14 = vsub.s32 1, %v8855_v20  ;;  %v8879_v4 = vsub.s32 2, %v8855_v20  ;;  %v8891_v60 = vsub.s32 5, %v8855_v20 }
 0x127   :  { %v503_v27 = vpop.permute.xlu0 %502  ;;  %5611 = vmatmul.mubr.msk.f32.vlgmr.msra.gmra.mrb[6].mxu1 %vm534_vm8, %v8229_v11  ;;  %5804 = vmatprep.subr.bf16.mxu1 %v5803_v6  ;;  %v526_v49 = vsel %vm506_vm7, %v505_v55, %v8220_v59  ;;  %v8903_v6 = vsub.s32 3, %v8855_v20  ;;  %v8908_v47 = vsub.s32 4, %v8855_v20  ;;  %v8936_v48 = vsub.s32 6, %v8855_v20 }
 0x128   :  { %5806 = vmatpush1.bf16.msra.mxu1 %v5805_v40  ;;  %v508_v44 = vsel %vm506_vm7, %v501_v54, %v503_v27  ;;  %1241 = vmatprep.mubr.f32.mxu1 %v12442_v12  ;;  %v507_v18 = vsel %vm506_vm7, %v503_v27, %v505_v55  ;;  %12632 = vst [vmem:[#allocation3_spill] sm:$0xff] %v8858_v30  ;;  %12633 = vst [vmem:[#allocation4_spill] sm:$0xff] %v8876_v14 }
 0x129   :  { %1122 = vmatprep.subr.mxu0 %v508_v44  ;;  %5808 = vmatprep.subr.bf16.mxu1 %v5807_v53  ;;  %v1277_v33 = vrot.slane %v8865_v21, %v8858_v30  ;;  %12634 = vst [vmem:[#allocation5_spill] sm:$0xff] %v8879_v4  ;;  %v1281_v62 = vrot.slane %v8865_v21, %v8876_v14  ;;  %12635 = vst [vmem:[#allocation6_spill] sm:$0xff] %v8891_v60 }
 0x12a   :  { %1123 = vmatpush1.msra.mxu0 %v509_v51  ;;  %v1285_v61 = vrot.slane %v8865_v21, %v8879_v4  ;;  %v1297_v1 = vrot.slane %v8865_v21, %v8891_v60  ;;  %12636 = vst [vmem:[#allocation7_spill] sm:$0xff] %v8903_v6  ;;  %12637 = vst [vmem:[#allocation8_spill] sm:$0xff] %v8908_v47  ;;  %v1289_v56 = vrot.slane %v8865_v21, %v8903_v6 }
 0x12b   :  { %5612 = vmatmul.mubr.msk.f32.vlgmr.msra.gmra.mrb[8].mxu0 %vm534_vm8, %v8229_v11  ;;  %v385_v11 = vsel %vm384_vm5, %v6660_v9, %v6661_v37  ;;  %v7793_v9 = vld [vmem:[%s12433_s1] sm:$0xff]  ;;  %v1293_v53 = vrot.slane %v8865_v21, %v8908_v47  ;;  %12638 = vst [vmem:[#allocation9_spill] sm:$0xff] %v8936_v48  ;;  %v8939_v37 = vsub.s32 7, %v8855_v20  ;;  %v1301_v63 = vrot.slane %v8865_v21, %v8936_v48 }
 0x12c   :  { %5810 = vmatpush1.bf16.msra.mxu1 %v5809_v58  ;;  %1950 = vmatprep.mubr.f32.mxu0 %v12442_v12  ;;  %v5817_v24 = vpack.c.bf16 %v446_v46, %v385_v11 }
 0x12d   :  { %5812 = vmatprep.subr.bf16.mxu1 %v5811_v15  ;;  %12639 = vst [vmem:[#allocation10_spill] sm:$0xff] %v8939_v37  ;;  %v1305_v0 = vrot.slane %v8865_v21, %v8939_v37 }
 0x130   :  { %5814 = vmatpush1.bf16.msra.mxu1 %v5813_v23 }
 0x131   :  { %5816 = vmatprep.subr.bf16.mxu1 %v5815_v25 }
 0x134   :  { %5818 = vmatpush1.bf16.msra.mxu1 %v5817_v24  ;;  %v8966_v24 = vld [vmem:[%s12435_s3 + $0x8] sm:$0xff] }
 0x135   :  { %1193 = vmatprep.subr.mxu1 %v526_v49 }
 0x138   :  { %1194 = vmatpush1.msra.mxu1 %v507_v18  ;;  %v1309_v18 = vrot.slane %v8966_v24, %v8858_v30 }
 0x139   :  { %5613 = vmatmul.mubr.msk.f32.vlgmr.msra.gmra.mrb[8].mxu1 %vm534_vm8, %v7793_v9 }
 0x13a   :  { %2021 = vmatprep.mubr.f32.mxu1 %v12442_v12 }
 0x13b   :  { %v8860_v59 = vpop.permute.xlu0 %531 }
 0x171   :  { %v604_v19 = vpop.f32.mrb[0].mxu0 }
 0x172   :  { %v605_v28 = vadd.f32 %v604_v19, %v8860_v59  ;;  %v606_v17 = vpop.f32.mrb[1].mxu0 }
 0x173   :  { %v607_v32 = vadd.f32 %v606_v17, %v8860_v59 }
 0x174   :  { %v1248_v16 = vmax.f32 %v605_v28, 0.0 }
 0x175   :  { %v1249_v22 = vmax.f32 %v607_v32, 0.0 }
 0x176   :  { %v8870_v50 = vmul.f32 %v1277_v33, %v1248_v16  ;;  %v1321_v16 = vrot.slane %v8966_v24, %v8903_v6 }
 0x177   :  { %v8886_v42 = vmul.f32 %v1281_v62, %v1249_v22  ;;  %v1317_v62 = vrot.slane %v8966_v24, %v8879_v4 }
 0x178   :  { %1814 = vrot.lane.b32.xlu1 %v8870_v50, %s7804_s12 }
 0x18d   :  { %v675_v7 = vpop.f32.mrb[0].mxu1 }
 0x18e   :  { %v676_v41 = vadd.f32 %v675_v7, %v8860_v59  ;;  %v677_v13 = vpop.f32.mrb[1].mxu1 }
 0x18f   :  { %v678_v43 = vadd.f32 %v677_v13, %v8860_v59 }
 0x190   :  { %v1250_v45 = vmax.f32 %v676_v41, 0.0 }
 0x191   :  { %v1251_v2 = vmax.f32 %v678_v43, 0.0 }
 0x192   :  { %v8888_v29 = vmul.f32 %v1285_v61, %v1250_v45 }
 0x193   :  { %v8920_v51 = vmul.f32 %v1289_v56, %v1251_v2 }
 0x194   :  { %1818 = vrot.lane.b32.xlu0 %v8888_v29, %s7804_s12  ;;  %v6668_v10 = vpack.i.bf16 %v8888_v29, %v8886_v42 }
 0x195   :  { %v746_v38 = vpop.f32.mrb[2].mxu0 }
 0x196   :  { %v748_v35 = vpop.f32.mrb[3].mxu0  ;;  %6669 = vrot.lane.b32.xlu1 %v6668_v10, %s7797_s24  ;;  %v747_v54 = vadd.f32 %v746_v38, %v8860_v59 }
 0x197   :  { %v749_v39 = vadd.f32 %v748_v35, %v8860_v59  ;;  %v1313_v35 = vrot.slane %v8966_v24, %v8876_v14 }
 0x198   :  { %6679 = vrot.lane.b32.xlu0 %v6668_v10, %s7798_s25  ;;  %v1252_v27 = vmax.f32 %v747_v54, 0.0 }
 0x199   :  { %v1253_v36 = vmax.f32 %v749_v39, 0.0 }
 0x19a   :  { %6674 = vrot.lane.b32.xlu1 %v6668_v10, %s7796_s23  ;;  %v8922_v52 = vmul.f32 %v1293_v53, %v1252_v27 }
 0x19b   :  { %v8911_v40 = vmul.f32 %v1297_v1, %v1253_v36  ;;  %v1325_v36 = vrot.slane %v8966_v24, %v8908_v47 }
 0x19c   :  { %6689 = vrot.lane.b32.xlu0 %v6668_v10, %s7799_s26  ;;  %v6713_v44 = vpack.i.bf16 %v8922_v52, %v8920_v51 }
 0x19e   :  { %6684 = vrot.lane.b32.xlu1 %v6668_v10, %s7800_s27 }
 0x1a0   :  { %6699 = vrot.lane.b32.xlu0 %v6668_v10, %s7801_s28 }
 0x1a2   :  { %6694 = vrot.lane.b32.xlu1 %v6668_v10, %s7802_s29 }
 0x1a4   :  { %1820 = vrot.lane.b32.xlu0 %v8920_v51, %s7804_s12 }
 0x1a6   :  { %1816 = vrot.lane.b32.xlu1 %v8886_v42, %s7804_s12 }
 0x1a8   :  { %6714 = vrot.lane.b32.xlu0 %v6713_v44, %s7798_s25 }
 0x1aa   :  { %6704 = vrot.lane.b32.xlu1 %v6713_v44, %s7797_s24 }
 0x1ac   :  { %6724 = vrot.lane.b32.xlu0 %v6713_v44, %s7799_s26 }
 0x1ae   :  { %6709 = vrot.lane.b32.xlu1 %v6713_v44, %s7796_s23 }
 0x1b0   :  { %6734 = vrot.lane.b32.xlu0 %v6713_v44, %s7801_s28 }
 0x1b1   :  { %v817_v58 = vpop.f32.mrb[2].mxu1 }
 0x1b2   :  { %v818_v57 = vadd.f32 %v817_v58, %v8860_v59  ;;  %v819_v3 = vpop.f32.mrb[3].mxu1  ;;  %6719 = vrot.lane.b32.xlu1 %v6713_v44, %s7800_s27 }
 0x1b3   :  { %v820_v15 = vadd.f32 %v819_v3, %v8860_v59 }
 0x1b4   :  { %v1254_v5 = vmax.f32 %v818_v57, 0.0 }
 0x1b5   :  { %v1255_v23 = vmax.f32 %v820_v15, 0.0 }
 0x1b6   :  { %v8949_v31 = vmul.f32 %v1301_v63, %v1254_v5  ;;  %6729 = vrot.lane.b32.xlu1 %v6713_v44, %s7802_s29  ;;  %v1333_v44 = vrot.slane %v8966_v24, %v8936_v48  ;;  %v1337_v5 = vrot.slane %v8966_v24, %v8939_v37 }
 0x1b7   :  { %v8952_v8 = vmul.f32 %v1305_v0, %v1255_v23 }
 0x1b9   :  { %v888_v11 = vpop.f32.mrb[4].mxu0  ;;  %v6738_v46 = vpack.i.bf16 %v8952_v8, %v8870_v50 }
 0x1ba   :  { %v890_v25 = vpop.f32.mrb[5].mxu0  ;;  %1822 = vrot.lane.b32.xlu1 %v8922_v52, %s7804_s12  ;;  %v889_v55 = vadd.f32 %v888_v11, %v8860_v59 }
 0x1bb   :  { %6739 = vrot.lane.b32.xlu0 %v6738_v46, %s7797_s24  ;;  %v891_v10 = vadd.f32 %v890_v25, %v8860_v59 }
 0x1bc   :  { %v1256_v49 = vmax.f32 %v889_v55, 0.0 }
 0x1bd   :  { %v1257_v39 = vmax.f32 %v891_v10, 0.0 }
 0x1be   :  { %1826 = vrot.lane.b32.xlu1 %v8949_v31, %s7804_s12  ;;  %v8974_v9 = vmul.f32 %v1309_v18, %v1256_v49 }
 0x1bf   :  { %6749 = vrot.lane.b32.xlu0 %v6738_v46, %s7798_s25  ;;  %v9018_v43 = vmul.f32 %v1313_v35, %v1257_v39  ;;  %v1329_v35 = vrot.slane %v8966_v24, %v8891_v60 }
 0x1c0   :  { %v6778_v21 = vpack.i.bf16 %v8911_v40, %v8974_v9 }
 0x1c2   :  { %6744 = vrot.lane.b32.xlu1 %v6738_v46, %s7796_s23 }
 0x1c3   :  { %6759 = vrot.lane.b32.xlu0 %v6738_v46, %s7799_s26 }
 0x1c6   :  { %6754 = vrot.lane.b32.xlu1 %v6738_v46, %s7800_s27 }
 0x1c7   :  { %6769 = vrot.lane.b32.xlu0 %v6738_v46, %s7801_s28 }
 0x1ca   :  { %6764 = vrot.lane.b32.xlu1 %v6738_v46, %s7802_s29 }
 0x1cb   :  { %1824 = vrot.lane.b32.xlu0 %v8911_v40, %s7804_s12 }
 0x1ce   :  { %1828 = vrot.lane.b32.xlu1 %v8952_v8, %s7804_s12 }
 0x1cf   :  { %6779 = vrot.lane.b32.xlu0 %v6778_v21, %s7796_s23 }
 0x1d2   :  { %6774 = vrot.lane.b32.xlu1 %v6778_v21, %s7797_s24 }
 0x1d3   :  { %6789 = vrot.lane.b32.xlu0 %v6778_v21, %s7800_s27 }
 0x1d6   :  { %v959_v19 = vpop.f32.mrb[4].mxu1  ;;  %6784 = vrot.lane.b32.xlu1 %v6778_v21, %s7798_s25 }
 0x1d7   :  { %v961_v28 = vpop.f32.mrb[5].mxu1  ;;  %6799 = vrot.lane.b32.xlu0 %v6778_v21, %s7802_s29  ;;  %v960_v33 = vadd.f32 %v959_v19, %v8860_v59 }
 0x1d8   :  { %v962_v17 = vadd.f32 %v961_v28, %v8860_v59 }
 0x1d9   :  { %v1258_v22 = vmax.f32 %v960_v33, 0.0 }
 0x1da   :  { %v1259_v32 = vmax.f32 %v962_v17, 0.0  ;;  %6794 = vrot.lane.b32.xlu1 %v6778_v21, %s7799_s26 }
 0x1db   :  { %1830 = vrot.lane.b32.xlu0 %v8974_v9, %s7804_s12  ;;  %v9002_v45 = vmul.f32 %v1317_v62, %v1258_v22 }
 0x1dc   :  { %v8997_v7 = vmul.f32 %v1321_v16, %v1259_v32  ;;  %v9083_v32 = vld [vmem:[%s12435_s3 + $0x10] sm:$0xf] }
 0x1dd   :  { %v1341_v10 = vrot.slane %v9083_v32, %v8858_v30 }
 0x1de   :  { %v1030_v41 = vpop.f32.mrb[6].mxu0  ;;  %6804 = vrot.lane.b32.xlu1 %v6778_v21, %s7801_s28  ;;  %v6808_v61 = vpack.i.bf16 %v8997_v7, %v8949_v31 }
 0x1df   :  { %v1032_v13 = vpop.f32.mrb[7].mxu0  ;;  %v1031_v38 = vadd.f32 %v1030_v41, %v8860_v59 }
 0x1e0   :  { %6809 = vrot.lane.b32.xlu0 %v6808_v61, %s7797_s24  ;;  %v1033_v62 = vadd.f32 %v1032_v13, %v8860_v59 }
 0x1e1   :  { %v1260_v1 = vmax.f32 %v1031_v38, 0.0 }
 0x1e2   :  { %1834 = vrot.lane.b32.xlu1 %v9002_v45, %s7804_s12  ;;  %v1261_v38 = vmax.f32 %v1033_v62, 0.0 }
 0x1e3   :  { %v9020_v54 = vmul.f32 %v1325_v36, %v1260_v1 }
 0x1e4   :  { %6814 = vrot.lane.b32.xlu0 %v6808_v61, %s7796_s23  ;;  %v9104_v36 = vmul.f32 %v1329_v35, %v1261_v38 }
 0x1e5   :  { %v6843_v56 = vpack.i.bf16 %v9018_v43, %v9020_v54 }
 0x1e6   :  { %6819 = vrot.lane.b32.xlu1 %v6808_v61, %s7798_s25 }
 0x1e8   :  { %6824 = vrot.lane.b32.xlu0 %v6808_v61, %s7800_s27 }
 0x1ea   :  { %6829 = vrot.lane.b32.xlu1 %v6808_v61, %s7799_s26  ;;  %v9048_v23 = vpop.permute.xlu1 %1814 }
 0x1eb   :  { %12640 = vst [vmem:[#allocation11_spill] sm:$0xff] %v9048_v23 }
 0x1ec   :  { %6834 = vrot.lane.b32.xlu0 %v6808_v61, %s7802_s29 }
 0x1ee   :  { %6839 = vrot.lane.b32.xlu1 %v6808_v61, %s7801_s28 }
 0x1f0   :  { %1832 = vrot.lane.b32.xlu0 %v9018_v43, %s7804_s12 }
 0x1f2   :  { %1836 = vrot.lane.b32.xlu1 %v8997_v7, %s7804_s12 }
 0x1f4   :  { %6844 = vrot.lane.b32.xlu0 %v6843_v56, %s7797_s24 }
 0x1f6   :  { %6854 = vrot.lane.b32.xlu1 %v6843_v56, %s7798_s25 }
 0x1f8   :  { %6849 = vrot.lane.b32.xlu0 %v6843_v56, %s7796_s23 }
 0x1fa   :  { %v1101_v2 = vpop.f32.mrb[6].mxu1  ;;  %6864 = vrot.lane.b32.xlu1 %v6843_v56, %s7799_s26 }
 0x1fb   :  { %v1102_v27 = vadd.f32 %v1101_v2, %v8860_v59  ;;  %v1103_v53 = vpop.f32.mrb[7].mxu1 }
 0x1fc   :  { %v1104_v58 = vadd.f32 %v1103_v53, %v8860_v59  ;;  %6859 = vrot.lane.b32.xlu0 %v6843_v56, %s7800_s27 }
 0x1fd   :  { %v1262_v57 = vmax.f32 %v1102_v27, 0.0 }
 0x1fe   :  { %v1172_v63 = vpop.f32.mrb[8].mxu0  ;;  %6874 = vrot.lane.b32.xlu1 %v6843_v56, %s7801_s28  ;;  %v1263_v0 = vmax.f32 %v1104_v58, 0.0  ;;  %v1353_v58 = vrot.slane %v9083_v32, %v8903_v6 }
 0x1ff   :  { %v9039_v3 = vpop.f32.mrb[9].mxu0  ;;  %v9041_v15 = vmul.f32 %v1333_v44, %v1262_v57  ;;  %v1173_v28 = vadd.f32 %v1172_v63, %v8860_v59 }
 0x200   :  { %6869 = vrot.lane.b32.xlu0 %v6843_v56, %s7802_s29  ;;  %v9050_v11 = vmul.f32 %v1337_v5, %v1263_v0 }
 0x201   :  { %v1264_v61 = vmax.f32 %v1173_v28, 0.0 }
 0x202   :  { %1662 = vrot.lane.b32.xlu1 %v9041_v15, %s7799_s26  ;;  %v6878_v55 = vpack.i.bf16 %v9050_v11, %v9002_v45 }
 0x203   :  { %v9099_v13 = vmul.f32 %v1341_v10, %v1264_v61 }
 0x204   :  { %1838 = vrot.lane.b32.xlu0 %v9020_v54, %s7804_s12 }
 0x205   :  { %12641 = vst [vmem:[#allocation12_spill] sm:$0xff] %v9099_v13  ;;  %v6923_v27 = vpack.i.bf16 %v9104_v36, %v9099_v13 }
 0x206   :  { %v9054_v46 = vpop.permute.xlu0 %1818  ;;  %1782 = vrot.lane.b32.xlu1 %v9041_v15, %s7801_s28 }
 0x208   :  { %1722 = vrot.lane.b32.xlu0 %v9041_v15, %s7802_s29  ;;  %v9060_v25 = vpop.permute.xlu1 %6669 }
 0x209   :  { %v6672_v49 = vunpack.i.h.bf16 %v9060_v25  ;;  %v12444_v18 = vunpack.i.l.bf16 %v9060_v25 }
 0x20a   :  { %v9066_v21 = vpop.permute.xlu0 %6679  ;;  %6879 = vrot.lane.b32.xlu1 %v6878_v55, %s7797_s24 }
 0x20b   :  { %v1451_v19 = vsel %vm79_vm0, %v12444_v18, %v6672_v49  ;;  %v12449_v38 = vunpack.i.h.bf16 %v9066_v21 }
 0x20c   :  { %v9074_v33 = vpop.f32.mrb[8].mxu1  ;;  %6884 = vrot.lane.b32.xlu0 %v6878_v55, %s7796_s23  ;;  %v9077_v17 = vpop.permute.xlu1 %6674  ;;  %v5819_v16 = vpack.c.bf16 %v1451_v19, %v8886_v42 }
 0x20d   :  { %v1245_v22 = vpop.f32.mrb[9].mxu1  ;;  %v6677_v35 = vunpack.i.h.bf16 %v9077_v17  ;;  %v6676_v20 = vunpack.i.l.bf16 %v9077_v17 }
 0x20e   :  { %v9086_v41 = vpop.permute.xlu0 %6689  ;;  %6889 = vrot.lane.b32.xlu1 %v6878_v55, %s7798_s25  ;;  %5820 = vmatprep.subr.bf16.mxu0 %v5819_v16  ;;  %v1246_v2 = vadd.f32 %v1245_v22, %v8860_v59 }
 0x210   :  { %6894 = vrot.lane.b32.xlu0 %v6878_v55, %s7800_s27  ;;  %v9092_v42 = vpop.permute.xlu1 %6684  ;;  %v1267_v44 = vmax.f32 %v1246_v2, 0.0 }
 0x212   :  { %v9096_v39 = vpop.permute.xlu0 %6699  ;;  %6899 = vrot.lane.b32.xlu1 %v6878_v55, %s7799_s26  ;;  %v9137_v22 = vmul.f32 %v1353_v58, %v1267_v44 }
 0x214   :  { %6904 = vrot.lane.b32.xlu0 %v6878_v55, %s7802_s29  ;;  %v9102_v1 = vpop.permute.xlu1 %6694 }
 0x216   :  { %v9106_v56 = vpop.permute.xlu0 %1820  ;;  %6909 = vrot.lane.b32.xlu1 %v6878_v55, %s7801_s28 }
 0x218   :  { %1844 = vrot.lane.b32.xlu0 %v9050_v11, %s7804_s12  ;;  %v9112_v24 = vpop.permute.xlu1 %1816 }
 0x21a   :  { %v9116_v53 = vpop.permute.xlu0 %6714  ;;  %6924 = vrot.lane.b32.xlu1 %v6923_v27, %s7798_s25 }
 0x21b   :  { %v12446_v55 = vunpack.i.h.bf16 %v9116_v53  ;;  %v6716_v19 = vunpack.i.l.bf16 %v9116_v53 }
 0x21c   :  { %6914 = vrot.lane.b32.xlu0 %v6923_v27, %s7797_s24  ;;  %v9122_v57 = vpop.permute.xlu1 %6704 }
 0x21d   :  { %v12441_v63 = vunpack.i.h.bf16 %v9122_v57  ;;  %v6706_v0 = vunpack.i.l.bf16 %v9122_v57 }
 0x21e   :  { %v9126_v5 = vpop.permute.xlu0 %6724  ;;  %6934 = vrot.lane.b32.xlu1 %v6923_v27, %s7799_s26 }
 0x21f   :  { %v1450_v28 = vsel %vm79_vm0, %v6672_v49, %v6706_v0  ;;  %v1449_v16 = vsel %vm79_vm0, %v6706_v0, %v12441_v63  ;;  %v12448_v0 = vunpack.i.h.bf16 %v9126_v5  ;;  %v6726_v44 = vunpack.i.l.bf16 %v9126_v5 }
 0x220   :  { %6919 = vrot.lane.b32.xlu0 %v6923_v27, %s7796_s23  ;;  %v9140_v62 = vpop.permute.xlu1 %6709  ;;  %v5835_v61 = vpack.c.bf16 %v1449_v16, %v8920_v51  ;;  %v5837_v10 = vpack.c.bf16 %v1450_v28, %v8888_v29  ;;  %v1570_v29 = vsel %vm201_vm2, %v12449_v38, %v6716_v19  ;;  %v1569_v28 = vsel %vm201_vm2, %v6716_v19, %v12446_v55 }
 0x221   :  { %v12445_v49 = vunpack.i.h.bf16 %v9140_v62  ;;  %v6711_v2 = vunpack.i.l.bf16 %v9140_v62  ;;  %v12447_v16 = vunpack.i.h.bf16 %v9086_v41  ;;  %v12453_v38 = vunpack.i.h.bf16 %v9096_v39 }
 0x222   :  { %6944 = vrot.lane.b32.xlu1 %v6923_v27, %s7801_s28  ;;  %5836 = vmatprep.subr.bf16.mxu1 %v5835_v61  ;;  %v9166_v61 = vpop.permute.xlu0 %6734 }
 0x223   :  { %v1510_v51 = vsel %vm140_vm1, %v6677_v35, %v6711_v2  ;;  %5838 = vmatpush1.bf16.msra.mxu1 %v5837_v10  ;;  %v1509_v58 = vsel %vm140_vm1, %v6711_v2, %v12445_v49  ;;  %v9173_v10 = vpack.i.bf16 %v9137_v22, %v9041_v15  ;;  %v12450_v2 = vunpack.i.h.bf16 %v9092_v42 }
 0x224   :  { %6929 = vrot.lane.b32.xlu0 %v6923_v27, %s7800_s27  ;;  %v9169_v63 = vpop.permute.xlu1 %6719  ;;  %v5839_v12 = vpack.c.bf16 %v1569_v28, %v1509_v58  ;;  %v5841_v18 = vpack.c.bf16 %v1570_v29, %v1510_v51  ;;  %v1690_v55 = vsel %vm323_vm4, %v12447_v16, %v6726_v44  ;;  %v1689_v29 = vsel %vm323_vm4, %v6726_v44, %v12448_v0 }
 0x225   :  { %v12452_v49 = vunpack.i.h.bf16 %v9169_v63  ;;  %v6721_v19 = vunpack.i.l.bf16 %v9169_v63  ;;  %v6736_v58 = vunpack.i.l.bf16 %v9166_v61  ;;  %v6697_v51 = vunpack.i.h.bf16 %v9102_v1 }
 0x226   :  { %6949 = vrot.lane.b32.xlu1 %v9173_v10, %s7797_s24  ;;  %5840 = vmatprep.subr.bf16.mxu1 %v5839_v12 }
 0x227   :  { %v1630_v28 = vsel %vm262_vm3, %v12450_v2, %v6721_v19  ;;  %5842 = vmatpush1.bf16.msra.mxu1 %v5841_v18  ;;  %v1629_v12 = vsel %vm262_vm3, %v6721_v19, %v12452_v49  ;;  %v6681_v18 = vunpack.i.l.bf16 %v9066_v21  ;;  %v12642_v19 = vunpack.i.h.bf16 %v9166_v61 }
 0x228   :  { %6939 = vrot.lane.b32.xlu0 %v6923_v27, %s7802_s29  ;;  %v9199_v16 = vpop.permute.xlu1 %6729  ;;  %v5843_v44 = vpack.c.bf16 %v1689_v29, %v1629_v12  ;;  %v5845_v0 = vpack.c.bf16 %v1690_v55, %v1630_v28  ;;  %v1810_v27 = vsel %vm445_vm6, %v12453_v38, %v6736_v58  ;;  %v1244_v28 = vadd.f32 %v9074_v33, %v8860_v59 }
 0x229   :  { %v12457_v34 = vunpack.i.h.bf16 %v9199_v16  ;;  %v6731_v2 = vunpack.i.l.bf16 %v9199_v16  ;;  %v1809_v29 = vsel %vm445_vm6, %v6736_v58, %v12642_v19  ;;  %v1175_v49 = vadd.f32 %v9039_v3, %v8860_v59 }
 0x22a   :  { %6959 = vrot.lane.b32.xlu1 %v9173_v10, %s7798_s25  ;;  %5844 = vmatprep.subr.bf16.mxu1 %v5843_v44  ;;  %v1511_v58 = vsel %vm140_vm1, %v6676_v20, %v6677_v35  ;;  %v1266_v3 = vmax.f32 %v1244_v28, 0.0 }
 0x22b   :  { %v1750_v55 = vsel %vm384_vm5, %v6697_v51, %v6731_v2  ;;  %5846 = vmatpush1.bf16.msra.mxu1 %v5845_v0  ;;  %v1749_v17 = vsel %vm384_vm5, %v6731_v2, %v12457_v34 }
 0x22c   :  { %6954 = vrot.lane.b32.xlu0 %v9173_v10, %s7796_s23  ;;  %v9229_v12 = vpop.permute.xlu1 %1822  ;;  %v5847_v44 = vpack.c.bf16 %v1809_v29, %v1749_v17  ;;  %v5849_v0 = vpack.c.bf16 %v1810_v27, %v1750_v55  ;;  %v12643_v27 = vunpack.i.h.bf16 %v9066_v21  ;;  %v1349_v55 = vrot.slane %v9083_v32, %v8879_v4 }
 0x22d   :  { %v9233_v38 = vpop.permute.xlu0 %6739  ;;  %v1869_v33 = vsel %vm506_vm7, %v9106_v56, %v9229_v12  ;;  %v12644_v17 = vunpack.i.l.bf16 %v9060_v25  ;;  %v1265_v21 = vmax.f32 %v1175_v49, 0.0  ;;  %v1345_v29 = vrot.slane %v9083_v32, %v8876_v14  ;;  %v9275_v49 = vld [vmem:[%s12433_s1 + $0x8] sm:$0xff] }
 0x22e   :  { %v12456_v2 = vunpack.i.l.bf16 %v9233_v38  ;;  %1846 = vrot.lane.b32.xlu1 %v9099_v13, %s7804_s12  ;;  %5848 = vmatprep.subr.bf16.mxu1 %v5847_v44  ;;  %v1571_v59 = vsel %vm201_vm2, %v6681_v18, %v12643_v27  ;;  %v6686_v25 = vunpack.i.l.bf16 %v9092_v42 }
 0x22f   :  { %5850 = vmatpush1.bf16.msra.mxu1 %v5849_v0  ;;  %v1870_v0 = vsel %vm506_vm7, %v9054_v46, %v9106_v56  ;;  %v5823_v27 = vpack.c.bf16 %v1571_v59, %v1511_v58  ;;  %v9290_v59 = vmul.f32 %v1345_v29, %v1265_v21 }
 0x230   :  { %v1452_v19 = vsel %vm79_vm0, %v12456_v2, %v12644_v17  ;;  %1842 = vrot.lane.b32.xlu0 %v9041_v15, %s7804_s12  ;;  %v9258_v35 = vpop.permute.xlu1 %1826  ;;  %1973 = vmatprep.subr.mxu1 %v1869_v33  ;;  %v6691_v33 = vunpack.i.l.bf16 %v9086_v41 }
 0x231   :  { %v9262_v28 = vpop.permute.xlu0 %6749  ;;  %v5821_v44 = vpack.c.bf16 %v1452_v19, %v8870_v50  ;;  %v9278_v50 = vmul.f32 %v1349_v55, %v1266_v3  ;;  %v6696_v3 = vunpack.i.l.bf16 %v9102_v1  ;;  %v12647_v55 = vunpack.i.h.bf16 %v9092_v42 }
 0x232   :  { %1840 = vrot.lane.b32.xlu1 %v9104_v36, %s7804_s12  ;;  %v12454_v32 = vunpack.i.l.bf16 %v9262_v28  ;;  %v12648_v19 = vmov 0.0   ;;  %v6983_v1 = vpack.i.bf16 %v9290_v59, %v9137_v22 }
 0x233   :  { %5822 = vmatpush1.bf16.msra.mxu0 %v5821_v44  ;;  %1974 = vmatpush1.msra.mxu1 %v1870_v0  ;;  %12645 = vst [vmem:[#allocation13_spill] sm:$0xff] %v9278_v50  ;;  %v6701_v0 = vunpack.i.l.bf16 %v9096_v39  ;;  %v1751_v34 = vsel %vm384_vm5, %v6696_v3, %v6697_v51 }
 0x234   :  { %6964 = vrot.lane.b32.xlu0 %v9173_v10, %s7800_s27  ;;  %v9283_v17 = vpop.permute.xlu1 %6744  ;;  %5824 = vmatprep.subr.bf16.mxu0 %v5823_v27  ;;  %v1631_v10 = vsel %vm262_vm3, %v6686_v25, %v12647_v55  ;;  %v1572_v44 = vsel %vm201_vm2, %v12454_v32, %v6681_v18  ;;  %v6973_v27 = vpack.i.bf16 %v9278_v50, %v9290_v59  ;;  %v12650_v18 = vunpack.i.h.bf16 %v9086_v41 }
 0x235   :  { %v12455_v56 = vunpack.i.l.bf16 %v9283_v17  ;;  %v9286_v58 = vpop.permute.xlu0 %6759  ;;  %5617 = vmatmul.mubr.msk.f32.vlgmr.msra.gmra.mrb[10].mxu1 %vm534_vm8, %v9275_v49 }
 0x236   :  { %12646 = vst [vmem:[#allocation14_spill] sm:$0xff] %v9286_v58  ;;  %1670 = vrot.lane.b32.xlu1 %v9278_v50, %s7799_s26  ;;  %2163 = vmatprep.mubr.f32.mxu1 %v12648_v19  ;;  %v12461_v29 = vunpack.i.l.bf16 %v9286_v58  ;;  %v1691_v32 = vsel %vm323_vm4, %v6691_v33, %v12650_v18  ;;  %v6762_v4 = vunpack.i.h.bf16 %v9286_v58 }
 0x237   :  { %v1512_v21 = vsel %vm140_vm1, %v12455_v56, %v6676_v20  ;;  %v5827_v2 = vpack.c.bf16 %v1691_v32, %v1631_v10 }
 0x238   :  { %1730 = vrot.lane.b32.xlu0 %v9278_v50, %s7802_s29  ;;  %v9312_v42 = vpop.permute.xlu1 %6754  ;;  %v5825_v55 = vpack.c.bf16 %v1572_v44, %v1512_v21  ;;  %v1692_v41 = vsel %vm323_vm4, %v12461_v29, %v6691_v33  ;;  %v12653_v21 = vunpack.i.h.bf16 %v9096_v39 }
 0x239   :  { %12649 = vst [vmem:[#allocation15_spill] sm:$0xff] %v9312_v42  ;;  %v12460_v20 = vunpack.i.l.bf16 %v9312_v42  ;;  %v9321_v56 = vpop.permute.xlu0 %6769 }
 0x23a   :  { %12651 = vst [vmem:[#allocation16_spill] sm:$0xff] %v9321_v56  ;;  %6974 = vrot.lane.b32.xlu1 %v6973_v27, %s7796_s23  ;;  %5826 = vmatpush1.bf16.msra.mxu0 %v5825_v55  ;;  %v12459_v32 = vunpack.i.l.bf16 %v9321_v56  ;;  %v1811_v33 = vsel %vm445_vm6, %v6701_v0, %v12653_v21  ;;  %v6772_v48 = vunpack.i.h.bf16 %v9321_v56 }
 0x23b   :  { %v1632_v44 = vsel %vm262_vm3, %v12460_v20, %v6686_v25  ;;  %5828 = vmatprep.subr.bf16.mxu0 %v5827_v2  ;;  %v5831_v25 = vpack.c.bf16 %v1811_v33, %v1751_v34  ;;  %v6747_v20 = vunpack.i.h.bf16 %v9283_v17 }
 0x23c   :  { %6969 = vrot.lane.b32.xlu0 %v6973_v27, %s7797_s24  ;;  %v9338_v10 = vpop.permute.xlu1 %6764  ;;  %v5829_v51 = vpack.c.bf16 %v1692_v41, %v1632_v44  ;;  %v1812_v2 = vsel %vm445_vm6, %v12459_v32, %v6701_v0  ;;  %v1871_v0 = vsel %vm506_vm7, %v9112_v24, %v9054_v46 }
 0x23d   :  { %12652 = vst [vmem:[#allocation17_spill] sm:$0xff] %v9338_v10  ;;  %v12458_v55 = vunpack.i.l.bf16 %v9338_v10  ;;  %v9347_v18 = vpop.permute.xlu0 %1824 }
 0x23e   :  { %6984 = vrot.lane.b32.xlu1 %v6983_v1, %s7799_s26  ;;  %5830 = vmatpush1.bf16.msra.mxu0 %v5829_v51  ;;  %v6742_v51 = vunpack.i.h.bf16 %v9233_v38 }
 0x23f   :  { %v1752_v39 = vsel %vm384_vm5, %v12458_v55, %v6696_v3  ;;  %5832 = vmatprep.subr.bf16.mxu0 %v5831_v25  ;;  %v1872_v25 = vsel %vm506_vm7, %v9048_v23, %v9112_v24  ;;  %v5615_v24 = vld [vmem:[%s12434_s2 + $0x8] sm:$0xff] }
 0x240   :  { %6979 = vrot.lane.b32.xlu0 %v6973_v27, %s7798_s25  ;;  %v9359_v41 = vpop.permute.xlu1 %1828  ;;  %v5833_v44 = vpack.c.bf16 %v1812_v2, %v1752_v39 }
 0x241   :  { %v9361_v34 = vpop.permute.xlu0 %6779 }
 0x242   :  { %6999 = vrot.lane.b32.xlu1 %v6983_v1, %s7801_s28  ;;  %5834 = vmatpush1.bf16.msra.mxu0 %v5833_v44 }
 0x243   :  { %1902 = vmatprep.subr.mxu0 %v1871_v0 }
 0x244   :  { %6989 = vrot.lane.b32.xlu0 %v6973_v27, %s7800_s27  ;;  %v9369_v3 = vpop.permute.xlu1 %6774 }
 0x245   :  { %v12462_v21 = vunpack.i.l.bf16 %v9369_v3  ;;  %v9373_v33 = vpop.permute.xlu0 %6789 }
 0x246   :  { %1790 = vrot.lane.b32.xlu1 %v9278_v50, %s7801_s28  ;;  %1903 = vmatpush1.msra.mxu0 %v1872_v25  ;;  %v12659_v58 = vunpack.i.l.bf16 %v9373_v33 }
 0x247   :  { %v1445_v46 = vsel %vm79_vm0, %v6742_v51, %v12462_v21  ;;  %5616 = vmatmul.mubr.msk.f32.vlgmr.msra.gmra.mrb[10].mxu0 %vm534_vm8, %v9275_v49 }
 0x248   :  { %6994 = vrot.lane.b32.xlu0 %v6983_v1, %s7802_s29  ;;  %v9388_v27 = vpop.permute.xlu1 %6784  ;;  %v5867_v2 = vpack.c.bf16 %v1445_v46, %v8952_v8  ;;  %2092 = vmatprep.mubr.f32.mxu0 %v12648_v19  ;;  %v6777_v8 = vunpack.i.h.bf16 %v9369_v3  ;;  %v6752_v46 = vunpack.i.h.bf16 %v9262_v28 }
 0x249   :  { %v9391_v39 = vpop.permute.xlu0 %6799  ;;  %v12475_v0 = vunpack.i.l.bf16 %v9388_v27  ;;  %v6787_v37 = vunpack.i.h.bf16 %v9388_v27 }
 0x24a   :  { %1848 = vrot.lane.b32.xlu1 %v9290_v59, %s7804_s12  ;;  %5868 = vmatprep.subr.bf16.mxu1 %v5867_v2  ;;  %v6782_v2 = vunpack.i.h.bf16 %v9361_v34 }
 0x24b   :  { %v1565_v60 = vsel %vm201_vm2, %v6752_v46, %v12475_v0  ;;  %v12655_v0 = vunpack.i.l.bf16 %v9361_v34 }
 0x24c   :  { %1852 = vrot.lane.b32.xlu0 %v9137_v22, %s7804_s12  ;;  %v9401_v1 = vpop.permute.xlu1 %6794 }
 0x24d   :  { %v9403_v44 = vpop.permute.xlu0 %1830  ;;  %v1505_v6 = vsel %vm140_vm1, %v6747_v20, %v12655_v0  ;;  %v12656_v0 = vunpack.i.h.bf16 %v9140_v62 }
 0x24e   :  { %1880 = vperm.xlu1 %7003, %v5615_v24   ;;  %v12654_v24 = vunpack.i.h.bf16 %v9122_v57 }
 0x250   :  { %1850 = vrot.lane.b32.xlu0 %v9278_v50, %s7804_s12  ;;  %v9409_v25 = vpop.permute.xlu1 %6804  ;;  %v1448_v29 = vsel %vm79_vm0, %v12654_v24, %v6777_v8  ;;  %s7806_s12 = smov 65  }
 0x251   :  { %v5853_v23 = vpack.c.bf16 %v1448_v29, %v8922_v52  ;;  %v6792_v52 = vunpack.i.h.bf16 %v9373_v33 }
 0x252   :  { %v9413_v55 = vpop.permute.xlu0 %6809 }
 0x253   :  { %v6811_v32 = vunpack.i.l.bf16 %v9413_v55 }
 0x254   :  { %v9421_v21 = vpop.permute.xlu1 %1834 }
 0x255   :  { %v1446_v47 = vsel %vm79_vm0, %v6811_v32, %v6742_v51  ;;  %v1447_v57 = vsel %vm79_vm0, %v6777_v8, %v6811_v32  ;;  %v5871_v32 = vpack.c.bf16 %v1565_v60, %v1505_v6  ;;  %v6757_v8 = vunpack.i.h.bf16 %v9312_v42 }
 0x256   :  { %v9434_v24 = vpop.permute.xlu0 %6814  ;;  %v5851_v14 = vpack.c.bf16 %v1447_v57, %v8911_v40  ;;  %v5869_v30 = vpack.c.bf16 %v1446_v47, %v8949_v31  ;;  %v6767_v40 = vunpack.i.h.bf16 %v9338_v10  ;;  %v1508_v57 = vsel %vm140_vm1, %v12656_v0, %v6782_v2 }
 0x257   :  { %v6816_v51 = vunpack.i.l.bf16 %v9434_v24  ;;  %v12657_v60 = vunpack.i.h.bf16 %v9116_v53  ;;  %v12658_v0 = vunpack.i.l.bf16 %v9401_v1 }
 0x258   :  { %5852 = vmatprep.subr.bf16.mxu0 %v5851_v14  ;;  %5870 = vmatpush1.bf16.msra.mxu1 %v5869_v30  ;;  %v9449_v31 = vpop.permute.xlu1 %6819  ;;  %v6797_v30 = vunpack.i.h.bf16 %v9401_v1 }
 0x259   :  { %v1568_v6 = vsel %vm201_vm2, %v12657_v60, %v6787_v37  ;;  %v6821_v29 = vunpack.i.l.bf16 %v9449_v31  ;;  %5854 = vmatpush1.bf16.msra.mxu0 %v5853_v23  ;;  %5872 = vmatprep.subr.bf16.mxu1 %v5871_v32  ;;  %v1506_v62 = vsel %vm140_vm1, %v6816_v51, %v6747_v20  ;;  %v1685_v53 = vsel %vm323_vm4, %v6762_v4, %v12658_v0 }
 0x25a   :  { %v9465_v47 = vpop.permute.xlu0 %6824  ;;  %v1507_v32 = vsel %vm140_vm1, %v6782_v2, %v6816_v51  ;;  %v12489_v20 = vunpack.i.l.bf16 %v9391_v39  ;;  %v1625_v0 = vsel %vm262_vm3, %v6757_v8, %v12659_v58  ;;  %v5857_v51 = vpack.c.bf16 %v1568_v6, %v1508_v57 }
 0x25b   :  { %v1566_v60 = vsel %vm201_vm2, %v6821_v29, %v6752_v46  ;;  %v6826_v23 = vunpack.i.l.bf16 %v9465_v47  ;;  %v1567_v14 = vsel %vm201_vm2, %v6787_v37, %v6821_v29  ;;  %v12660_v46 = vunpack.i.h.bf16 %v9169_v63 }
 0x25c   :  { %v9479_v10 = vpop.permute.xlu1 %6829  ;;  %v5855_v56 = vpack.c.bf16 %v1567_v14, %v1507_v32  ;;  %v5873_v42 = vpack.c.bf16 %v1566_v60, %v1506_v62  ;;  %v5875_v37 = vpack.c.bf16 %v1685_v53, %v1625_v0  ;;  %v12661_v29 = vunpack.i.h.bf16 %v9126_v5 }
 0x25d   :  { %v1628_v13 = vsel %vm262_vm3, %v12660_v46, %v6792_v52  ;;  %v6831_v2 = vunpack.i.l.bf16 %v9479_v10  ;;  %v6807_v62 = vunpack.i.h.bf16 %v9409_v25  ;;  %v1626_v60 = vsel %vm262_vm3, %v6826_v23, %v6757_v8 }
 0x25e   :  { %v1688_v14 = vsel %vm323_vm4, %v12661_v29, %v6797_v30  ;;  %v9497_v58 = vpop.permute.xlu0 %6834  ;;  %5856 = vmatprep.subr.bf16.mxu0 %v5855_v56  ;;  %5874 = vmatpush1.bf16.msra.mxu1 %v5873_v42  ;;  %v12662_v63 = vunpack.i.l.bf16 %v9409_v25  ;;  %v1627_v53 = vsel %vm262_vm3, %v6792_v52, %v6826_v23  ;;  %v6802_v56 = vunpack.i.h.bf16 %v9391_v39 }
 0x25f   :  { %v1686_v5 = vsel %vm323_vm4, %v6831_v2, %v6762_v4  ;;  %v6836_v6 = vunpack.i.l.bf16 %v9497_v58  ;;  %5858 = vmatpush1.bf16.msra.mxu0 %v5857_v51  ;;  %5876 = vmatprep.subr.bf16.mxu1 %v5875_v37  ;;  %v1687_v8 = vsel %vm323_vm4, %v6797_v30, %v6831_v2  ;;  %v1745_v4 = vsel %vm384_vm5, %v6767_v40, %v12489_v20 }
 0x260   :  { %v1805_v57 = vsel %vm445_vm6, %v6772_v48, %v12662_v63  ;;  %v9511_v42 = vpop.permute.xlu1 %6839  ;;  %v5859_v32 = vpack.c.bf16 %v1687_v8, %v1627_v53  ;;  %v5877_v0 = vpack.c.bf16 %v1686_v5, %v1626_v60  ;;  %v5861_v51 = vpack.c.bf16 %v1688_v14, %v1628_v13 }
 0x261   :  { %v6841_v46 = vunpack.i.l.bf16 %v9511_v42  ;;  %v5879_v37 = vpack.c.bf16 %v1805_v57, %v1745_v4  ;;  %v12663_v52 = vunpack.i.h.bf16 %v9166_v61  ;;  %v1746_v23 = vsel %vm384_vm5, %v6836_v6, %v6767_v40 }
 0x262   :  { %v9524_v2 = vpop.permute.xlu0 %1832  ;;  %5860 = vmatprep.subr.bf16.mxu0 %v5859_v32  ;;  %5878 = vmatpush1.bf16.msra.mxu1 %v5877_v0  ;;  %v1747_v13 = vsel %vm384_vm5, %v6802_v56, %v6836_v6  ;;  %v12664_v14 = vunpack.i.h.bf16 %v9199_v16  ;;  %v1867_v6 = vsel %vm506_vm7, %v9347_v18, %v9258_v35  ;;  %v1868_v0 = vsel %vm506_vm7, %v9229_v12, %v9347_v18 }
 0x263   :  { %v1808_v30 = vsel %vm445_vm6, %v12663_v52, %v6807_v62  ;;  %v1806_v29 = vsel %vm445_vm6, %v6841_v46, %v6772_v48  ;;  %5862 = vmatpush1.bf16.msra.mxu0 %v5861_v51  ;;  %5880 = vmatprep.subr.bf16.mxu1 %v5879_v37  ;;  %v1807_v61 = vsel %vm445_vm6, %v6807_v62, %v6841_v46  ;;  %v6812_v62 = vunpack.i.h.bf16 %v9413_v55 }
 0x264   :  { %v1748_v40 = vsel %vm384_vm5, %v12664_v14, %v6802_v56  ;;  %v9536_v60 = vpop.permute.xlu1 %1836  ;;  %v5863_v63 = vpack.c.bf16 %v1807_v61, %v1747_v13  ;;  %v5881_v57 = vpack.c.bf16 %v1806_v29, %v1746_v23  ;;  %v1865_v48 = vsel %vm506_vm7, %v9359_v41, %v9403_v44 }
 0x265   :  { %v5865_v5 = vpack.c.bf16 %v1808_v30, %v1748_v40  ;;  %v1866_v56 = vsel %vm506_vm7, %v9258_v35, %v9359_v41  ;;  %v12665_v29 = vunpack.i.l.bf16 %v9369_v3  ;;  %v6817_v14 = vunpack.i.h.bf16 %v9434_v24 }
 0x266   :  { %v9538_v53 = vpop.permute.xlu0 %6844  ;;  %5864 = vmatprep.subr.bf16.mxu0 %v5863_v63  ;;  %5882 = vmatpush1.bf16.msra.mxu1 %v5881_v57  ;;  %v6822_v40 = vunpack.i.h.bf16 %v9449_v31 }
 0x267   :  { %v12488_v16 = vunpack.i.l.bf16 %v9538_v53  ;;  %5866 = vmatpush1.bf16.msra.mxu0 %v5865_v5  ;;  %2115 = vmatprep.subr.mxu1 %v1865_v48  ;;  %v6847_v51 = vunpack.i.h.bf16 %v9538_v53  ;;  %v6827_v5 = vunpack.i.h.bf16 %v9465_v47  ;;  %v6832_v48 = vunpack.i.h.bf16 %v9479_v10 }
 0x268   :  { %v9550_v8 = vpop.permute.xlu1 %6854  ;;  %2044 = vmatprep.subr.mxu0 %v1867_v6  ;;  %v12666_v47 = vunpack.i.l.bf16 %v9388_v27 }
 0x269   :  { %v1441_v55 = vsel %vm79_vm0, %v6812_v62, %v12488_v16  ;;  %v12487_v52 = vunpack.i.l.bf16 %v9550_v8  ;;  %v1444_v13 = vsel %vm79_vm0, %v12665_v29, %v6847_v51  ;;  %v6857_v61 = vunpack.i.h.bf16 %v9550_v8 }
 0x26a   :  { %v9560_v32 = vpop.permute.xlu0 %6849  ;;  %2116 = vmatpush1.msra.mxu1 %v1866_v56  ;;  %v5899_v4 = vpack.c.bf16 %v1441_v55, %v8997_v7  ;;  %v5885_v24 = vpack.c.bf16 %v1444_v13, %v8974_v9  ;;  %v12667_v13 = vunpack.i.l.bf16 %v9361_v34 }
 0x26b   :  { %2045 = vmatpush1.msra.mxu0 %v1868_v0  ;;  %5619 = vmatmul.mubr.msk.f32.vlgmr.msra.gmra.mrb[12].mxu1 %vm534_vm8, %v9275_v49  ;;  %v12486_v30 = vunpack.i.l.bf16 %v9560_v32  ;;  %v6852_v63 = vunpack.i.h.bf16 %v9560_v32  ;;  %v1561_v10 = vsel %vm201_vm2, %v6822_v40, %v12487_v52  ;;  %v1564_v0 = vsel %vm201_vm2, %v12666_v47, %v6857_v61 }
 0x26c   :  { %5900 = vmatprep.subr.bf16.mxu1 %v5899_v4  ;;  %v9569_v35 = vpop.permute.xlu1 %6864  ;;  %5618 = vmatmul.mubr.msk.f32.vlgmr.msra.gmra.mrb[12].mxu0 %vm534_vm8, %v9275_v49 }
 0x26d   :  { %2305 = vmatprep.mubr.f32.mxu1 %v12648_v19  ;;  %2234 = vmatprep.mubr.f32.mxu0 %v12648_v19  ;;  %v12490_v6 = vunpack.i.l.bf16 %v9569_v35  ;;  %v1501_v31 = vsel %vm140_vm1, %v6817_v14, %v12486_v30  ;;  %v1504_v30 = vsel %vm140_vm1, %v12667_v13, %v6852_v63  ;;  %v6867_v52 = vunpack.i.h.bf16 %v9569_v35 }
 0x26e   :  { %v9575_v41 = vpop.permute.xlu0 %6859  ;;  %v5903_v56 = vpack.c.bf16 %v1561_v10, %v1501_v31 }
 0x26f   :  { %v1681_v34 = vsel %vm323_vm4, %v6832_v48, %v12490_v6 }
 0x270   :  { %v9577_v46 = vpop.permute.xlu1 %6874 }
 0x272   :  { %v9579_v12 = vpop.permute.xlu0 %6869 }
 0x274   :  { %v9581_v7 = vpop.permute.xlu1 %1662 }
 0x276   :  { %v9583_v18 = vpop.permute.xlu0 %1838 }
 0x278   :  { %v9586_v37 = vpop.permute.xlu1 %1782 }
 0x27a   :  { %v9590_v23 = vpop.permute.xlu0 %1722 }
 0x27c   :  { %v9600_v57 = vpop.permute.xlu1 %6879 }
 0x27d   :  { %v6881_v3 = vunpack.i.l.bf16 %v9600_v57 }
 0x27e   :  { %v9607_v55 = vpop.permute.xlu0 %6884 }
 0x27f   :  { %v1442_v4 = vsel %vm79_vm0, %v6881_v3, %v6812_v62  ;;  %v6886_v9 = vunpack.i.l.bf16 %v9607_v55  ;;  %v1443_v29 = vsel %vm79_vm0, %v6847_v51, %v6881_v3  ;;  %v6862_v62 = vunpack.i.h.bf16 %v9575_v41 }
 0x280   :  { %v9632_v16 = vpop.permute.xlu1 %6889  ;;  %v5883_v27 = vpack.c.bf16 %v1443_v29, %v9018_v43  ;;  %v5901_v47 = vpack.c.bf16 %v1442_v4, %v9002_v45  ;;  %v12668_v45 = vunpack.i.l.bf16 %v9575_v41  ;;  %v5889_v3 = vpack.c.bf16 %v1564_v0, %v1504_v30 }
 0x281   :  { %v6891_v20 = vunpack.i.l.bf16 %v9632_v16  ;;  %v1502_v13 = vsel %vm140_vm1, %v6886_v9, %v6817_v14  ;;  %v1503_v29 = vsel %vm140_vm1, %v6852_v63, %v6886_v9 }
 0x282   :  { %v9646_v43 = vpop.permute.xlu0 %6894  ;;  %5884 = vmatprep.subr.bf16.mxu0 %v5883_v27  ;;  %5902 = vmatpush1.bf16.msra.mxu1 %v5901_v47  ;;  %v1621_v31 = vsel %vm262_vm3, %v6827_v5, %v12668_v45  ;;  %v6837_v27 = vunpack.i.h.bf16 %v9497_v58  ;;  %v6842_v47 = vunpack.i.h.bf16 %v9511_v42  ;;  %v12671_v42 = vunpack.i.l.bf16 %v9577_v46 }
 0x283   :  { %v1562_v10 = vsel %vm201_vm2, %v6891_v20, %v6822_v40  ;;  %v6896_v4 = vunpack.i.l.bf16 %v9646_v43  ;;  %5886 = vmatpush1.bf16.msra.mxu0 %v5885_v24  ;;  %5904 = vmatprep.subr.bf16.mxu1 %v5903_v56  ;;  %v1563_v14 = vsel %vm201_vm2, %v6857_v61, %v6891_v20  ;;  %v5907_v50 = vpack.c.bf16 %v1681_v34, %v1621_v31 }
 0x284   :  { %v9661_v6 = vpop.permute.xlu1 %6899  ;;  %v5887_v45 = vpack.c.bf16 %v1563_v14, %v1503_v29  ;;  %v5905_v51 = vpack.c.bf16 %v1562_v10, %v1502_v13  ;;  %v12669_v56 = vunpack.i.l.bf16 %v9401_v1  ;;  %v12670_v20 = vunpack.i.l.bf16 %v9579_v12 }
 0x285   :  { %v6901_v40 = vunpack.i.l.bf16 %v9661_v6  ;;  %v1801_v30 = vsel %vm445_vm6, %v6842_v47, %v12671_v42  ;;  %v12672_v61 = vunpack.i.l.bf16 %v9373_v33  ;;  %v1622_v0 = vsel %vm262_vm3, %v6896_v4, %v6827_v5 }
 0x286   :  { %v1684_v63 = vsel %vm323_vm4, %v12669_v56, %v6867_v52  ;;  %v9668_v24 = vpop.permute.xlu0 %6904  ;;  %5888 = vmatprep.subr.bf16.mxu0 %v5887_v45  ;;  %5906 = vmatpush1.bf16.msra.mxu1 %v5905_v51  ;;  %v1741_v58 = vsel %vm384_vm5, %v6837_v27, %v12670_v20  ;;  %v6877_v51 = vunpack.i.h.bf16 %v9577_v46  ;;  %v6872_v13 = vunpack.i.h.bf16 %v9579_v12 }
 0x287   :  { %v1624_v1 = vsel %vm262_vm3, %v12672_v61, %v6862_v62  ;;  %v1682_v9 = vsel %vm323_vm4, %v6901_v40, %v6832_v48  ;;  %v6906_v34 = vunpack.i.l.bf16 %v9668_v24  ;;  %5890 = vmatpush1.bf16.msra.mxu0 %v5889_v3  ;;  %5908 = vmatprep.subr.bf16.mxu1 %v5907_v50  ;;  %v1683_v33 = vsel %vm323_vm4, %v6867_v52, %v6901_v40 }
 0x288   :  { %v9689_v31 = vpop.permute.xlu1 %6909  ;;  %v5909_v10 = vpack.c.bf16 %v1682_v9, %v1622_v0  ;;  %v1623_v5 = vsel %vm262_vm3, %v6862_v62, %v6896_v4  ;;  %v5911_v48 = vpack.c.bf16 %v1801_v30, %v1741_v58  ;;  %v5893_v50 = vpack.c.bf16 %v1684_v63, %v1624_v1 }
 0x289   :  { %v6911_v29 = vunpack.i.l.bf16 %v9689_v31  ;;  %v5891_v3 = vpack.c.bf16 %v1683_v33, %v1623_v5  ;;  %v1742_v45 = vsel %vm384_vm5, %v6906_v34, %v6837_v27  ;;  %v1743_v52 = vsel %vm384_vm5, %v6872_v13, %v6906_v34 }
 0x28a   :  { %v9696_v14 = vpop.permute.xlu0 %1844  ;;  %5910 = vmatpush1.bf16.msra.mxu1 %v5909_v10  ;;  %v12673_v62 = vunpack.i.l.bf16 %v9409_v25  ;;  %v12674_v63 = vunpack.i.l.bf16 %v9391_v39  ;;  %v1861_v25 = vsel %vm506_vm7, %v9536_v60, %v9583_v18  ;;  %v6882_v39 = vunpack.i.h.bf16 %v9600_v57 }
 0x28b   :  { %v1802_v56 = vsel %vm445_vm6, %v6911_v29, %v6842_v47  ;;  %5912 = vmatprep.subr.bf16.mxu1 %v5911_v48  ;;  %v1803_v40 = vsel %vm445_vm6, %v6877_v51, %v6911_v29  ;;  %5892 = vmatprep.subr.bf16.mxu0 %v5891_v3  ;;  %v1863_v0 = vsel %vm506_vm7, %v9524_v2, %v9421_v21  ;;  %v6892_v29 = vunpack.i.h.bf16 %v9632_v16 }
 0x28c   :  { %v1804_v4 = vsel %vm445_vm6, %v12673_v62, %v6877_v51  ;;  %v1744_v27 = vsel %vm384_vm5, %v12674_v63, %v6872_v13  ;;  %v9714_v20 = vpop.permute.xlu1 %6924  ;;  %v5895_v47 = vpack.c.bf16 %v1803_v40, %v1743_v52  ;;  %v5913_v58 = vpack.c.bf16 %v1802_v56, %v1742_v45  ;;  %5894 = vmatpush1.bf16.msra.mxu0 %v5893_v50 }
 0x28d   :  { %v5897_v61 = vpack.c.bf16 %v1804_v4, %v1744_v27  ;;  %v1862_v9 = vsel %vm506_vm7, %v9421_v21, %v9536_v60  ;;  %v1864_v13 = vsel %vm506_vm7, %v9403_v44, %v9524_v2  ;;  %v6926_v10 = vunpack.i.l.bf16 %v9714_v20 }
 0x28e   :  { %v9716_v42 = vpop.permute.xlu0 %6914  ;;  %5896 = vmatprep.subr.bf16.mxu0 %v5895_v47  ;;  %5914 = vmatpush1.bf16.msra.mxu1 %v5913_v58  ;;  %v6887_v44 = vunpack.i.h.bf16 %v9607_v55  ;;  %v12675_v48 = vunpack.i.l.bf16 %v9538_v53  ;;  %v6927_v63 = vunpack.i.h.bf16 %v9714_v20 }
 0x28f   :  { %v6916_v30 = vunpack.i.l.bf16 %v9716_v42  ;;  %2257 = vmatprep.subr.mxu1 %v1861_v25  ;;  %v6917_v60 = vunpack.i.h.bf16 %v9716_v42  ;;  %v1557_v53 = vsel %vm201_vm2, %v6892_v29, %v6926_v10  ;;  %v6897_v25 = vunpack.i.h.bf16 %v9646_v43 }
 0x290   :  { %v9724_v1 = vpop.permute.xlu1 %6934  ;;  %5898 = vmatpush1.bf16.msra.mxu0 %v5897_v61  ;;  %v12676_v43 = vunpack.i.l.bf16 %v9560_v32 }
 0x291   :  { %v1437_v57 = vsel %vm79_vm0, %v6882_v39, %v6916_v30  ;;  %2186 = vmatprep.subr.mxu0 %v1863_v0  ;;  %v1440_v3 = vsel %vm79_vm0, %v12675_v48, %v6917_v60 }
 0x292   :  { %v9738_v34 = vpop.permute.xlu0 %6919  ;;  %2258 = vmatpush1.msra.mxu1 %v1862_v9  ;;  %v5931_v51 = vpack.c.bf16 %v1437_v57, %v9050_v11  ;;  %v5917_v47 = vpack.c.bf16 %v1440_v3, %v9020_v54  ;;  %v6902_v54 = vunpack.i.h.bf16 %v9661_v6  ;;  %v12677_v6 = vunpack.i.l.bf16 %v9550_v8 }
 0x293   :  { %5621 = vmatmul.mubr.msk.f32.vlgmr.msra.gmra.mrb[14].mxu1 %vm534_vm8, %v9275_v49  ;;  %v6921_v33 = vunpack.i.l.bf16 %v9738_v34  ;;  %v6922_v56 = vunpack.i.h.bf16 %v9738_v34 }
 0x294   :  { %5932 = vmatprep.subr.bf16.mxu1 %v5931_v51  ;;  %v9747_v21 = vpop.permute.xlu1 %6944  ;;  %2447 = vmatprep.mubr.f32.mxu1 %v12648_v19  ;;  %v1560_v32 = vsel %vm201_vm2, %v12677_v6, %v6927_v63 }
 0x295   :  { %2187 = vmatpush1.msra.mxu0 %v1864_v13  ;;  %v1497_v45 = vsel %vm140_vm1, %v6887_v44, %v6921_v33  ;;  %v1500_v9 = vsel %vm140_vm1, %v12676_v43, %v6922_v56 }
 0x296   :  { %5620 = vmatmul.mubr.msk.f32.vlgmr.msra.gmra.mrb[14].mxu0 %vm534_vm8, %v9275_v49  ;;  %v9754_v11 = vpop.permute.xlu0 %6929  ;;  %v5935_v58 = vpack.c.bf16 %v1557_v53, %v1497_v45  ;;  %v5921_v45 = vpack.c.bf16 %v1560_v32, %v1500_v9 }
 0x297   :  { %2376 = vmatprep.mubr.f32.mxu0 %v12648_v19  ;;  %v6931_v52 = vunpack.i.l.bf16 %v9754_v11 }
 0x298   :  { %v9759_v2 = vpop.permute.xlu1 %6949 }
 0x299   :  { %v6951_v5 = vunpack.i.l.bf16 %v9759_v2  ;;  %v1617_v51 = vsel %vm262_vm3, %v6897_v25, %v6931_v52 }
 0x29a   :  { %v9767_v50 = vpop.permute.xlu0 %6939 }
 0x29b   :  { %v1438_v55 = vsel %vm79_vm0, %v6951_v5, %v6882_v39  ;;  %v1439_v16 = vsel %vm79_vm0, %v6917_v60, %v6951_v5  ;;  %v6936_v39 = vunpack.i.l.bf16 %v9724_v1  ;;  %v6941_v8 = vunpack.i.l.bf16 %v9767_v50 }
 0x29c   :  { %v9783_v40 = vpop.permute.xlu1 %6959  ;;  %v5915_v62 = vpack.c.bf16 %v1439_v16, %v9104_v36  ;;  %v5933_v4 = vpack.c.bf16 %v1438_v55, %v9041_v15  ;;  %v6932_v16 = vunpack.i.h.bf16 %v9754_v11 }
 0x29d   :  { %v6961_v27 = vunpack.i.l.bf16 %v9783_v40  ;;  %v1677_v3 = vsel %vm323_vm4, %v6902_v54, %v6936_v39 }
 0x29e   :  { %v9792_v61 = vpop.permute.xlu0 %6954  ;;  %5916 = vmatprep.subr.bf16.mxu0 %v5915_v62  ;;  %5934 = vmatpush1.bf16.msra.mxu1 %v5933_v4  ;;  %v5939_v55 = vpack.c.bf16 %v1677_v3, %v1617_v51  ;;  %v6942_v62 = vunpack.i.h.bf16 %v9767_v50  ;;  %v6907_v4 = vunpack.i.h.bf16 %v9668_v24  ;;  %v12695_v50 = vld [vmem:[#allocation11_spill] sm:$0xff] }
 0x29f   :  { %v1558_v36 = vsel %vm201_vm2, %v6961_v27, %v6892_v29  ;;  %v6956_v15 = vunpack.i.l.bf16 %v9792_v61  ;;  %5918 = vmatpush1.bf16.msra.mxu0 %v5917_v47  ;;  %5936 = vmatprep.subr.bf16.mxu1 %v5935_v58  ;;  %v1559_v0 = vsel %vm201_vm2, %v6927_v63, %v6961_v27  ;;  %v6946_v63 = vunpack.i.l.bf16 %v9747_v21 }
 0x2a0   :  { %v9804_v57 = vpop.permute.xlu1 %1846  ;;  %v1678_v58 = vsel %vm323_vm4, %v9581_v7, %v6902_v54  ;;  %v1737_v43 = vsel %vm384_vm5, %v6907_v4, %v6941_v8  ;;  %v1739_v51 = vsel %vm384_vm5, %v6942_v62, %v9590_v23 }
 0x2a1   :  { %v1498_v13 = vsel %vm140_vm1, %v6956_v15, %v6887_v44  ;;  %v1499_v60 = vsel %vm140_vm1, %v6922_v56, %v6956_v15  ;;  %v6912_v44 = vunpack.i.h.bf16 %v9689_v31  ;;  %v6937_v56 = vunpack.i.h.bf16 %v9724_v1  ;;  %v12693_v1 = vld [vmem:[#allocation17_spill] sm:$0xff] }
 0x2a2   :  { %v9818_v29 = vpop.permute.xlu0 %1842  ;;  %v5919_v5 = vpack.c.bf16 %v1559_v0, %v1499_v60  ;;  %v5937_v48 = vpack.c.bf16 %v1558_v36, %v1498_v13  ;;  %v6947_v31 = vunpack.i.h.bf16 %v9747_v21  ;;  %v12678_v15 = vunpack.i.l.bf16 %v9575_v41 }
 0x2a3   :  { %v1798_v36 = vsel %vm445_vm6, %v9586_v37, %v6912_v44  ;;  %v1679_v41 = vsel %vm323_vm4, %v6937_v56, %v9581_v7  ;;  %v12679_v13 = vunpack.i.l.bf16 %v9569_v35  ;;  %v6952_v7 = vunpack.i.h.bf16 %v9759_v2 }
 0x2a4   :  { %5920 = vmatprep.subr.bf16.mxu0 %v5919_v5  ;;  %5938 = vmatpush1.bf16.msra.mxu1 %v5937_v48  ;;  %v9827_v53 = vpop.permute.xlu1 %1840  ;;  %v1620_v24 = vsel %vm262_vm3, %v12678_v15, %v6932_v16  ;;  %v1797_v5 = vsel %vm445_vm6, %v6912_v44, %v6946_v63  ;;  %v1799_v35 = vsel %vm445_vm6, %v6947_v31, %v9586_v37  ;;  %v6962_v2 = vunpack.i.h.bf16 %v9783_v40 }
 0x2a5   :  { %5922 = vmatpush1.bf16.msra.mxu0 %v5921_v45  ;;  %5940 = vmatprep.subr.bf16.mxu1 %v5939_v55  ;;  %v1680_v60 = vsel %vm323_vm4, %v12679_v13, %v6937_v56  ;;  %v5943_v3 = vpack.c.bf16 %v1797_v5, %v1737_v43  ;;  %v12680_v45 = vunpack.i.l.bf16 %v9579_v12  ;;  %v5927_v56 = vpack.c.bf16 %v1799_v35, %v1739_v51 }
 0x2a6   :  { %v9833_v27 = vpop.permute.xlu0 %6964  ;;  %v5925_v48 = vpack.c.bf16 %v1680_v60, %v1620_v24  ;;  %v1738_v44 = vsel %vm384_vm5, %v9590_v23, %v6907_v4  ;;  %v12681_v37 = vunpack.i.l.bf16 %v9577_v46  ;;  %v1857_v46 = vsel %vm506_vm7, %v9696_v14, %v9804_v57 }
 0x2a7   :  { %v6966_v47 = vunpack.i.l.bf16 %v9833_v27  ;;  %v1740_v55 = vsel %vm384_vm5, %v12680_v45, %v6942_v62  ;;  %v6967_v42 = vunpack.i.h.bf16 %v9833_v27  ;;  %v12686_v45 = vld [vmem:[#allocation12_spill] sm:$0xff] }
 0x2a8   :  { %v9847_v0 = vpop.permute.xlu1 %1670  ;;  %v1800_v12 = vsel %vm445_vm6, %v12681_v37, %v6947_v31  ;;  %v12683_v31 = vunpack.i.l.bf16 %v9283_v17 }
 0x2a9   :  { %v1618_v9 = vsel %vm262_vm3, %v6966_v47, %v6897_v25  ;;  %v1619_v54 = vsel %vm262_vm3, %v6932_v16, %v6966_v47  ;;  %v6957_v47 = vunpack.i.h.bf16 %v9792_v61  ;;  %v5929_v43 = vpack.c.bf16 %v1800_v12, %v1740_v55  ;;  %v12687_v12 = vld [vmem:[#allocation14_spill] sm:$0xff] }
 0x2aa   :  { %v9867_v6 = vpop.permute.xlu0 %1730  ;;  %v5923_v32 = vpack.c.bf16 %v1679_v41, %v1619_v54  ;;  %v5941_v25 = vpack.c.bf16 %v1678_v58, %v1618_v9  ;;  %v5945_v58 = vpack.c.bf16 %v1798_v36, %v1738_v44  ;;  %v12682_v9 = vunpack.i.l.bf16 %v9233_v38 }
 0x2ab   :  { %v1859_v38 = vsel %vm506_vm7, %v9827_v53, %v9818_v29  ;;  %v1513_v36 = vsel %vm140_vm1, %v6957_v47, %v12683_v31  ;;  %v12684_v54 = vunpack.i.l.bf16 %v9262_v28 }
 0x2ac   :  { %5924 = vmatprep.subr.bf16.mxu0 %v5923_v32  ;;  %5942 = vmatpush1.bf16.msra.mxu1 %v5941_v25  ;;  %v6975_v16 = vpop.permute.xlu1 %6974  ;;  %v1453_v23 = vsel %vm79_vm0, %v6952_v7, %v12682_v9 }
 0x2ad   :  { %5926 = vmatpush1.bf16.msra.mxu0 %v5925_v48  ;;  %5944 = vmatprep.subr.bf16.mxu1 %v5943_v3  ;;  %v6977_v40 = vunpack.i.h.bf16 %v6975_v16  ;;  %v6976_v61 = vunpack.i.l.bf16 %v6975_v16  ;;  %v1573_v41 = vsel %vm201_vm2, %v6962_v2, %v12684_v54  ;;  %v5963_v17 = vpack.c.bf16 %v1453_v23, %v9137_v22 }
 0x2ae   :  { %v6970_v62 = vpop.permute.xlu0 %6969  ;;  %5928 = vmatprep.subr.bf16.mxu0 %v5927_v56  ;;  %v1860_v22 = vsel %vm506_vm7, %v9583_v18, %v9827_v53  ;;  %v5967_v48 = vpack.c.bf16 %v1573_v41, %v1513_v36 }
 0x2af   :  { %v6972_v15 = vunpack.i.h.bf16 %v6970_v62  ;;  %v6971_v24 = vunpack.i.l.bf16 %v6970_v62  ;;  %v1495_v3 = vsel %vm140_vm1, %v6976_v61, %v6977_v40 }
 0x2b0   :  { %5946 = vmatpush1.bf16.msra.mxu1 %v5945_v58  ;;  %v9894_v4 = vpop.permute.xlu1 %6984 }
 0x2b1   :  { %5930 = vmatpush1.bf16.msra.mxu0 %v5929_v43  ;;  %2399 = vmatprep.subr.mxu1 %v1857_v46  ;;  %v1434_v51 = vsel %vm79_vm0, %v6972_v15, %v6952_v7  ;;  %v1436_v13 = vsel %vm79_vm0, %v6916_v30, %v6971_v24  ;;  %v1435_v32 = vsel %vm79_vm0, %v6971_v24, %v6972_v15  ;;  %v6986_v28 = vunpack.i.l.bf16 %v9894_v4  ;;  %v12689_v24 = vld [vmem:[#allocation15_spill] sm:$0xff] }
 0x2b2   :  { %v6980_v60 = vpop.permute.xlu0 %6979  ;;  %2328 = vmatprep.subr.mxu0 %v1859_v38  ;;  %v1858_v7 = vsel %vm506_vm7, %v9818_v29, %v9696_v14  ;;  %v6987_v35 = vunpack.i.h.bf16 %v9894_v4  ;;  %v5947_v14 = vpack.c.bf16 %v1435_v32, %v9290_v59  ;;  %v12685_v29 = vld [vmem:[#allocation13_spill] sm:$0xff]  ;;  %v5949_v55 = vpack.c.bf16 %v1436_v13, %v12686_v45 }
 0x2b3   :  { %v6982_v25 = vunpack.i.h.bf16 %v6980_v60  ;;  %v6981_v5 = vunpack.i.l.bf16 %v6980_v60  ;;  %v5965_v27 = vpack.c.bf16 %v1434_v51, %v12685_v29  ;;  %v12690_v43 = vunpack.i.l.bf16 %v12689_v24  ;;  %v12691_v51 = vld [vmem:[#allocation16_spill] sm:$0xff]  ;;  %v7794_v29 = vld [vmem:[%s12433_s1 + $0x8] sm:$0xff] }
 0x2b4   :  { %2400 = vmatpush1.msra.mxu1 %v1858_v7  ;;  %v9927_v30 = vpop.permute.xlu1 %6999  ;;  %v1674_v54 = vsel %vm323_vm4, %v9847_v0, %v6986_v28  ;;  %v1676_v41 = vsel %vm323_vm4, %v6936_v39, %v6987_v35  ;;  %v12692_v11 = vunpack.i.l.bf16 %v12691_v51  ;;  %v5626_v45 = vld [vmem:[%s12435_s3 + $0x14] sm:$0xff] }
 0x2b5   :  { %2329 = vmatpush1.msra.mxu0 %v1860_v22  ;;  %5623 = vmatmul.mubr.msk.f32.vlgmr.msra.gmra.mrb[16].mxu1 %vm534_vm8, %v9275_v49  ;;  %v1554_v16 = vsel %vm201_vm2, %v6982_v25, %v6962_v2  ;;  %v1556_v18 = vsel %vm201_vm2, %v6926_v10, %v6981_v5  ;;  %v1555_v59 = vsel %vm201_vm2, %v6981_v5, %v6982_v25  ;;  %v12688_v2 = vunpack.i.l.bf16 %v12687_v12 }
 0x2b6   :  { %5964 = vmatprep.subr.bf16.mxu1 %v5963_v17  ;;  %v6990_v53 = vpop.permute.xlu0 %6989  ;;  %5622 = vmatmul.mubr.msk.f32.vlgmr.msra.gmra.mrb[16].mxu0 %vm534_vm8, %v9275_v49  ;;  %v5951_v37 = vpack.c.bf16 %v1555_v59, %v1495_v3  ;;  %v1494_v10 = vsel %vm140_vm1, %v6977_v40, %v6957_v47  ;;  %v1496_v49 = vsel %vm140_vm1, %v6921_v33, %v6976_v61  ;;  %v7001_v62 = vunpack.i.l.bf16 %v9927_v30 }
 0x2b7   :  { %v6992_v56 = vunpack.i.h.bf16 %v6990_v53  ;;  %v6991_v44 = vunpack.i.l.bf16 %v6990_v53  ;;  %5948 = vmatprep.subr.bf16.mxu0 %v5947_v14  ;;  %5966 = vmatpush1.bf16.msra.mxu1 %v5965_v27  ;;  %v1693_v20 = vsel %vm323_vm4, %v6986_v28, %v12688_v2  ;;  %v5969_v58 = vpack.c.bf16 %v1554_v16, %v1494_v10 }
 0x2b8   :  { %5950 = vmatpush1.bf16.msra.mxu0 %v5949_v55  ;;  %5968 = vmatprep.subr.bf16.mxu1 %v5967_v48  ;;  %v5953_v15 = vpack.c.bf16 %v1556_v18, %v1496_v49  ;;  %v1633_v9 = vsel %vm262_vm3, %v6967_v42, %v12690_v43  ;;  %v1675_v47 = vsel %vm323_vm4, %v6987_v35, %v9847_v0  ;;  %v7002_v34 = vunpack.i.h.bf16 %v9927_v30  ;;  %v1791_v23 = vpop.permute.xlu1 %1790  ;;  %v12696_v18 = vld [vmem:[#allocation5_spill] sm:$0xff] }
 0x2b9   :  { %5952 = vmatprep.subr.bf16.mxu0 %v5951_v37  ;;  %v1614_v33 = vsel %vm262_vm3, %v6992_v56, %v6967_v42  ;;  %v5971_v61 = vpack.c.bf16 %v1693_v20, %v1633_v9  ;;  %v1615_v4 = vsel %vm262_vm3, %v6991_v44, %v6992_v56  ;;  %2589 = vmatprep.mubr.f32.mxu1 %v12648_v19  ;;  %v12694_v17 = vunpack.i.l.bf16 %v12693_v1  ;;  %v12697_v56 = vld [vmem:[#allocation7_spill] sm:$0xff] }
 0x2ba   :  { %v6995_v40 = vpop.permute.xlu0 %6994  ;;  %2518 = vmatprep.mubr.f32.mxu0 %v12648_v19  ;;  %v1616_v46 = vsel %vm262_vm3, %v6931_v52, %v6991_v44  ;;  %v5955_v36 = vpack.c.bf16 %v1675_v47, %v1615_v4  ;;  %v1813_v52 = vsel %vm445_vm6, %v7001_v62, %v12692_v11  ;;  %v1795_v13 = vsel %vm445_vm6, %v7002_v34, %v1791_v23  ;;  %v12700_v4 = vld [vmem:[#allocation9_spill] sm:$0xff] }
 0x2bb   :  { %v6997_v38 = vunpack.i.h.bf16 %v6995_v40  ;;  %v6996_v31 = vunpack.i.l.bf16 %v6995_v40  ;;  %5970 = vmatpush1.bf16.msra.mxu1 %v5969_v58  ;;  %v5973_v60 = vpack.c.bf16 %v1674_v54, %v1614_v33  ;;  %v5957_v25 = vpack.c.bf16 %v1676_v41, %v1616_v46  ;;  %v12698_v58 = vld [vmem:[#allocation3_spill] sm:$0xff]  ;;  %v12699_v33 = vld [vmem:[#allocation4_spill] sm:$0xff] }
 0x2bc   :  { %5954 = vmatpush1.bf16.msra.mxu0 %v5953_v15  ;;  %5972 = vmatprep.subr.bf16.mxu1 %v5971_v61  ;;  %v1794_v30 = vsel %vm445_vm6, %v1791_v23, %v7001_v62  ;;  %v1849_v48 = vpop.permute.xlu1 %1848  ;;  %v2634_v53 = vrot.slane %v5626_v45, %v12696_v18  ;;  %v2638_v44 = vrot.slane %v5626_v45, %v12697_v56  ;;  %v12701_v54 = vld [vmem:[#allocation8_spill] sm:$0xff] }
 0x2bd   :  { %5956 = vmatprep.subr.bf16.mxu0 %v5955_v36  ;;  %v1735_v0 = vsel %vm384_vm5, %v6997_v38, %v9867_v6  ;;  %v1753_v39 = vsel %vm384_vm5, %v6996_v31, %v12694_v17  ;;  %v1734_v32 = vsel %vm384_vm5, %v9867_v6, %v6996_v31  ;;  %v1736_v42 = vsel %vm384_vm5, %v6941_v8, %v6997_v38  ;;  %v12703_v17 = vld [vmem:[#allocation6_spill] sm:$0xff] }
 0x2be   :  { %v1853_v28 = vpop.permute.xlu0 %1852  ;;  %v5959_v5 = vpack.c.bf16 %v1795_v13, %v1735_v0  ;;  %v5975_v7 = vpack.c.bf16 %v1813_v52, %v1753_v39  ;;  %v1796_v6 = vsel %vm445_vm6, %v6946_v63, %v7002_v34  ;;  %v5977_v22 = vpack.c.bf16 %v1794_v30, %v1734_v32  ;;  %v12702_v52 = vld [vmem:[#allocation10_spill] sm:$0xff] }
 0x2bf   :  { %5974 = vmatpush1.bf16.msra.mxu1 %v5973_v60  ;;  %v5961_v35 = vpack.c.bf16 %v1796_v6, %v1736_v42  ;;  %v1873_v8 = vsel %vm506_vm7, %v1853_v28, %v12695_v50  ;;  %v1856_v63 = vsel %vm506_vm7, %v9804_v57, %v1849_v48  ;;  %v2626_v15 = vrot.slane %v5626_v45, %v12698_v58 }
 0x2c0   :  { %5958 = vmatpush1.bf16.msra.mxu0 %v5957_v25  ;;  %5976 = vmatprep.subr.bf16.mxu1 %v5975_v7  ;;  %v2630_v23 = vrot.slane %v5626_v45, %v12699_v33  ;;  %v2650_v46 = vrot.slane %v5626_v45, %v12700_v4  ;;  %v2642_v41 = vrot.slane %v5626_v45, %v12701_v54 }
 0x2c1   :  { %5960 = vmatprep.subr.bf16.mxu0 %v5959_v5  ;;  %v2654_v13 = vrot.slane %v5626_v45, %v12702_v52  ;;  %v2646_v39 = vrot.slane %v5626_v45, %v12703_v17 }
 0x2c2   :  { %v1851_v3 = vpop.permute.xlu0 %1850 }
 0x2c3   :  { %5978 = vmatpush1.bf16.msra.mxu1 %v5977_v22  ;;  %v1855_v14 = vsel %vm506_vm7, %v1849_v48, %v1851_v3  ;;  %v1854_v21 = vsel %vm506_vm7, %v1851_v3, %v1853_v28  ;;  %v10100_v48 = vld [vmem:[%s12435_s3 + $0x1c] sm:$0xff] }
 0x2c4   :  { %5962 = vmatpush1.bf16.msra.mxu0 %v5961_v35  ;;  %2541 = vmatprep.subr.mxu1 %v1873_v8  ;;  %v2666_v50 = vrot.slane %v10100_v48, %v12696_v18 }
 0x2c5   :  { %2470 = vmatprep.subr.mxu0 %v1855_v14 }
 0x2c7   :  { %2542 = vmatpush1.msra.mxu1 %v1854_v21  ;;  %v2670_v21 = vrot.slane %v10100_v48, %v12697_v56 }
 0x2c8   :  { %2471 = vmatpush1.msra.mxu0 %v1856_v63  ;;  %5625 = vmatmul.mubr.msk.f32.vlgmr.msra.gmra.mrb[18].mxu1 %vm534_vm8, %v7794_v29 }
 0x2c9   :  { %5624 = vmatmul.mubr.msk.f32.vlgmr.msra.gmra.mrb[18].mxu0 %vm534_vm8, %v7794_v29  ;;  %3377 = vmatprep.mubr.f32.mxu1 %v12648_v19 }
 0x2ca   :  { %3306 = vmatprep.mubr.f32.mxu0 %v12648_v19 }
 0x2cd   :  { %v10030_v27 = vpop.permute.xlu1 %1880 }
 0x308   :  { %v2023_v57 = vpop.f32.mrb[10].mxu1 }
 0x309   :  { %v2024_v55 = vadd.f32 %v2023_v57, %v10030_v27  ;;  %v2025_v16 = vpop.f32.mrb[11].mxu1  ;;  %v2658_v57 = vrot.slane %v10100_v48, %v12698_v58 }
 0x30a   :  { %v2026_v59 = vadd.f32 %v2025_v16, %v10030_v27 }
 0x30b   :  { %v2598_v37 = vmax.f32 %v2024_v55, 0.0 }
 0x30c   :  { %v2599_v12 = vmax.f32 %v2026_v59, 0.0 }
 0x30d   :  { %v10039_v2 = vmul.f32 %v2634_v53, %v2598_v37 }
 0x30e   :  { %v10041_v20 = vmul.f32 %v2638_v44, %v2599_v12 }
 0x310   :  { %v7009_v10 = vpack.i.bf16 %v10041_v20, %v10039_v2 }
 0x312   :  { %7010 = vrot.lane.b32.xlu1 %v7009_v10, %s7806_s12  ;;  %7005 = vrot.lane.b32.xlu0 %v7009_v10, %s7807_s22 }
 0x316   :  { %7020 = vrot.lane.b32.xlu1 %v7009_v10, %s7808_s30  ;;  %7015 = vrot.lane.b32.xlu0 %v7009_v10, %s7802_s29 }
 0x31a   :  { %v1952_v49 = vpop.f32.mrb[10].mxu0  ;;  %7030 = vrot.lane.b32.xlu1 %v7009_v10, %s7809_s5  ;;  %7025 = vrot.lane.b32.xlu0 %v7009_v10, %s7810_s6 }
 0x31b   :  { %v1953_v62 = vadd.f32 %v1952_v49, %v10030_v27  ;;  %v1954_v24 = vpop.f32.mrb[11].mxu0 }
 0x31c   :  { %v1955_v47 = vadd.f32 %v1954_v24, %v10030_v27 }
 0x31d   :  { %v2596_v43 = vmax.f32 %v1953_v62, 0.0 }
 0x31e   :  { %7040 = vrot.lane.b32.xlu1 %v7009_v10, %s7811_s7  ;;  %7035 = vrot.lane.b32.xlu0 %v7009_v10, %s7812_s8  ;;  %v2597_v34 = vmax.f32 %v1955_v47, 0.0 }
 0x31f   :  { %v10055_v9 = vmul.f32 %v2626_v15, %v2596_v43 }
 0x320   :  { %v10065_v60 = vmul.f32 %v2630_v23, %v2597_v34 }
 0x33e   :  { %v2165_v40 = vpop.f32.mrb[12].mxu1 }
 0x33f   :  { %v2166_v61 = vadd.f32 %v2165_v40, %v10030_v27  ;;  %v2094_v38 = vpop.f32.mrb[12].mxu0  ;;  %v2167_v31 = vpop.f32.mrb[13].mxu1 }
 0x340   :  { %v2095_v36 = vadd.f32 %v2094_v38, %v10030_v27  ;;  %v2096_v51 = vpop.f32.mrb[13].mxu0  ;;  %v2168_v11 = vadd.f32 %v2167_v31, %v10030_v27  ;;  %v2662_v38 = vrot.slane %v10100_v48, %v12699_v33 }
 0x341   :  { %v2602_v0 = vmax.f32 %v2166_v61, 0.0  ;;  %v2097_v1 = vadd.f32 %v2096_v51, %v10030_v27 }
 0x342   :  { %v2600_v32 = vmax.f32 %v2095_v36, 0.0  ;;  %v2603_v28 = vmax.f32 %v2168_v11, 0.0  ;;  %v2682_v36 = vrot.slane %v10100_v48, %v12700_v4 }
 0x343   :  { %v10069_v25 = vmul.f32 %v2650_v46, %v2602_v0  ;;  %v2601_v5 = vmax.f32 %v2097_v1, 0.0 }
 0x344   :  { %v10071_v7 = vmul.f32 %v2642_v41, %v2600_v32  ;;  %v10073_v42 = vmul.f32 %v2654_v13, %v2603_v28  ;;  %v2674_v13 = vrot.slane %v10100_v48, %v12701_v54 }
 0x345   :  { %v10075_v30 = vmul.f32 %v2646_v39, %v2601_v5  ;;  %v7049_v6 = vpack.i.bf16 %v10069_v25, %v10065_v60 }
 0x346   :  { %12704 = vst [vmem:[#allocation13_spill] sm:$0xff] %v10071_v7 }
 0x347   :  { %7050 = vrot.lane.b32.xlu1 %v7049_v6, %s7806_s12  ;;  %7045 = vrot.lane.b32.xlu0 %v7049_v6, %s7807_s22  ;;  %v7089_v22 = vpack.i.bf16 %v10075_v30, %v10073_v42 }
 0x34b   :  { %7060 = vrot.lane.b32.xlu1 %v7049_v6, %s7808_s30  ;;  %7055 = vrot.lane.b32.xlu0 %v7049_v6, %s7802_s29 }
 0x34f   :  { %7070 = vrot.lane.b32.xlu1 %v7049_v6, %s7809_s5  ;;  %7065 = vrot.lane.b32.xlu0 %v7049_v6, %s7810_s6 }
 0x353   :  { %7080 = vrot.lane.b32.xlu1 %v7049_v6, %s7811_s7  ;;  %7075 = vrot.lane.b32.xlu0 %v7049_v6, %s7812_s8 }
 0x357   :  { %7090 = vrot.lane.b32.xlu1 %v7089_v22, %s7806_s12  ;;  %7085 = vrot.lane.b32.xlu0 %v7089_v22, %s7807_s22 }
 0x35b   :  { %7100 = vrot.lane.b32.xlu1 %v7089_v22, %s7808_s30  ;;  %7095 = vrot.lane.b32.xlu0 %v7089_v22, %s7802_s29 }
 0x35f   :  { %7110 = vrot.lane.b32.xlu1 %v7089_v22, %s7809_s5  ;;  %7105 = vrot.lane.b32.xlu0 %v7089_v22, %s7810_s6 }
 0x363   :  { %7120 = vrot.lane.b32.xlu1 %v7089_v22, %s7811_s7  ;;  %7115 = vrot.lane.b32.xlu0 %v7089_v22, %s7812_s8 }
 0x366   :  { %v2307_v3 = vpop.f32.mrb[14].mxu1 }
 0x367   :  { %v2308_v35 = vadd.f32 %v2307_v3, %v10030_v27  ;;  %v2309_v8 = vpop.f32.mrb[15].mxu1 }
 0x368   :  { %v2310_v14 = vadd.f32 %v2309_v8, %v10030_v27 }
 0x369   :  { %v2606_v63 = vmax.f32 %v2308_v35, 0.0  ;;  %v2236_v29 = vpop.f32.mrb[14].mxu0  ;;  %v2686_v35 = vrot.slane %v10100_v48, %v12702_v52 }
 0x36a   :  { %v2237_v45 = vadd.f32 %v2236_v29, %v10030_v27  ;;  %v2607_v55 = vmax.f32 %v2310_v14, 0.0  ;;  %v2238_v16 = vpop.f32.mrb[15].mxu0 }
 0x36b   :  { %v10111_v53 = vmul.f32 %v2666_v50, %v2606_v63  ;;  %v2239_v10 = vadd.f32 %v2238_v16, %v10030_v27  ;;  %v2678_v50 = vrot.slane %v10100_v48, %v12703_v17 }
 0x36c   :  { %v2604_v59 = vmax.f32 %v2237_v45, 0.0  ;;  %v10113_v44 = vmul.f32 %v2670_v21, %v2607_v55 }
 0x36d   :  { %v2605_v46 = vmax.f32 %v2239_v10, 0.0 }
 0x36e   :  { %v10115_v37 = vmul.f32 %v2658_v57, %v2604_v59  ;;  %v7129_v12 = vpack.i.bf16 %v10113_v44, %v10111_v53  ;;  %v10194_v59 = vld [vmem:[%s12435_s3 + $0x24] sm:$0xf] }
 0x36f   :  { %v10158_v32 = vmul.f32 %v2662_v38, %v2605_v46  ;;  %v2698_v10 = vrot.slane %v10194_v59, %v12696_v18 }
 0x370   :  { %12705 = vst [vmem:[#allocation12_spill] sm:$0xff] %v10115_v37  ;;  %7130 = vrot.lane.b32.xlu1 %v7129_v12, %s7806_s12  ;;  %7125 = vrot.lane.b32.xlu0 %v7129_v12, %s7807_s22 }
 0x371   :  { %12706 = vst [vmem:[#allocation14_spill] sm:$0xff] %v10158_v32 }
 0x374   :  { %7140 = vrot.lane.b32.xlu1 %v7129_v12, %s7808_s30  ;;  %7135 = vrot.lane.b32.xlu0 %v7129_v12, %s7802_s29 }
 0x378   :  { %7150 = vrot.lane.b32.xlu1 %v7129_v12, %s7809_s5  ;;  %7145 = vrot.lane.b32.xlu0 %v7129_v12, %s7810_s6 }
 0x37c   :  { %7160 = vrot.lane.b32.xlu1 %v7129_v12, %s7811_s7  ;;  %7155 = vrot.lane.b32.xlu0 %v7129_v12, %s7812_s8 }
 0x384   :  { %v10128_v49 = vpop.permute.xlu1 %7010  ;;  %v10130_v62 = vpop.permute.xlu0 %7005 }
 0x385   :  { %v12495_v15 = vunpack.i.h.bf16 %v10128_v49  ;;  %v7012_v24 = vunpack.i.l.bf16 %v10128_v49  ;;  %v12493_v43 = vunpack.i.h.bf16 %v10130_v62  ;;  %v7007_v47 = vunpack.i.l.bf16 %v10130_v62 }
 0x387   :  { %v2800_v34 = vsel %vm2783_vm10, %v7007_v47, %v12493_v43  ;;  %v2861_v23 = vsel %vm2844_vm9, %v7012_v24, %v12495_v15 }
 0x388   :  { %v2449_v40 = vpop.f32.mrb[16].mxu1  ;;  %v5995_v61 = vpack.c.bf16 %v2861_v23, %v2800_v34  ;;  %v10200_v34 = vpop.permute.xlu1 %7020 }
 0x389   :  { %v2450_v31 = vadd.f32 %v2449_v40, %v10030_v27  ;;  %v2378_v41 = vpop.f32.mrb[16].mxu0  ;;  %v2451_v51 = vpop.f32.mrb[17].mxu1 }
 0x38a   :  { %v2379_v11 = vadd.f32 %v2378_v41, %v10030_v27  ;;  %v2380_v0 = vpop.f32.mrb[17].mxu0  ;;  %5996 = vmatprep.subr.bf16.mxu1 %v5995_v61  ;;  %v2452_v22 = vadd.f32 %v2451_v51, %v10030_v27  ;;  %v10202_v23 = vpop.permute.xlu0 %7015 }
 0x38b   :  { %v2610_v1 = vmax.f32 %v2450_v31, 0.0  ;;  %v2381_v3 = vadd.f32 %v2380_v0, %v10030_v27  ;;  %v12494_v0 = vunpack.i.h.bf16 %v10202_v23 }
 0x38c   :  { %v2608_v39 = vmax.f32 %v2379_v11, 0.0  ;;  %v2611_v8 = vmax.f32 %v2452_v22, 0.0  ;;  %v10210_v61 = vpop.permute.xlu1 %7030  ;;  %v12492_v11 = vunpack.i.h.bf16 %v10200_v34 }
 0x38d   :  { %v10160_v28 = vmul.f32 %v2682_v36, %v2610_v1  ;;  %v2609_v14 = vmax.f32 %v2381_v3, 0.0  ;;  %v7017_v1 = vunpack.i.l.bf16 %v10202_v23 }
 0x38e   :  { %v10162_v5 = vmul.f32 %v2674_v13, %v2608_v39  ;;  %v10178_v21 = vmul.f32 %v2686_v35, %v2611_v8  ;;  %v10212_v46 = vpop.permute.xlu0 %7025  ;;  %v7022_v13 = vunpack.i.l.bf16 %v10200_v34  ;;  %v2702_v39 = vrot.slane %v10194_v59, %v12697_v56 }
 0x38f   :  { %v7169_v6 = vpack.i.bf16 %v10160_v28, %v10158_v32  ;;  %v10180_v63 = vmul.f32 %v2678_v50, %v2609_v14  ;;  %v12497_v35 = vunpack.i.h.bf16 %v10210_v61  ;;  %v7032_v8 = vunpack.i.l.bf16 %v10210_v61 }
 0x390   :  { %12707 = vst [vmem:[#allocation15_spill] sm:$0xff] %v10162_v5  ;;  %v10220_v41 = vpop.permute.xlu1 %7040  ;;  %v2982_v50 = vsel %vm2965_vm11, %v7022_v13, %v12492_v11  ;;  %v12496_v14 = vunpack.i.h.bf16 %v10212_v46 }
 0x391   :  { %7170 = vrot.lane.b32.xlu1 %v7169_v6, %s7806_s12  ;;  %7165 = vrot.lane.b32.xlu0 %v7169_v6, %s7807_s22  ;;  %12708 = vst [vmem:[#allocation16_spill] sm:$0xff] %v10180_v63  ;;  %v7209_v48 = vpack.i.bf16 %v10180_v63, %v10178_v21 }
 0x392   :  { %v10222_v51 = vpop.permute.xlu0 %7035 }
 0x393   :  { %v12500_v43 = vunpack.i.h.bf16 %v10222_v51 }
 0x395   :  { %7180 = vrot.lane.b32.xlu1 %v7169_v6, %s7808_s30  ;;  %7175 = vrot.lane.b32.xlu0 %v7169_v6, %s7802_s29 }
 0x399   :  { %7190 = vrot.lane.b32.xlu1 %v7169_v6, %s7809_s5  ;;  %7185 = vrot.lane.b32.xlu0 %v7169_v6, %s7810_s6 }
 0x39b   :  { %v2591_v29 = vpop.f32.mrb[18].mxu1 }
 0x39c   :  { %v10182_v45 = vpop.f32.mrb[18].mxu0  ;;  %v2593_v57 = vpop.f32.mrb[19].mxu1  ;;  %v2592_v16 = vadd.f32 %v2591_v29, %v10030_v27  ;;  %v7027_v29 = vunpack.i.l.bf16 %v10212_v46 }
 0x39d   :  { %v2522_v55 = vpop.f32.mrb[19].mxu0  ;;  %7200 = vrot.lane.b32.xlu1 %v7169_v6, %s7811_s7  ;;  %7195 = vrot.lane.b32.xlu0 %v7169_v6, %s7812_s8  ;;  %v2594_v31 = vadd.f32 %v2593_v57, %v10030_v27  ;;  %v2694_v6 = vrot.slane %v10194_v59, %v12699_v33 }
 0x39e   :  { %v2614_v12 = vmax.f32 %v2592_v16, 0.0  ;;  %v2523_v36 = vadd.f32 %v2522_v55, %v10030_v27 }
 0x39f   :  { %v2615_v22 = vmax.f32 %v2594_v31, 0.0 }
 0x3a0   :  { %v10206_v40 = vmul.f32 %v2698_v10, %v2614_v12  ;;  %v2613_v3 = vmax.f32 %v2523_v36, 0.0  ;;  %v7042_v12 = vunpack.i.l.bf16 %v10220_v41 }
 0x3a1   :  { %7210 = vrot.lane.b32.xlu1 %v7209_v48, %s7806_s12  ;;  %7205 = vrot.lane.b32.xlu0 %v7209_v48, %s7807_s22  ;;  %v10259_v36 = vmul.f32 %v2702_v39, %v2615_v22 }
 0x3a2   :  { %v7249_v38 = vpack.i.bf16 %v10206_v40, %v10055_v9  ;;  %v10261_v11 = vmul.f32 %v2694_v6, %v2613_v3  ;;  %v7037_v6 = vunpack.i.l.bf16 %v10222_v51 }
 0x3a4   :  { %12709 = vst [vmem:[#allocation17_spill] sm:$0xff] %v10261_v11 }
 0x3a5   :  { %7220 = vrot.lane.b32.xlu1 %v7209_v48, %s7808_s30  ;;  %7215 = vrot.lane.b32.xlu0 %v7209_v48, %s7802_s29 }
 0x3a9   :  { %7230 = vrot.lane.b32.xlu1 %v7209_v48, %s7809_s5  ;;  %7225 = vrot.lane.b32.xlu0 %v7209_v48, %s7810_s6 }
 0x3ad   :  { %7240 = vrot.lane.b32.xlu1 %v7209_v48, %s7811_s7  ;;  %7235 = vrot.lane.b32.xlu0 %v7209_v48, %s7812_s8  ;;  %v2921_v48 = vsel %vm384_vm5, %v7017_v1, %v12494_v0 }
 0x3ae   :  { %v5999_v39 = vpack.c.bf16 %v2982_v50, %v2921_v48 }
 0x3b1   :  { %7250 = vrot.lane.b32.xlu1 %v7249_v38, %s7806_s12  ;;  %7245 = vrot.lane.b32.xlu0 %v7249_v38, %s7807_s22 }
 0x3b5   :  { %7260 = vrot.lane.b32.xlu1 %v7249_v38, %s7808_s30  ;;  %7255 = vrot.lane.b32.xlu0 %v7249_v38, %s7802_s29 }
 0x3b9   :  { %7270 = vrot.lane.b32.xlu1 %v7249_v38, %s7809_s5  ;;  %7265 = vrot.lane.b32.xlu0 %v7249_v38, %s7810_s6  ;;  %v10247_v57 = vpop.permute.xlu1 %7050  ;;  %v10249_v55 = vpop.permute.xlu0 %7045 }
 0x3ba   :  { %v12498_v10 = vunpack.i.l.bf16 %v10247_v57  ;;  %v12510_v31 = vunpack.i.l.bf16 %v10249_v55 }
 0x3bc   :  { %v2862_v0 = vsel %vm2844_vm9, %v12498_v10, %v7012_v24  ;;  %v2801_v15 = vsel %vm2783_vm10, %v12510_v31, %v7007_v47  ;;  %v3043_v24 = vsel %vm3026_vm13, %v7027_v29, %v12496_v14  ;;  %v3104_v47 = vsel %vm3087_vm12, %v7032_v8, %v12497_v35 }
 0x3bd   :  { %7280 = vrot.lane.b32.xlu1 %v7249_v38, %s7811_s7  ;;  %7275 = vrot.lane.b32.xlu0 %v7249_v38, %s7812_s8  ;;  %v10279_v22 = vpop.permute.xlu1 %7060  ;;  %v10281_v3 = vpop.permute.xlu0 %7055  ;;  %v5997_v16 = vpack.c.bf16 %v2862_v0, %v2801_v15  ;;  %v7289_v15 = vpack.i.bf16 %v10261_v11, %v10259_v36  ;;  %v6003_v14 = vpack.c.bf16 %v3104_v47, %v3043_v24 }
 0x3be   :  { %v12499_v50 = vunpack.i.l.bf16 %v10279_v22  ;;  %v12501_v48 = vunpack.i.l.bf16 %v10281_v3  ;;  %v7329_v31 = vpack.i.bf16 %v10115_v37, %v10071_v7 }
 0x3bf   :  { %5998 = vmatpush1.bf16.msra.mxu1 %v5997_v16 }
 0x3c0   :  { %v2983_v38 = vsel %vm2965_vm11, %v12499_v50, %v7022_v13  ;;  %v2922_v0 = vsel %vm384_vm5, %v12501_v48, %v7017_v1  ;;  %6000 = vmatprep.subr.bf16.mxu1 %v5999_v39  ;;  %v3165_v13 = vsel %vm3148_vm15, %v7037_v6, %v12500_v43  ;;  %v12710_v50 = vunpack.i.h.bf16 %v10220_v41 }
 0x3c1   :  { %7290 = vrot.lane.b32.xlu1 %v7289_v15, %s7806_s12  ;;  %7285 = vrot.lane.b32.xlu0 %v7289_v15, %s7807_s22  ;;  %v10307_v16 = vpop.permute.xlu1 %7070  ;;  %v10309_v35 = vpop.permute.xlu0 %7065  ;;  %v6001_v10 = vpack.c.bf16 %v2983_v38, %v2922_v0 }
 0x3c2   :  { %v3226_v1 = vsel %vm3209_vm14, %v7042_v12, %v12710_v50  ;;  %v12504_v39 = vunpack.i.l.bf16 %v10307_v16  ;;  %v12507_v24 = vunpack.i.l.bf16 %v10309_v35  ;;  %v7073_v4 = vunpack.i.h.bf16 %v10307_v16 }
 0x3c3   :  { %6002 = vmatpush1.bf16.msra.mxu1 %v6001_v10  ;;  %v6007_v0 = vpack.c.bf16 %v3226_v1, %v3165_v13  ;;  %v7053_v13 = vunpack.i.h.bf16 %v10247_v57  ;;  %v7048_v1 = vunpack.i.h.bf16 %v10249_v55 }
 0x3c4   :  { %v3105_v47 = vsel %vm3087_vm12, %v12504_v39, %v7032_v8  ;;  %v3044_v38 = vsel %vm3026_vm13, %v12507_v24, %v7027_v29  ;;  %6004 = vmatprep.subr.bf16.mxu1 %v6003_v14 }
 0x3c5   :  { %7300 = vrot.lane.b32.xlu1 %v7289_v15, %s7808_s30  ;;  %7295 = vrot.lane.b32.xlu0 %v7289_v15, %s7802_s29  ;;  %v10331_v50 = vpop.permute.xlu1 %7080  ;;  %v10333_v43 = vpop.permute.xlu0 %7075  ;;  %v6005_v10 = vpack.c.bf16 %v3105_v47, %v3044_v38 }
 0x3c6   :  { %v12502_v48 = vunpack.i.l.bf16 %v10331_v50  ;;  %v12503_v8 = vunpack.i.l.bf16 %v10333_v43  ;;  %v7083_v56 = vunpack.i.h.bf16 %v10331_v50 }
 0x3c7   :  { %6006 = vmatpush1.bf16.msra.mxu1 %v6005_v10 }
 0x3c8   :  { %v3227_v14 = vsel %vm3209_vm14, %v12502_v48, %v7042_v12  ;;  %v3166_v29 = vsel %vm3148_vm15, %v12503_v8, %v7037_v6  ;;  %6008 = vmatprep.subr.bf16.mxu1 %v6007_v0 }
 0x3c9   :  { %7310 = vrot.lane.b32.xlu1 %v7289_v15, %s7809_s5  ;;  %7305 = vrot.lane.b32.xlu0 %v7289_v15, %s7810_s6  ;;  %v10349_v47 = vpop.permute.xlu1 %7090  ;;  %v10351_v38 = vpop.permute.xlu0 %7085  ;;  %v6009_v10 = vpack.c.bf16 %v3227_v14, %v3166_v29  ;;  %v7058_v29 = vunpack.i.h.bf16 %v10281_v3 }
 0x3ca   :  { %v12508_v12 = vunpack.i.h.bf16 %v10349_v47  ;;  %v12506_v48 = vunpack.i.l.bf16 %v10349_v47  ;;  %v12509_v6 = vunpack.i.h.bf16 %v10351_v38  ;;  %v12505_v0 = vunpack.i.l.bf16 %v10351_v38 }
 0x3cb   :  { %6010 = vmatpush1.bf16.msra.mxu1 %v6009_v10 }
 0x3cc   :  { %3329 = vmatprep.subr.mxu1 %v10041_v20  ;;  %v2796_v8 = vsel %vm2783_vm10, %v7048_v1, %v12505_v0  ;;  %v2857_v14 = vsel %vm2844_vm9, %v7053_v13, %v12506_v48  ;;  %v2858_v39 = vsel %vm2844_vm9, %v12508_v12, %v7053_v13  ;;  %v2797_v20 = vsel %vm2783_vm10, %v12509_v6, %v7048_v1  ;;  %v10384_v48 = vld [vmem:[%s12433_s1 + $0x10] sm:$0xff] }
 0x3cd   :  { %7320 = vrot.lane.b32.xlu1 %v7289_v15, %s7811_s7  ;;  %7315 = vrot.lane.b32.xlu0 %v7289_v15, %s7812_s8  ;;  %v10377_v10 = vpop.permute.xlu1 %7100  ;;  %v10379_v0 = vpop.permute.xlu0 %7095  ;;  %v6027_v24 = vpack.c.bf16 %v2857_v14, %v2796_v8  ;;  %v7063_v15 = vunpack.i.h.bf16 %v10279_v22  ;;  %v6029_v8 = vpack.c.bf16 %v2858_v39, %v2797_v20  ;;  %v7068_v12 = vunpack.i.h.bf16 %v10309_v35 }
 0x3ce   :  { %v12514_v13 = vunpack.i.h.bf16 %v10377_v10  ;;  %v12517_v1 = vunpack.i.h.bf16 %v10379_v0  ;;  %v12513_v6 = vunpack.i.l.bf16 %v10379_v0  ;;  %v12711_v20 = vunpack.i.l.bf16 %v10377_v10 }
 0x3cf   :  { %3330 = vmatpush1.msra.mxu1 %v10039_v2 }
 0x3d0   :  { %5632 = vmatmul.mubr.msk.f32.vlgmr.msra.gmra.mrb[20].mxu1 %vm534_vm8, %v10384_v48  ;;  %6028 = vmatprep.subr.bf16.mxu1 %v6027_v24  ;;  %v2917_v14 = vsel %vm384_vm5, %v7058_v29, %v12513_v6  ;;  %v2979_v2 = vsel %vm2965_vm11, %v12514_v13, %v7063_v15  ;;  %v2918_v17 = vsel %vm384_vm5, %v12517_v1, %v7058_v29 }
 0x3d1   :  { %7330 = vrot.lane.b32.xlu1 %v7329_v31, %s7806_s12  ;;  %7325 = vrot.lane.b32.xlu0 %v7329_v31, %s7807_s22  ;;  %v10412_v39 = vpop.permute.xlu1 %7110  ;;  %v10414_v24 = vpop.permute.xlu0 %7105  ;;  %v2978_v6 = vsel %vm2965_vm11, %v7063_v15, %v12711_v20  ;;  %v2521_v1 = vadd.f32 %v10182_v45, %v10030_v27  ;;  %v6033_v18 = vpack.c.bf16 %v2979_v2, %v2918_v17 }
 0x3d2   :  { %v12530_v13 = vunpack.i.h.bf16 %v10412_v39  ;;  %v12522_v54 = vunpack.i.l.bf16 %v10412_v39  ;;  %v12523_v33 = vunpack.i.h.bf16 %v10414_v24  ;;  %v12521_v29 = vunpack.i.l.bf16 %v10414_v24  ;;  %6030 = vmatpush1.bf16.msra.mxu1 %v6029_v8  ;;  %3519 = vmatprep.mubr.f32.mxu1 %v12648_v19 }
 0x3d3   :  { %v6031_v52 = vpack.c.bf16 %v2978_v6, %v2917_v14  ;;  %v7078_v8 = vunpack.i.h.bf16 %v10333_v43 }
 0x3d4   :  { %v3039_v15 = vsel %vm3026_vm13, %v7068_v12, %v12521_v29  ;;  %v3100_v20 = vsel %vm3087_vm12, %v7073_v4, %v12522_v54  ;;  %v3101_v27 = vsel %vm3087_vm12, %v12530_v13, %v7073_v4  ;;  %v3040_v17 = vsel %vm3026_vm13, %v12523_v33, %v7068_v12 }
 0x3d5   :  { %6032 = vmatprep.subr.bf16.mxu1 %v6031_v52  ;;  %7340 = vrot.lane.b32.xlu1 %v7329_v31, %s7808_s30  ;;  %v10446_v45 = vpop.permute.xlu1 %7120  ;;  %v10448_v6 = vpop.permute.xlu0 %7115  ;;  %v6035_v14 = vpack.c.bf16 %v3100_v20, %v3039_v15  ;;  %v2612_v12 = vmax.f32 %v2521_v1, 0.0  ;;  %v2690_v52 = vrot.slane %v10194_v59, %v12698_v58  ;;  %v6037_v33 = vpack.c.bf16 %v3101_v27, %v3040_v17 }
 0x3d6   :  { %7335 = vrot.lane.b32.xlu0 %v7329_v31, %s7802_s29  ;;  %v12529_v2 = vunpack.i.h.bf16 %v10446_v45  ;;  %v12527_v29 = vunpack.i.l.bf16 %v10446_v45  ;;  %v12528_v4 = vunpack.i.h.bf16 %v10448_v6  ;;  %v12526_v54 = vunpack.i.l.bf16 %v10448_v6  ;;  %6034 = vmatpush1.bf16.msra.mxu1 %v6033_v18 }
 0x3d7   :  { %6036 = vmatprep.subr.bf16.mxu1 %v6035_v14  ;;  %v10475_v27 = vmul.f32 %v2690_v52, %v2612_v12 }
 0x3d8   :  { %v3161_v15 = vsel %vm3148_vm15, %v7078_v8, %v12526_v54  ;;  %v3222_v20 = vsel %vm3209_vm14, %v7083_v56, %v12527_v29  ;;  %v3223_v18 = vsel %vm3209_vm14, %v12529_v2, %v7083_v56  ;;  %v3162_v59 = vsel %vm3148_vm15, %v12528_v4, %v7078_v8 }
 0x3d9   :  { %7350 = vrot.lane.b32.xlu1 %v7329_v31, %s7809_s5  ;;  %v6039_v1 = vpack.c.bf16 %v3222_v20, %v3161_v15  ;;  %12712 = vst [vmem:[#allocation11_spill] sm:$0xff] %v10475_v27  ;;  %v6041_v17 = vpack.c.bf16 %v3223_v18, %v3162_v59  ;;  %v7369_v56 = vpack.i.bf16 %v10475_v27, %v10162_v5  ;;  %v5630_v20 = vld [vmem:[%s12434_s2 + $0x10] sm:$0xff] }
 0x3da   :  { %7345 = vrot.lane.b32.xlu0 %v7329_v31, %s7810_s6  ;;  %6038 = vmatpush1.bf16.msra.mxu1 %v6037_v33 }
 0x3db   :  { %6040 = vmatprep.subr.bf16.mxu1 %v6039_v1 }
 0x3dd   :  { %7360 = vrot.lane.b32.xlu1 %v7329_v31, %s7811_s7 }
 0x3de   :  { %7355 = vrot.lane.b32.xlu0 %v7329_v31, %s7812_s8  ;;  %6042 = vmatpush1.bf16.msra.mxu1 %v6041_v17 }
 0x3df   :  { %3471 = vmatprep.subr.mxu1 %v10073_v42 }
 0x3e1   :  { %7370 = vrot.lane.b32.xlu1 %v7369_v56, %s7806_s12 }
 0x3e2   :  { %7365 = vrot.lane.b32.xlu0 %v7369_v56, %s7807_s22  ;;  %3472 = vmatpush1.msra.mxu1 %v10069_v25  ;;  %v10485_v33 = vpop.permute.xlu1 %7130  ;;  %v10487_v8 = vpop.permute.xlu0 %7125 }
 0x3e3   :  { %12713 = vst [vmem:[#allocation18_spill] sm:$0xff] %v10485_v33  ;;  %12714 = vst [vmem:[#allocation19_spill] sm:$0xff] %v10487_v8  ;;  %v12525_v14 = vunpack.i.h.bf16 %v10485_v33  ;;  %v7132_v31 = vunpack.i.l.bf16 %v10485_v33  ;;  %v12524_v12 = vunpack.i.h.bf16 %v10487_v8  ;;  %v7127_v42 = vunpack.i.l.bf16 %v10487_v8  ;;  %5634 = vmatmul.mubr.msk.f32.vlgmr.msra.gmra.mrb[22].mxu1 %vm534_vm8, %v10384_v48 }
 0x3e4   :  { %3661 = vmatprep.mubr.f32.mxu1 %v12648_v19 }
 0x3e5   :  { %7380 = vrot.lane.b32.xlu1 %v7369_v56, %s7808_s30  ;;  %v2792_v25 = vsel %vm2783_vm10, %v7127_v42, %v12524_v12  ;;  %v2853_v52 = vsel %vm2844_vm9, %v7132_v31, %v12525_v14 }
 0x3e6   :  { %7375 = vrot.lane.b32.xlu0 %v7369_v56, %s7802_s29  ;;  %v6059_v15 = vpack.c.bf16 %v2853_v52, %v2792_v25  ;;  %v10513_v18 = vpop.permute.xlu1 %7140  ;;  %v10515_v59 = vpop.permute.xlu0 %7135 }
 0x3e7   :  { %12715 = vst [vmem:[#allocation20_spill] sm:$0xff] %v10513_v18  ;;  %12716 = vst [vmem:[#allocation21_spill] sm:$0xff] %v10515_v59  ;;  %v12537_v25 = vunpack.i.h.bf16 %v10513_v18  ;;  %v7142_v52 = vunpack.i.l.bf16 %v10513_v18 }
 0x3e8   :  { %6060 = vmatprep.subr.bf16.mxu1 %v6059_v15  ;;  %v12535_v15 = vunpack.i.h.bf16 %v10515_v59 }
 0x3e9   :  { %7390 = vrot.lane.b32.xlu1 %v7369_v56, %s7809_s5  ;;  %v2974_v13 = vsel %vm2965_vm11, %v7142_v52, %v12537_v25 }
 0x3ea   :  { %7385 = vrot.lane.b32.xlu0 %v7369_v56, %s7810_s6  ;;  %v10517_v1 = vpop.permute.xlu1 %7150  ;;  %v10519_v17 = vpop.permute.xlu0 %7145 }
 0x3eb   :  { %12717 = vst [vmem:[#allocation22_spill] sm:$0xff] %v10517_v1  ;;  %12718 = vst [vmem:[#allocation23_spill] sm:$0xff] %v10519_v17  ;;  %v7152_v54 = vunpack.i.l.bf16 %v10517_v1  ;;  %v12721_v32 = vunpack.i.h.bf16 %v10519_v17 }
 0x3ed   :  { %7400 = vrot.lane.b32.xlu1 %v7369_v56, %s7811_s7 }
 0x3ee   :  { %7395 = vrot.lane.b32.xlu0 %v7369_v56, %s7812_s8  ;;  %v7137_v56 = vunpack.i.l.bf16 %v10515_v59  ;;  %v10525_v12 = vpop.permute.xlu1 %7160  ;;  %v10527_v14 = vpop.permute.xlu0 %7155 }
 0x3ef   :  { %12719 = vst [vmem:[#allocation24_spill] sm:$0xff] %v10525_v12  ;;  %12720 = vst [vmem:[#allocation25_spill] sm:$0xff] %v10527_v14  ;;  %v7162_v8 = vunpack.i.l.bf16 %v10525_v12 }
 0x3f0   :  { %v2913_v2 = vsel %vm384_vm5, %v7137_v56, %v12535_v15 }
 0x3f1   :  { %v6063_v59 = vpack.c.bf16 %v2974_v13, %v2913_v2  ;;  %v7157_v13 = vunpack.i.l.bf16 %v10527_v14 }
 0x3f2   :  { %3236 = vperm.xlu0 %6667, %v5630_v20   ;;  %v7147_v20 = vunpack.i.l.bf16 %v10519_v17 }
 0x403   :  { %v10531_v29 = vpop.permute.xlu1 %7170  ;;  %v10533_v4 = vpop.permute.xlu0 %7165 }
 0x404   :  { %v12542_v27 = vunpack.i.l.bf16 %v10531_v29  ;;  %v12543_v11 = vunpack.i.l.bf16 %v10533_v4 }
 0x406   :  { %v2854_v5 = vsel %vm2844_vm9, %v12542_v27, %v7132_v31  ;;  %v2793_v15 = vsel %vm2783_vm10, %v12543_v11, %v7127_v42  ;;  %v3035_v31 = vsel %vm3026_vm13, %v7147_v20, %v12721_v32  ;;  %v12722_v27 = vunpack.i.h.bf16 %v10517_v1 }
 0x407   :  { %v10555_v63 = vpop.permute.xlu1 %7180  ;;  %v10557_v25 = vpop.permute.xlu0 %7175  ;;  %v6061_v58 = vpack.c.bf16 %v2854_v5, %v2793_v15  ;;  %v12725_v1 = vunpack.i.h.bf16 %v10527_v14 }
 0x408   :  { %v12547_v18 = vunpack.i.l.bf16 %v10555_v63  ;;  %v12554_v37 = vunpack.i.l.bf16 %v10557_v25  ;;  %v3096_v42 = vsel %vm3087_vm12, %v7152_v54, %v12722_v27 }
 0x409   :  { %6062 = vmatpush1.bf16.msra.mxu1 %v6061_v58  ;;  %v6067_v17 = vpack.c.bf16 %v3096_v42, %v3035_v31 }
 0x40a   :  { %v2975_v2 = vsel %vm2965_vm11, %v12547_v18, %v7142_v52  ;;  %v2914_v32 = vsel %vm384_vm5, %v12554_v37, %v7137_v56  ;;  %6064 = vmatprep.subr.bf16.mxu1 %v6063_v59  ;;  %v3157_v52 = vsel %vm3148_vm15, %v7157_v13, %v12725_v1  ;;  %v12726_v18 = vunpack.i.h.bf16 %v10525_v12 }
 0x40b   :  { %v10581_v27 = vpop.permute.xlu1 %7190  ;;  %v10583_v15 = vpop.permute.xlu0 %7185  ;;  %v6065_v11 = vpack.c.bf16 %v2975_v2, %v2914_v32 }
 0x40c   :  { %12723 = vst [vmem:[#allocation26_spill] sm:$0xff] %v10581_v27  ;;  %12724 = vst [vmem:[#allocation27_spill] sm:$0xff] %v10583_v15  ;;  %v12548_v5 = vunpack.i.l.bf16 %v10581_v27  ;;  %v12552_v58 = vunpack.i.l.bf16 %v10583_v15  ;;  %v3218_v59 = vsel %vm3209_vm14, %v7162_v8, %v12726_v18 }
 0x40d   :  { %6066 = vmatpush1.bf16.msra.mxu1 %v6065_v11  ;;  %v6071_v32 = vpack.c.bf16 %v3218_v59, %v3157_v52 }
 0x40e   :  { %v3097_v56 = vsel %vm3087_vm12, %v12548_v5, %v7152_v54  ;;  %v3036_v11 = vsel %vm3026_vm13, %v12552_v58, %v7147_v20  ;;  %6068 = vmatprep.subr.bf16.mxu1 %v6067_v17  ;;  %v7173_v20 = vunpack.i.h.bf16 %v10531_v29 }
 0x40f   :  { %v10603_v31 = vpop.permute.xlu1 %7200  ;;  %v10605_v42 = vpop.permute.xlu0 %7195  ;;  %v6069_v1 = vpack.c.bf16 %v3097_v56, %v3036_v11  ;;  %v7168_v56 = vunpack.i.h.bf16 %v10533_v4 }
 0x410   :  { %12727 = vst [vmem:[#allocation28_spill] sm:$0xff] %v10603_v31  ;;  %12728 = vst [vmem:[#allocation29_spill] sm:$0xff] %v10605_v42  ;;  %v12549_v2 = vunpack.i.l.bf16 %v10603_v31  ;;  %v12551_v18 = vunpack.i.l.bf16 %v10605_v42 }
 0x411   :  { %6070 = vmatpush1.bf16.msra.mxu1 %v6069_v1 }
 0x412   :  { %v3219_v54 = vsel %vm3209_vm14, %v12549_v2, %v7162_v8  ;;  %v3158_v17 = vsel %vm3148_vm15, %v12551_v18, %v7157_v13  ;;  %6072 = vmatprep.subr.bf16.mxu1 %v6071_v32 }
 0x413   :  { %v10619_v11 = vpop.permute.xlu1 %7210  ;;  %v10621_v5 = vpop.permute.xlu0 %7205  ;;  %v6073_v52 = vpack.c.bf16 %v3219_v54, %v3158_v17 }
 0x414   :  { %12729 = vst [vmem:[#allocation30_spill] sm:$0xff] %v10619_v11  ;;  %12730 = vst [vmem:[#allocation31_spill] sm:$0xff] %v10621_v5  ;;  %v12550_v59 = vunpack.i.h.bf16 %v10619_v11  ;;  %v12556_v1 = vunpack.i.l.bf16 %v10619_v11  ;;  %v12553_v8 = vunpack.i.h.bf16 %v10621_v5  ;;  %v12555_v2 = vunpack.i.l.bf16 %v10621_v5 }
 0x415   :  { %6074 = vmatpush1.bf16.msra.mxu1 %v6073_v52  ;;  %v7178_v52 = vunpack.i.h.bf16 %v10557_v25 }
 0x416   :  { %v2850_v13 = vsel %vm2844_vm9, %v12550_v59, %v7173_v20  ;;  %v2789_v32 = vsel %vm2783_vm10, %v12553_v8, %v7168_v56  ;;  %3613 = vmatprep.subr.mxu1 %v10113_v44  ;;  %v2788_v54 = vsel %vm2783_vm10, %v7168_v56, %v12555_v2  ;;  %v2849_v17 = vsel %vm2844_vm9, %v7173_v20, %v12556_v1 }
 0x417   :  { %v10645_v59 = vpop.permute.xlu1 %7220  ;;  %v10647_v18 = vpop.permute.xlu0 %7215  ;;  %v6091_v58 = vpack.c.bf16 %v2849_v17, %v2788_v54  ;;  %v7183_v2 = vunpack.i.h.bf16 %v10555_v63  ;;  %v6093_v20 = vpack.c.bf16 %v2850_v13, %v2789_v32  ;;  %v7193_v1 = vunpack.i.h.bf16 %v10581_v27 }
 0x418   :  { %12731 = vst [vmem:[#allocation32_spill] sm:$0xff] %v10645_v59  ;;  %12732 = vst [vmem:[#allocation33_spill] sm:$0xff] %v10647_v18  ;;  %v12559_v8 = vunpack.i.h.bf16 %v10645_v59  ;;  %v12561_v37 = vunpack.i.h.bf16 %v10647_v18  ;;  %v12557_v56 = vunpack.i.l.bf16 %v10647_v18  ;;  %v7188_v17 = vunpack.i.h.bf16 %v10583_v15 }
 0x419   :  { %3614 = vmatpush1.msra.mxu1 %v10111_v53  ;;  %v12735_v32 = vunpack.i.l.bf16 %v10645_v59  ;;  %v7203_v18 = vunpack.i.h.bf16 %v10603_v31 }
 0x41a   :  { %5636 = vmatmul.mubr.msk.f32.vlgmr.msra.gmra.mrb[24].mxu1 %vm534_vm8, %v10384_v48  ;;  %6092 = vmatprep.subr.bf16.mxu1 %v6091_v58  ;;  %v2909_v54 = vsel %vm384_vm5, %v7178_v52, %v12557_v56  ;;  %v2971_v44 = vsel %vm2965_vm11, %v12559_v8, %v7183_v2  ;;  %v2910_v53 = vsel %vm384_vm5, %v12561_v37, %v7178_v52 }
 0x41b   :  { %v10671_v13 = vpop.permute.xlu1 %7230  ;;  %v10673_v58 = vpop.permute.xlu0 %7225  ;;  %6094 = vmatpush1.bf16.msra.mxu1 %v6093_v20  ;;  %v2970_v56 = vsel %vm2965_vm11, %v7183_v2, %v12735_v32  ;;  %3803 = vmatprep.mubr.f32.mxu1 %v12648_v19  ;;  %v6097_v33 = vpack.c.bf16 %v2971_v44, %v2910_v53  ;;  %v7198_v32 = vunpack.i.h.bf16 %v10605_v42 }
 0x41c   :  { %12733 = vst [vmem:[#allocation34_spill] sm:$0xff] %v10671_v13  ;;  %12734 = vst [vmem:[#allocation35_spill] sm:$0xff] %v10673_v58  ;;  %v12574_v14 = vunpack.i.h.bf16 %v10671_v13  ;;  %v12566_v8 = vunpack.i.l.bf16 %v10671_v13  ;;  %v12576_v12 = vunpack.i.h.bf16 %v10673_v58  ;;  %v12565_v52 = vunpack.i.l.bf16 %v10673_v58 }
 0x41d   :  { %v6095_v37 = vpack.c.bf16 %v2970_v56, %v2909_v54 }
 0x41e   :  { %v3031_v20 = vsel %vm3026_vm13, %v7188_v17, %v12565_v52  ;;  %v3092_v2 = vsel %vm3087_vm12, %v7193_v1, %v12566_v8  ;;  %v3093_v56 = vsel %vm3087_vm12, %v12574_v14, %v7193_v1  ;;  %v3032_v44 = vsel %vm3026_vm13, %v12576_v12, %v7188_v17 }
 0x41f   :  { %6096 = vmatprep.subr.bf16.mxu1 %v6095_v37  ;;  %v10702_v54 = vpop.permute.xlu1 %7240  ;;  %v10704_v53 = vpop.permute.xlu0 %7235  ;;  %v6099_v52 = vpack.c.bf16 %v3092_v2, %v3031_v20  ;;  %v6101_v1 = vpack.c.bf16 %v3093_v56, %v3032_v44 }
 0x420   :  { %12736 = vst [vmem:[#allocation36_spill] sm:$0xff] %v10702_v54  ;;  %12737 = vst [vmem:[#allocation37_spill] sm:$0xff] %v10704_v53  ;;  %v12577_v8 = vunpack.i.h.bf16 %v10702_v54  ;;  %v12575_v59 = vunpack.i.l.bf16 %v10702_v54  ;;  %v12580_v13 = vunpack.i.h.bf16 %v10704_v53  ;;  %v12573_v11 = vunpack.i.l.bf16 %v10704_v53  ;;  %6098 = vmatpush1.bf16.msra.mxu1 %v6097_v33 }
 0x421   :  { %6100 = vmatprep.subr.bf16.mxu1 %v6099_v52 }
 0x422   :  { %v3153_v37 = vsel %vm3148_vm15, %v7198_v32, %v12573_v11  ;;  %v3214_v17 = vsel %vm3209_vm14, %v7203_v18, %v12575_v59  ;;  %v3215_v20 = vsel %vm3209_vm14, %v12577_v8, %v7203_v18  ;;  %v3154_v33 = vsel %vm3148_vm15, %v12580_v13, %v7198_v32 }
 0x423   :  { %v7251_v52 = vpop.permute.xlu1 %7250  ;;  %v7246_v2 = vpop.permute.xlu0 %7245  ;;  %v6103_v56 = vpack.c.bf16 %v3214_v17, %v3153_v37  ;;  %v6105_v14 = vpack.c.bf16 %v3215_v20, %v3154_v33  ;;  %v12738_v59 = vunpack.i.l.bf16 %v10249_v55  ;;  %v12739_v18 = vunpack.i.l.bf16 %v10247_v57 }
 0x424   :  { %6102 = vmatpush1.bf16.msra.mxu1 %v6101_v1  ;;  %v7252_v44 = vunpack.i.l.bf16 %v7251_v52  ;;  %v7247_v11 = vunpack.i.l.bf16 %v7246_v2  ;;  %v12741_v17 = vunpack.i.l.bf16 %v10279_v22 }
 0x425   :  { %6104 = vmatprep.subr.bf16.mxu1 %v6103_v56  ;;  %v7253_v56 = vunpack.i.h.bf16 %v7251_v52 }
 0x426   :  { %v2802_v12 = vsel %vm2783_vm10, %v7247_v11, %v12738_v59  ;;  %v2863_v8 = vsel %vm2844_vm9, %v7252_v44, %v12739_v18  ;;  %v7248_v18 = vunpack.i.h.bf16 %v7246_v2 }
 0x427   :  { %v10734_v54 = vpop.permute.xlu1 %7260  ;;  %v10736_v32 = vpop.permute.xlu0 %7255  ;;  %v5979_v37 = vpack.c.bf16 %v2863_v8, %v2802_v12 }
 0x428   :  { %6106 = vmatpush1.bf16.msra.mxu1 %v6105_v14  ;;  %v7262_v59 = vunpack.i.l.bf16 %v10734_v54  ;;  %v7257_v57 = vunpack.i.l.bf16 %v10736_v32  ;;  %v7258_v13 = vunpack.i.h.bf16 %v10736_v32 }
 0x429   :  { %3755 = vmatprep.subr.mxu1 %v10178_v21  ;;  %5980 = vmatprep.subr.bf16.mxu0 %v5979_v37  ;;  %v12740_v21 = vunpack.i.l.bf16 %v10281_v3  ;;  %v7263_v37 = vunpack.i.h.bf16 %v10734_v54  ;;  %v12742_v3 = vunpack.i.l.bf16 %v10309_v35 }
 0x42a   :  { %v2984_v20 = vsel %vm2965_vm11, %v7262_v59, %v12741_v17 }
 0x42b   :  { %v10739_v1 = vpop.permute.xlu1 %7270  ;;  %v10741_v55 = vpop.permute.xlu0 %7265  ;;  %v2923_v8 = vsel %vm384_vm5, %v7257_v57, %v12740_v21 }
 0x42c   :  { %3756 = vmatpush1.msra.mxu1 %v10160_v28  ;;  %v7272_v28 = vunpack.i.l.bf16 %v10739_v1  ;;  %v12587_v33 = vunpack.i.l.bf16 %v10741_v55  ;;  %v5983_v58 = vpack.c.bf16 %v2984_v20, %v2923_v8  ;;  %v12743_v8 = vunpack.i.l.bf16 %v10307_v16 }
 0x42d   :  { %5638 = vmatmul.mubr.msk.f32.vlgmr.msra.gmra.mrb[26].mxu1 %vm534_vm8, %v10384_v48 }
 0x42e   :  { %3945 = vmatprep.mubr.f32.mxu1 %v12648_v19  ;;  %v3045_v53 = vsel %vm3026_vm13, %v12587_v33, %v12742_v3  ;;  %v3106_v20 = vsel %vm3087_vm12, %v7272_v28, %v12743_v8 }
 0x42f   :  { %v10749_v12 = vpop.permute.xlu1 %7280  ;;  %v10751_v14 = vpop.permute.xlu0 %7275  ;;  %v5987_v7 = vpack.c.bf16 %v3106_v20, %v3045_v53 }
 0x433   :  { %v10767_v21 = vpop.permute.xlu1 %7290  ;;  %v10769_v22 = vpop.permute.xlu0 %7285 }
 0x434   :  { %v12589_v17 = vunpack.i.h.bf16 %v10767_v21  ;;  %v7292_v5 = vunpack.i.l.bf16 %v10767_v21  ;;  %v7287_v2 = vunpack.i.l.bf16 %v10769_v22  ;;  %v12744_v35 = vunpack.i.h.bf16 %v10769_v22 }
 0x436   :  { %v2846_v52 = vsel %vm2844_vm9, %v12589_v17, %v7253_v56  ;;  %v2864_v54 = vsel %vm2844_vm9, %v7292_v5, %v7252_v44  ;;  %v2785_v32 = vsel %vm2783_vm10, %v12744_v35, %v7248_v18  ;;  %v2803_v3 = vsel %vm2783_vm10, %v7287_v2, %v7247_v11 }
 0x437   :  { %v10799_v16 = vpop.permute.xlu1 %7300  ;;  %v10801_v33 = vpop.permute.xlu0 %7295  ;;  %v5981_v8 = vpack.c.bf16 %v2864_v54, %v2803_v3  ;;  %v2784_v31 = vsel %vm2783_vm10, %v7248_v18, %v7287_v2  ;;  %v2845_v17 = vsel %vm2844_vm9, %v7253_v56, %v7292_v5  ;;  %v6125_v44 = vpack.c.bf16 %v2846_v52, %v2785_v32 }
 0x438   :  { %v7303_v42 = vunpack.i.h.bf16 %v10799_v16  ;;  %v7302_v27 = vunpack.i.l.bf16 %v10799_v16  ;;  %v7298_v35 = vunpack.i.h.bf16 %v10801_v33  ;;  %v7297_v11 = vunpack.i.l.bf16 %v10801_v33 }
 0x439   :  { %5982 = vmatpush1.bf16.msra.mxu0 %v5981_v8  ;;  %v6123_v15 = vpack.c.bf16 %v2845_v17, %v2784_v31  ;;  %v12745_v54 = vunpack.i.l.bf16 %v10333_v43  ;;  %v12746_v3 = vunpack.i.l.bf16 %v10751_v14  ;;  %v12747_v5 = vunpack.i.l.bf16 %v10331_v50 }
 0x43a   :  { %v12748_v56 = vunpack.i.l.bf16 %v10749_v12  ;;  %v2967_v31 = vsel %vm2965_vm11, %v7303_v42, %v7263_v37  ;;  %v2985_v43 = vsel %vm2965_vm11, %v7302_v27, %v7262_v59  ;;  %v2906_v53 = vsel %vm384_vm5, %v7298_v35, %v7258_v13  ;;  %5984 = vmatprep.subr.bf16.mxu0 %v5983_v58 }
 0x43b   :  { %v3167_v18 = vsel %vm3148_vm15, %v12746_v3, %v12745_v54  ;;  %v2924_v50 = vsel %vm384_vm5, %v7297_v11, %v7257_v57  ;;  %6124 = vmatprep.subr.bf16.mxu1 %v6123_v15  ;;  %v10835_v17 = vpop.permute.xlu1 %7310  ;;  %v10837_v2 = vpop.permute.xlu0 %7305  ;;  %v2905_v20 = vsel %vm384_vm5, %v7258_v13, %v7297_v11  ;;  %v2966_v59 = vsel %vm2965_vm11, %v7263_v37, %v7302_v27 }
 0x43c   :  { %v3228_v52 = vsel %vm3209_vm14, %v12748_v56, %v12747_v5  ;;  %v5985_v32 = vpack.c.bf16 %v2985_v43, %v2924_v50  ;;  %v6129_v8 = vpack.c.bf16 %v2967_v31, %v2906_v53  ;;  %6126 = vmatpush1.bf16.msra.mxu1 %v6125_v44  ;;  %v7313_v54 = vunpack.i.h.bf16 %v10835_v17 }
 0x43d   :  { %v7312_v3 = vunpack.i.l.bf16 %v10835_v17  ;;  %v7308_v58 = vunpack.i.h.bf16 %v10837_v2  ;;  %v7307_v15 = vunpack.i.l.bf16 %v10837_v2  ;;  %v7283_v57 = vunpack.i.h.bf16 %v10749_v12 }
 0x43e   :  { %v7278_v5 = vunpack.i.h.bf16 %v10751_v14  ;;  %5986 = vmatpush1.bf16.msra.mxu0 %v5985_v32  ;;  %v6127_v56 = vpack.c.bf16 %v2966_v59, %v2905_v20  ;;  %v5991_v13 = vpack.c.bf16 %v3228_v52, %v3167_v18  ;;  %v12749_v11 = vunpack.i.h.bf16 %v10739_v1 }
 0x43f   :  { %v3107_v37 = vsel %vm3087_vm12, %v7312_v3, %v7272_v28  ;;  %v12750_v44 = vunpack.i.h.bf16 %v10741_v55  ;;  %v12751_v43 = vunpack.i.l.bf16 %v10741_v55  ;;  %5988 = vmatprep.subr.bf16.mxu0 %v5987_v7  ;;  %v10867_v52 = vpop.permute.xlu1 %7320  ;;  %v10869_v53 = vpop.permute.xlu0 %7315  ;;  %v12787_v33 = vunpack.i.l.bf16 %v10412_v39 }
 0x440   :  { %v3089_v27 = vsel %vm3087_vm12, %v7313_v54, %v12749_v11  ;;  %6128 = vmatprep.subr.bf16.mxu1 %v6127_v56  ;;  %v12753_v20 = vmov %v12749_v11  ;;  %v7323_v7 = vunpack.i.h.bf16 %v10867_v52  ;;  %v7322_v56 = vunpack.i.l.bf16 %v10867_v52 }
 0x441   :  { %v3028_v31 = vsel %vm3026_vm13, %v7308_v58, %v12750_v44  ;;  %v3046_v18 = vsel %vm3026_vm13, %v7307_v15, %v12751_v43  ;;  %v12752_v28 = vmov %v12750_v44  ;;  %v3088_v59 = vsel %vm3087_vm12, %v12753_v20, %v7312_v3  ;;  %6130 = vmatpush1.bf16.msra.mxu1 %v6129_v8 }
 0x442   :  { %v5989_v50 = vpack.c.bf16 %v3107_v37, %v3046_v18  ;;  %v3027_v32 = vsel %vm3026_vm13, %v12752_v28, %v7307_v15  ;;  %v6133_v11 = vpack.c.bf16 %v3089_v27, %v3028_v31  ;;  %v7318_v44 = vunpack.i.h.bf16 %v10869_v53 }
 0x443   :  { %v7317_v37 = vunpack.i.l.bf16 %v10869_v53  ;;  %v6131_v55 = vpack.c.bf16 %v3088_v59, %v3027_v32  ;;  %v3211_v1 = vsel %vm3209_vm14, %v7323_v7, %v7283_v57  ;;  %v12754_v15 = vunpack.i.l.bf16 %v10749_v12  ;;  %v10899_v43 = vpop.permute.xlu1 %7330  ;;  %v10901_v18 = vpop.permute.xlu0 %7325 }
 0x444   :  { %5990 = vmatpush1.bf16.msra.mxu0 %v5989_v50  ;;  %v3150_v3 = vsel %vm3148_vm15, %v7318_v44, %v7278_v5  ;;  %v12755_v27 = vunpack.i.l.bf16 %v10751_v14  ;;  %v3210_v28 = vsel %vm3209_vm14, %v7283_v57, %v7322_v56  ;;  %v7332_v32 = vunpack.i.l.bf16 %v10899_v43 }
 0x445   :  { %v3229_v8 = vsel %vm3209_vm14, %v7322_v56, %v12754_v15  ;;  %5992 = vmatprep.subr.bf16.mxu0 %v5991_v13  ;;  %6132 = vmatprep.subr.bf16.mxu1 %v6131_v55  ;;  %v3149_v50 = vsel %vm3148_vm15, %v7278_v5, %v7317_v37  ;;  %v7327_v14 = vunpack.i.l.bf16 %v10901_v18  ;;  %v6137_v20 = vpack.c.bf16 %v3211_v1, %v3150_v3 }
 0x446   :  { %v3168_v31 = vsel %vm3148_vm15, %v7317_v37, %v12755_v27  ;;  %6134 = vmatpush1.bf16.msra.mxu1 %v6133_v11  ;;  %v6135_v13 = vpack.c.bf16 %v3210_v28, %v3149_v50  ;;  %v12756_v59 = vunpack.i.h.bf16 %v10128_v49  ;;  %v12757_v15 = vunpack.i.h.bf16 %v10130_v62 }
 0x447   :  { %v5993_v12 = vpack.c.bf16 %v3229_v8, %v3168_v31  ;;  %v10918_v57 = vpop.permute.xlu1 %7340  ;;  %v12758_v11 = vunpack.i.h.bf16 %v10351_v38  ;;  %v12759_v49 = vunpack.i.h.bf16 %v10349_v47  ;;  %v12760_v27 = vunpack.i.h.bf16 %v10200_v34 }
 0x448   :  { %v2860_v55 = vsel %vm2844_vm9, %v12756_v59, %v7332_v32  ;;  %v2799_v5 = vsel %vm2783_vm10, %v12757_v15, %v7327_v14  ;;  %6136 = vmatprep.subr.bf16.mxu1 %v6135_v13  ;;  %v7342_v62 = vunpack.i.l.bf16 %v10918_v57  ;;  %v10929_v1 = vpop.permute.xlu0 %7335  ;;  %v12762_v28 = vunpack.i.h.bf16 %v10202_v23 }
 0x449   :  { %5994 = vmatpush1.bf16.msra.mxu0 %v5993_v12  ;;  %v2798_v56 = vsel %vm2783_vm10, %v7327_v14, %v12758_v11  ;;  %v2859_v37 = vsel %vm2844_vm9, %v7332_v32, %v12759_v49  ;;  %v6013_v3 = vpack.c.bf16 %v2860_v55, %v2799_v5  ;;  %v12761_v12 = vunpack.i.h.bf16 %v10377_v10 }
 0x44a   :  { %3258 = vmatprep.subr.mxu0 %v10065_v60  ;;  %6138 = vmatpush1.bf16.msra.mxu1 %v6137_v20  ;;  %v6011_v8 = vpack.c.bf16 %v2859_v37, %v2798_v56  ;;  %v7337_v60 = vunpack.i.l.bf16 %v10929_v1  ;;  %v2981_v31 = vsel %vm2965_vm11, %v12760_v27, %v7342_v62  ;;  %v12763_v34 = vunpack.i.h.bf16 %v10379_v0 }
 0x44b   :  { %3897 = vmatprep.subr.mxu1 %v10259_v36  ;;  %v2980_v50 = vsel %vm2965_vm11, %v7342_v62, %v12761_v12  ;;  %v10948_v36 = vpop.permute.xlu1 %7350  ;;  %v12764_v55 = vunpack.i.h.bf16 %v10412_v39  ;;  %v12765_v5 = vunpack.i.h.bf16 %v10210_v61  ;;  %v12766_v11 = vunpack.i.h.bf16 %v10212_v46  ;;  %v12789_v39 = vld [vmem:[#allocation29_spill] sm:$0xff] }
 0x44c   :  { %v2919_v32 = vsel %vm384_vm5, %v7337_v60, %v12763_v34  ;;  %v7352_v14 = vunpack.i.l.bf16 %v10948_v36  ;;  %v10957_v20 = vpop.permute.xlu0 %7345  ;;  %v12767_v37 = vunpack.i.h.bf16 %v10414_v24  ;;  %v12768_v27 = vunpack.i.h.bf16 %v10446_v45 }
 0x44d   :  { %3259 = vmatpush1.msra.mxu0 %v10055_v9  ;;  %v2920_v9 = vsel %vm384_vm5, %v12762_v28, %v7337_v60  ;;  %v6015_v23 = vpack.c.bf16 %v2980_v50, %v2919_v32  ;;  %v7347_v13 = vunpack.i.l.bf16 %v10957_v20  ;;  %v12769_v12 = vunpack.i.h.bf16 %v10220_v41 }
 0x44e   :  { %5631 = vmatmul.mubr.msk.f32.vlgmr.msra.gmra.mrb[20].mxu0 %vm534_vm8, %v10384_v48  ;;  %6012 = vmatprep.subr.bf16.mxu0 %v6011_v8  ;;  %v6017_v59 = vpack.c.bf16 %v2981_v31, %v2920_v9  ;;  %v3102_v15 = vsel %vm3087_vm12, %v7352_v14, %v12764_v55  ;;  %v12770_v28 = vunpack.i.h.bf16 %v10222_v51  ;;  %v12771_v32 = vunpack.i.h.bf16 %v10448_v6 }
 0x44f   :  { %6014 = vmatpush1.bf16.msra.mxu0 %v6013_v3  ;;  %3448 = vmatprep.mubr.f32.mxu0 %v12648_v19  ;;  %v3042_v56 = vsel %vm3026_vm13, %v12766_v11, %v7347_v13  ;;  %v10974_v49 = vpop.permute.xlu1 %7360  ;;  %v3041_v62 = vsel %vm3026_vm13, %v7347_v13, %v12767_v37  ;;  %v7328_v41 = vunpack.i.h.bf16 %v10901_v18  ;;  %v7343_v55 = vunpack.i.h.bf16 %v10918_v57 }
 0x450   :  { %3898 = vmatpush1.msra.mxu1 %v10206_v40  ;;  %6016 = vmatprep.subr.bf16.mxu0 %v6015_v23  ;;  %v3103_v40 = vsel %vm3087_vm12, %v12765_v5, %v7352_v14  ;;  %v7362_v8 = vunpack.i.l.bf16 %v10974_v49  ;;  %v10981_v60 = vpop.permute.xlu0 %7355  ;;  %v6019_v46 = vpack.c.bf16 %v3102_v15, %v3041_v62  ;;  %v7333_v23 = vunpack.i.h.bf16 %v10899_v43 }
 0x451   :  { %5640 = vmatmul.mubr.msk.f32.vlgmr.msra.gmra.mrb[28].mxu1 %vm534_vm8, %v10384_v48  ;;  %v7357_v61 = vunpack.i.l.bf16 %v10981_v60  ;;  %v6021_v3 = vpack.c.bf16 %v3103_v40, %v3042_v56  ;;  %v7338_v15 = vunpack.i.h.bf16 %v10929_v1  ;;  %v12772_v43 = vunpack.i.l.bf16 %v10349_v47 }
 0x452   :  { %4726 = vmatprep.mubr.f32.mxu1 %v12648_v19  ;;  %v3224_v31 = vsel %vm3209_vm14, %v7362_v8, %v12768_v27  ;;  %v3225_v50 = vsel %vm3209_vm14, %v12769_v12, %v7362_v8  ;;  %v12773_v37 = vunpack.i.l.bf16 %v10533_v4  ;;  %v12774_v1 = vunpack.i.l.bf16 %v10531_v29 }
 0x453   :  { %6018 = vmatpush1.bf16.msra.mxu0 %v6017_v59  ;;  %v3164_v9 = vsel %vm3148_vm15, %v12770_v28, %v7357_v61  ;;  %v10997_v34 = vpop.permute.xlu1 %7370  ;;  %v3163_v14 = vsel %vm3148_vm15, %v7357_v61, %v12771_v32  ;;  %v2856_v18 = vsel %vm2844_vm9, %v12772_v43, %v7333_v23  ;;  %v12775_v8 = vunpack.i.l.bf16 %v10351_v38 }
 0x454   :  { %6020 = vmatprep.subr.bf16.mxu0 %v6019_v46  ;;  %v11005_v13 = vpop.permute.xlu0 %7365  ;;  %v6023_v59 = vpack.c.bf16 %v3224_v31, %v3163_v14  ;;  %v6025_v5 = vpack.c.bf16 %v3225_v50, %v3164_v9  ;;  %v7373_v40 = vunpack.i.h.bf16 %v10997_v34  ;;  %v2794_v57 = vsel %vm2783_vm10, %v7328_v41, %v12773_v37  ;;  %v12781_v9 = vld [vmem:[#allocation13_spill] sm:$0xff] }
 0x455   :  { %v7368_v51 = vunpack.i.h.bf16 %v11005_v13  ;;  %v2855_v62 = vsel %vm2844_vm9, %v7333_v23, %v12774_v1  ;;  %v2795_v47 = vsel %vm2783_vm10, %v12775_v8, %v7328_v41  ;;  %v7353_v61 = vunpack.i.h.bf16 %v10948_v36 }
 0x456   :  { %v7348_v46 = vunpack.i.h.bf16 %v10957_v20  ;;  %v12776_v4 = vunpack.i.h.bf16 %v10769_v22  ;;  %v12777_v38 = vunpack.i.l.bf16 %v10557_v25  ;;  %v12778_v36 = vunpack.i.l.bf16 %v10555_v63 }
 0x457   :  { %6022 = vmatpush1.bf16.msra.mxu0 %v6021_v3  ;;  %v11011_v11 = vpop.permute.xlu1 %7380  ;;  %v12779_v22 = vunpack.i.h.bf16 %v10767_v21  ;;  %v6043_v25 = vpack.c.bf16 %v2855_v62, %v2794_v57  ;;  %v12780_v63 = vunpack.i.l.bf16 %v10377_v10  ;;  %v6045_v32 = vpack.c.bf16 %v2856_v18, %v2795_v47  ;;  %v12785_v18 = vld [vmem:[#allocation26_spill] sm:$0xff] }
 0x458   :  { %6024 = vmatprep.subr.bf16.mxu0 %v6023_v59  ;;  %v11017_v56 = vpop.permute.xlu0 %7375  ;;  %v11040_v29 = vsel %vm2783_vm10, %v7368_v51, %v12776_v4  ;;  %v2915_v27 = vsel %vm384_vm5, %v7338_v15, %v12777_v38  ;;  %v7383_v31 = vunpack.i.h.bf16 %v11011_v11  ;;  %v12782_v14 = vunpack.i.l.bf16 %v10379_v0 }
 0x459   :  { %v7378_v3 = vunpack.i.h.bf16 %v11017_v56  ;;  %v11057_v20 = vsel %vm2844_vm9, %v7373_v40, %v12779_v22  ;;  %v2977_v28 = vsel %vm2965_vm11, %v12780_v63, %v7343_v55  ;;  %v7363_v41 = vunpack.i.h.bf16 %v10974_v49 }
 0x45a   :  { %v6107_v50 = vpack.c.bf16 %v11057_v20, %v11040_v29  ;;  %v2916_v23 = vsel %vm384_vm5, %v12782_v14, %v7338_v15  ;;  %v7358_v59 = vunpack.i.h.bf16 %v10981_v60  ;;  %v12786_v37 = vunpack.i.l.bf16 %v12785_v18 }
 0x45b   :  { %6026 = vmatpush1.bf16.msra.mxu0 %v6025_v5  ;;  %v11060_v12 = vpop.permute.xlu1 %7390  ;;  %v12783_v5 = vld [vmem:[#allocation27_spill] sm:$0xff]  ;;  %v11095_v60 = vsel %vm384_vm5, %v7378_v3, %v7298_v35  ;;  %v11106_v1 = vsel %vm2965_vm11, %v7383_v31, %v7303_v42  ;;  %v3099_v62 = vsel %vm3087_vm12, %v12787_v33, %v7353_v61  ;;  %v12788_v35 = vunpack.i.l.bf16 %v10414_v24 }
 0x45c   :  { %3400 = vmatprep.subr.mxu0 %v10075_v30  ;;  %v2976_v30 = vsel %vm2965_vm11, %v7343_v55, %v12778_v36  ;;  %v11068_v21 = vpop.permute.xlu0 %7385  ;;  %v12784_v43 = vunpack.i.l.bf16 %v12783_v5  ;;  %v3098_v49 = vsel %vm3087_vm12, %v7353_v61, %v12786_v37  ;;  %v7393_v15 = vunpack.i.h.bf16 %v11060_v12  ;;  %v12791_v61 = vld [vmem:[#allocation28_spill] sm:$0xff] }
 0x45d   :  { %v6047_v10 = vpack.c.bf16 %v2976_v30, %v2915_v27  ;;  %v7388_v55 = vunpack.i.h.bf16 %v11068_v21  ;;  %v3038_v8 = vsel %vm3026_vm13, %v12788_v35, %v7348_v46  ;;  %v6049_v4 = vpack.c.bf16 %v2977_v28, %v2916_v23  ;;  %v12803_v35 = vld [vmem:[#allocation14_spill] sm:$0xff] }
 0x45e   :  { %v3037_v0 = vsel %vm3026_vm13, %v7348_v46, %v12784_v43  ;;  %v6111_v42 = vpack.c.bf16 %v11106_v1, %v11095_v60  ;;  %v12790_v36 = vunpack.i.l.bf16 %v12789_v39  ;;  %v12792_v30 = vunpack.i.l.bf16 %v12791_v61  ;;  %v11325_v1 = vld [vmem:[%s12435_s3 + $0x28] sm:$0xff] }
 0x45f   :  { %3401 = vmatpush1.msra.mxu0 %v12781_v9  ;;  %v11098_v57 = vpop.permute.xlu1 %7400  ;;  %v6051_v27 = vpack.c.bf16 %v3098_v49, %v3037_v0  ;;  %v11136_v22 = vsel %vm3026_vm13, %v7388_v55, %v7308_v58  ;;  %v6053_v63 = vpack.c.bf16 %v3099_v62, %v3038_v8  ;;  %v12793_v28 = vunpack.i.l.bf16 %v10446_v45  ;;  %v12799_v0 = vld [vmem:[#allocation18_spill] sm:$0xff]  ;;  %v12801_v49 = vld [vmem:[#allocation19_spill] sm:$0xff] }
 0x460   :  { %5633 = vmatmul.mubr.msk.f32.vlgmr.msra.gmra.mrb[22].mxu0 %vm534_vm8, %v10384_v48  ;;  %6044 = vmatprep.subr.bf16.mxu0 %v6043_v25  ;;  %v11116_v47 = vpop.permute.xlu0 %7395  ;;  %v7403_v16 = vunpack.i.h.bf16 %v11098_v57  ;;  %v3159_v24 = vsel %vm3148_vm15, %v7358_v59, %v12790_v36  ;;  %v3220_v46 = vsel %vm3209_vm14, %v7363_v41, %v12792_v30  ;;  %v11144_v25 = vsel %vm3087_vm12, %v7393_v15, %v7313_v54 }
 0x461   :  { %6046 = vmatpush1.bf16.msra.mxu0 %v6045_v32  ;;  %3590 = vmatprep.mubr.f32.mxu0 %v12648_v19  ;;  %v7398_v38 = vunpack.i.h.bf16 %v11116_v47  ;;  %v3221_v2 = vsel %vm3209_vm14, %v12793_v28, %v7363_v41  ;;  %v6115_v9 = vpack.c.bf16 %v11144_v25, %v11136_v22  ;;  %v12794_v58 = vunpack.i.l.bf16 %v10448_v6  ;;  %v12795_v41 = vld [vmem:[#allocation31_spill] sm:$0xff]  ;;  %v12808_v28 = vld [vmem:[#allocation12_spill] sm:$0xff] }
 0x462   :  { %6048 = vmatprep.subr.bf16.mxu0 %v6047_v10  ;;  %v6055_v32 = vpack.c.bf16 %v3220_v46, %v3159_v24  ;;  %v11170_v45 = vsel %vm3209_vm14, %v7403_v16, %v7323_v7  ;;  %v7372_v6 = vunpack.i.l.bf16 %v10997_v34  ;;  %v7367_v14 = vunpack.i.l.bf16 %v11005_v13  ;;  %v12797_v10 = vld [vmem:[#allocation30_spill] sm:$0xff]  ;;  %v12806_v24 = vld [vmem:[#allocation32_spill] sm:$0xff] }
 0x463   :  { %v3160_v17 = vsel %vm3148_vm15, %v12794_v58, %v7358_v59  ;;  %v11162_v54 = vsel %vm3148_vm15, %v7398_v38, %v7318_v44  ;;  %v7382_v44 = vunpack.i.l.bf16 %v11011_v11  ;;  %v7377_v52 = vunpack.i.l.bf16 %v11017_v56 }
 0x464   :  { %v6119_v53 = vpack.c.bf16 %v11170_v45, %v11162_v54  ;;  %v6057_v23 = vpack.c.bf16 %v3221_v2, %v3160_v17  ;;  %v12796_v59 = vunpack.i.h.bf16 %v12795_v41  ;;  %v12798_v5 = vunpack.i.h.bf16 %v12797_v10  ;;  %v12809_v2 = vld [vmem:[#allocation20_spill] sm:$0xff]  ;;  %v12842_v54 = vld [vmem:[#allocation7_spill] sm:$0xff] }
 0x465   :  { %6050 = vmatpush1.bf16.msra.mxu0 %v6049_v4  ;;  %v12800_v18 = vunpack.i.h.bf16 %v12799_v0  ;;  %v12802_v33 = vunpack.i.h.bf16 %v12801_v49  ;;  %v7392_v8 = vunpack.i.l.bf16 %v11060_v12  ;;  %v7387_v4 = vunpack.i.l.bf16 %v11068_v21  ;;  %v12815_v0 = vld [vmem:[#allocation34_spill] sm:$0xff] }
 0x466   :  { %6052 = vmatprep.subr.bf16.mxu0 %v6051_v27  ;;  %v2790_v7 = vsel %vm2783_vm10, %v7367_v14, %v12796_v59  ;;  %v2851_v43 = vsel %vm2844_vm9, %v7372_v6, %v12798_v5  ;;  %v12804_v27 = vld [vmem:[#allocation33_spill] sm:$0xff]  ;;  %v12807_v61 = vunpack.i.h.bf16 %v12806_v24  ;;  %v12810_v58 = vunpack.i.h.bf16 %v12809_v2  ;;  %v12813_v5 = vld [vmem:[#allocation35_spill] sm:$0xff] }
 0x467   :  { %v2852_v37 = vsel %vm2844_vm9, %v12800_v18, %v7372_v6  ;;  %v2791_v62 = vsel %vm2783_vm10, %v12802_v33, %v7367_v14  ;;  %v12805_v39 = vunpack.i.h.bf16 %v12804_v27  ;;  %v6075_v46 = vpack.c.bf16 %v2851_v43, %v2790_v7 }
 0x468   :  { %v2972_v30 = vsel %vm2965_vm11, %v7382_v44, %v12807_v61  ;;  %v2973_v17 = vsel %vm2965_vm11, %v12810_v58, %v7382_v44  ;;  %v7402_v59 = vunpack.i.l.bf16 %v11098_v57  ;;  %v7397_v7 = vunpack.i.l.bf16 %v11116_v47  ;;  %v12821_v61 = vld [vmem:[#allocation37_spill] sm:$0xff]  ;;  %v12840_v57 = vld [vmem:[#allocation11_spill] sm:$0xff] }
 0x469   :  { %6054 = vmatpush1.bf16.msra.mxu0 %v6053_v63  ;;  %v2911_v36 = vsel %vm384_vm5, %v7377_v52, %v12805_v39  ;;  %v6077_v63 = vpack.c.bf16 %v2852_v37, %v2791_v62  ;;  %v12814_v43 = vunpack.i.h.bf16 %v12813_v5  ;;  %v12816_v18 = vunpack.i.h.bf16 %v12815_v0  ;;  %v12817_v37 = vld [vmem:[#allocation22_spill] sm:$0xff]  ;;  %v12819_v62 = vld [vmem:[#allocation23_spill] sm:$0xff] }
 0x46a   :  { %6056 = vmatprep.subr.bf16.mxu0 %v6055_v32  ;;  %v12811_v32 = vld [vmem:[#allocation21_spill] sm:$0xff]  ;;  %v12818_v49 = vunpack.i.h.bf16 %v12817_v37  ;;  %v12832_v37 = vld [vmem:[#allocation15_spill] sm:$0xff]  ;;  %v12833_v34 = vunpack.i.l.bf16 %v12806_v24  ;;  %v12834_v13 = vunpack.i.l.bf16 %v12804_v27  ;;  %v12835_v56 = vunpack.i.l.bf16 %v12815_v0 }
 0x46b   :  { %v12812_v6 = vunpack.i.h.bf16 %v12811_v32  ;;  %v3033_v44 = vsel %vm3026_vm13, %v7387_v4, %v12814_v43  ;;  %v12836_v29 = vunpack.i.l.bf16 %v12813_v5  ;;  %v12838_v21 = vunpack.i.l.bf16 %v12821_v61 }
 0x46c   :  { %v3095_v33 = vsel %vm3087_vm12, %v12818_v49, %v7392_v8  ;;  %v3994_v45 = vrot.slane %v11325_v1, %v12842_v54 }
 0x46d   :  { %6058 = vmatpush1.bf16.msra.mxu0 %v6057_v23  ;;  %v2912_v14 = vsel %vm384_vm5, %v12812_v6, %v7377_v52  ;;  %v6079_v23 = vpack.c.bf16 %v2972_v30, %v2911_v36  ;;  %v3094_v52 = vsel %vm3087_vm12, %v7392_v8, %v12816_v18  ;;  %v12822_v30 = vunpack.i.h.bf16 %v12821_v61  ;;  %v12825_v8 = vld [vmem:[#allocation24_spill] sm:$0xff] }
 0x46e   :  { %3542 = vmatprep.subr.mxu0 %v12803_v35  ;;  %v12820_v35 = vunpack.i.h.bf16 %v12819_v62  ;;  %v6083_v36 = vpack.c.bf16 %v3094_v52, %v3033_v44  ;;  %v12829_v44 = vunpack.i.l.bf16 %v12797_v10  ;;  %v2969_v10 = vsel %vm2965_vm11, %v12833_v34, %v7383_v31 }
 0x46f   :  { %v3030_v20 = vsel %vm3026_vm13, %v12836_v29, %v7388_v55  ;;  %v3152_v55 = vsel %vm3148_vm15, %v12838_v21, %v7398_v38  ;;  %v12846_v21 = vld [vmem:[#allocation8_spill] sm:$0xff] }
 0x470   :  { %v3034_v39 = vsel %vm3026_vm13, %v12820_v35, %v7387_v4  ;;  %v12827_v4 = vld [vmem:[#allocation25_spill] sm:$0xff]  ;;  %v2848_v18 = vsel %vm2844_vm9, %v12829_v44, %v7373_v40  ;;  %v2908_v40 = vsel %vm384_vm5, %v12834_v13, %v7378_v3  ;;  %v3091_v3 = vsel %vm3087_vm12, %v12835_v56, %v7393_v15 }
 0x471   :  { %3543 = vmatpush1.msra.mxu0 %v12808_v28  ;;  %v6085_v58 = vpack.c.bf16 %v3095_v33, %v3034_v39  ;;  %v12828_v6 = vunpack.i.h.bf16 %v12827_v4  ;;  %v6113_v11 = vpack.c.bf16 %v2969_v10, %v2908_v40  ;;  %v6117_v31 = vpack.c.bf16 %v3091_v3, %v3030_v20  ;;  %v12839_v15 = vld [vmem:[#allocation17_spill] sm:$0xff]  ;;  %v11327_v47 = vpop.permute.xlu0 %3236  ;;  %v11360_v39 = vld [vmem:[%s12435_s3 + $0x30] sm:$0xff] }
 0x472   :  { %5635 = vmatmul.mubr.msk.f32.vlgmr.msra.gmra.mrb[24].mxu0 %vm534_vm8, %v10384_v48  ;;  %6076 = vmatprep.subr.bf16.mxu0 %v6075_v46  ;;  %v6081_v48 = vpack.c.bf16 %v2973_v17, %v2912_v14  ;;  %v3155_v46 = vsel %vm3148_vm15, %v7397_v7, %v12822_v30  ;;  %v12826_v17 = vunpack.i.h.bf16 %v12825_v8  ;;  %v12843_v30 = vld [vmem:[#allocation10_spill] sm:$0xff]  ;;  %v12844_v8 = vld [vmem:[#allocation3_spill] sm:$0xff]  ;;  %v11410_v3 = vld [vmem:[%s12435_s3 + $0x38] sm:$0xf] }
 0x473   :  { %6078 = vmatpush1.bf16.msra.mxu0 %v6077_v63  ;;  %3732 = vmatprep.mubr.f32.mxu0 %v12648_v19  ;;  %v12823_v63 = vld [vmem:[#allocation36_spill] sm:$0xff]  ;;  %v3156_v14 = vsel %vm3148_vm15, %v12828_v6, %v7397_v7  ;;  %v4058_v20 = vrot.slane %v11410_v3, %v12842_v54 }
 0x474   :  { %6080 = vmatprep.subr.bf16.mxu0 %v6079_v23  ;;  %v12824_v28 = vunpack.i.h.bf16 %v12823_v63  ;;  %v3217_v32 = vsel %vm3209_vm14, %v12826_v17, %v7402_v59  ;;  %v12831_v7 = vld [vmem:[#allocation16_spill] sm:$0xff]  ;;  %v12837_v12 = vunpack.i.l.bf16 %v12823_v63  ;;  %v3982_v17 = vrot.slane %v11325_v1, %v12844_v8 }
 0x475   :  { %v6089_v43 = vpack.c.bf16 %v3217_v32, %v3156_v14  ;;  %v12845_v6 = vld [vmem:[#allocation4_spill] sm:$0xff] }
 0x476   :  { %v3216_v2 = vsel %vm3209_vm14, %v7402_v59, %v12824_v28  ;;  %v12830_v59 = vunpack.i.l.bf16 %v12795_v41  ;;  %v3986_v14 = vrot.slane %v11325_v1, %v12845_v6 }
 0x477   :  { %6082 = vmatpush1.bf16.msra.mxu0 %v6081_v48  ;;  %v6087_v23 = vpack.c.bf16 %v3216_v2, %v3155_v46  ;;  %v4042_v46 = vrot.slane %v11360_v39, %v12843_v30 }
 0x478   :  { %6084 = vmatprep.subr.bf16.mxu0 %v6083_v36  ;;  %v2787_v52 = vsel %vm2783_vm10, %v12830_v59, %v7368_v51  ;;  %v7795_v51 = vld [vmem:[%s12433_s1 + $0x10] sm:$0xff] }
 0x479   :  { %v6109_v48 = vpack.c.bf16 %v2848_v18, %v2787_v52 }
 0x47b   :  { %6086 = vmatpush1.bf16.msra.mxu0 %v6085_v58 }
 0x47c   :  { %6088 = vmatprep.subr.bf16.mxu0 %v6087_v23 }
 0x47f   :  { %6090 = vmatpush1.bf16.msra.mxu0 %v6089_v43 }
 0x480   :  { %3684 = vmatprep.subr.mxu0 %v12831_v7 }
 0x483   :  { %3685 = vmatpush1.msra.mxu0 %v12832_v37 }
 0x484   :  { %5637 = vmatmul.mubr.msk.f32.vlgmr.msra.gmra.mrb[26].mxu0 %vm534_vm8, %v7795_v51  ;;  %6108 = vmatprep.subr.bf16.mxu0 %v6107_v50  ;;  %v3213_v50 = vsel %vm3209_vm14, %v12837_v12, %v7403_v16 }
 0x485   :  { %6110 = vmatpush1.bf16.msra.mxu0 %v6109_v48  ;;  %3874 = vmatprep.mubr.f32.mxu0 %v12648_v19  ;;  %v6121_v60 = vpack.c.bf16 %v3213_v50, %v3152_v55  ;;  %v3998_v55 = vrot.slane %v11325_v1, %v12846_v21 }
 0x486   :  { %6112 = vmatprep.subr.bf16.mxu0 %v6111_v42  ;;  %v12841_v42 = vld [vmem:[#allocation5_spill] sm:$0xff] }
 0x487   :  { %v3990_v22 = vrot.slane %v11325_v1, %v12841_v42 }
 0x489   :  { %6114 = vmatpush1.bf16.msra.mxu0 %v6113_v11 }
 0x48a   :  { %6116 = vmatprep.subr.bf16.mxu0 %v6115_v9 }
 0x48d   :  { %6118 = vmatpush1.bf16.msra.mxu0 %v6117_v31 }
 0x48e   :  { %6120 = vmatprep.subr.bf16.mxu0 %v6119_v53 }
 0x491   :  { %6122 = vmatpush1.bf16.msra.mxu0 %v6121_v60 }
 0x492   :  { %3826 = vmatprep.subr.mxu0 %v12839_v15 }
 0x495   :  { %3827 = vmatpush1.msra.mxu0 %v12840_v57 }
 0x496   :  { %5639 = vmatmul.mubr.msk.f32.vlgmr.msra.gmra.mrb[28].mxu0 %vm534_vm8, %v7795_v51 }
 0x497   :  { %4655 = vmatprep.mubr.f32.mxu0 %v12648_v19 }
 0x4a3   :  { %v3379_v16 = vpop.f32.mrb[20].mxu1 }
 0x4a4   :  { %v3380_v38 = vadd.f32 %v3379_v16, %v11327_v47  ;;  %v3381_v25 = vpop.f32.mrb[21].mxu1 }
 0x4a5   :  { %v3382_v9 = vadd.f32 %v3381_v25, %v11327_v47  ;;  %v4010_v25 = vrot.slane %v11325_v1, %v12843_v30 }
 0x4a6   :  { %v3954_v53 = vmax.f32 %v3380_v38, 0.0 }
 0x4a7   :  { %v3955_v41 = vmax.f32 %v3382_v9, 0.0 }
 0x4a8   :  { %v11335_v27 = vmul.f32 %v3990_v22, %v3954_v53 }
 0x4a9   :  { %v11337_v24 = vmul.f32 %v3994_v45, %v3955_v41  ;;  %v4014_v41 = vrot.slane %v11360_v39, %v12844_v8 }
 0x4ab   :  { %v7404_v5 = vpack.i.bf16 %v11337_v24, %v11335_v27 }
 0x4ad   :  { %7405 = vrot.lane.b32.xlu0 %v7404_v5, %s7807_s22 }
 0x4b1   :  { %7410 = vrot.lane.b32.xlu0 %v7404_v5, %s7806_s12 }
 0x4b5   :  { %7415 = vrot.lane.b32.xlu0 %v7404_v5, %s7802_s29 }
 0x4b6   :  { %v11344_v0 = vpop.f32.mrb[22].mxu1 }
 0x4b7   :  { %v3523_v49 = vpop.f32.mrb[23].mxu1 }
 0x4b8   :  { %v3524_v22 = vadd.f32 %v3523_v49, %v11327_v47 }
 0x4b9   :  { %7420 = vrot.lane.b32.xlu0 %v7404_v5, %s7808_s30 }
 0x4ba   :  { %v3959_v45 = vmax.f32 %v3524_v22, 0.0 }
 0x4bc   :  { %v11440_v49 = vmul.f32 %v4010_v25, %v3959_v45  ;;  %v4018_v25 = vrot.slane %v11360_v39, %v12845_v6  ;;  %v4022_v45 = vrot.slane %v11360_v39, %v12841_v42 }
 0x4bd   :  { %7425 = vrot.lane.b32.xlu0 %v7404_v5, %s7810_s6 }
 0x4c1   :  { %7430 = vrot.lane.b32.xlu0 %v7404_v5, %s7809_s5 }
 0x4c5   :  { %7435 = vrot.lane.b32.xlu0 %v7404_v5, %s7812_s8 }
 0x4c9   :  { %7440 = vrot.lane.b32.xlu0 %v7404_v5, %s7811_s7 }
 0x4ed   :  { %v11351_v33 = vpop.f32.mrb[24].mxu1 }
 0x4ee   :  { %v11353_v62 = vpop.f32.mrb[25].mxu1 }
 0x500   :  { %v11355_v35 = vpop.f32.mrb[26].mxu1 }
 0x501   :  { %v3807_v36 = vpop.f32.mrb[27].mxu1 }
 0x502   :  { %v3808_v61 = vadd.f32 %v3807_v36, %v11327_v47 }
 0x504   :  { %v3967_v63 = vmax.f32 %v3808_v61, 0.0 }
 0x506   :  { %v11365_v28 = vmul.f32 %v4042_v46, %v3967_v63 }
 0x508   :  { %4429 = vrot.lane.b32.xlu0 %v11365_v28, %s7809_s5 }
 0x50c   :  { %4489 = vrot.lane.b32.xlu0 %v11365_v28, %s7812_s8 }
 0x51f   :  { %v11377_v23 = vpop.permute.xlu0 %7405 }
 0x520   :  { %v12598_v7 = vunpack.i.h.bf16 %v11377_v23  ;;  %v7407_v48 = vunpack.i.l.bf16 %v11377_v23 }
 0x521   :  { %v3308_v2 = vpop.f32.mrb[20].mxu0 }
 0x522   :  { %v3309_v58 = vadd.f32 %v3308_v2, %v11327_v47  ;;  %v3310_v32 = vpop.f32.mrb[21].mxu0  ;;  %v4155_v51 = vsel %vm2783_vm10, %v7407_v48, %v12598_v7  ;;  %v3522_v2 = vadd.f32 %v11344_v0, %v11327_v47 }
 0x523   :  { %v3311_v4 = vadd.f32 %v3310_v32, %v11327_v47  ;;  %v11387_v34 = vpop.permute.xlu0 %7410 }
 0x524   :  { %v3952_v43 = vmax.f32 %v3309_v58, 0.0  ;;  %v11379_v44 = vpop.f32.mrb[28].mxu1  ;;  %v12596_v10 = vunpack.i.h.bf16 %v11387_v34  ;;  %v7412_v13 = vunpack.i.l.bf16 %v11387_v34 }
 0x525   :  { %v3953_v18 = vmax.f32 %v3311_v4, 0.0  ;;  %v3949_v59 = vpop.f32.mrb[29].mxu1  ;;  %v3958_v4 = vmax.f32 %v3522_v2, 0.0 }
 0x526   :  { %v11381_v52 = vmul.f32 %v3982_v17, %v3952_v43  ;;  %v4215_v11 = vsel %vm2844_vm9, %v7412_v13, %v12596_v10  ;;  %v3950_v29 = vadd.f32 %v3949_v59, %v11327_v47  ;;  %v12847_v17 = vld [vmem:[#allocation6_spill] sm:$0xff] }
 0x527   :  { %v11385_v37 = vmul.f32 %v3986_v14, %v3953_v18  ;;  %v6155_v56 = vpack.c.bf16 %v4215_v11, %v4155_v51  ;;  %v4002_v32 = vrot.slane %v11325_v1, %v12847_v17  ;;  %v12848_v14 = vld [vmem:[#allocation9_spill] sm:$0xff]  ;;  %v3666_v11 = vadd.f32 %v11353_v62, %v11327_v47 }
 0x528   :  { %v3971_v12 = vmax.f32 %v3950_v29, 0.0  ;;  %v4006_v43 = vrot.slane %v11325_v1, %v12848_v14  ;;  %v4030_v29 = vrot.slane %v11360_v39, %v12846_v21 }
 0x529   :  { %v7444_v40 = vpack.i.bf16 %v11385_v37, %v11381_v52  ;;  %6156 = vmatprep.subr.bf16.mxu1 %v6155_v56 }
 0x52a   :  { %v11420_v57 = vmul.f32 %v4058_v20, %v3971_v12  ;;  %v11460_v59 = vmul.f32 %v4006_v43, %v3958_v4  ;;  %v3963_v20 = vmax.f32 %v3666_v11, 0.0  ;;  %v3806_v43 = vadd.f32 %v11355_v35, %v11327_v47 }
 0x52b   :  { %7445 = vrot.lane.b32.xlu1 %v7444_v40, %s7807_s22 }
 0x52c   :  { %v3966_v11 = vmax.f32 %v3806_v43, 0.0 }
 0x52f   :  { %7450 = vrot.lane.b32.xlu1 %v7444_v40, %s7806_s12 }
 0x533   :  { %7455 = vrot.lane.b32.xlu1 %v7444_v40, %s7802_s29  ;;  %v3450_v31 = vpop.f32.mrb[22].mxu0 }
 0x534   :  { %v3451_v50 = vadd.f32 %v3450_v31, %v11327_v47  ;;  %v3452_v60 = vpop.f32.mrb[23].mxu0  ;;  %v4026_v31 = vrot.slane %v11360_v39, %v12842_v54 }
 0x535   :  { %v3453_v46 = vadd.f32 %v3452_v60, %v11327_v47 }
 0x536   :  { %v3956_v15 = vmax.f32 %v3451_v50, 0.0  ;;  %v11483_v62 = vmul.f32 %v4026_v31, %v3963_v20 }
 0x537   :  { %7460 = vrot.lane.b32.xlu1 %v7444_v40, %s7808_s30  ;;  %v3957_v58 = vmax.f32 %v3453_v46, 0.0 }
 0x538   :  { %v11422_v16 = vmul.f32 %v3998_v55, %v3956_v15 }
 0x539   :  { %v11458_v18 = vmul.f32 %v4002_v32, %v3957_v58 }
 0x53a   :  { %v7489_v38 = vpack.i.bf16 %v11422_v16, %v11420_v57 }
 0x53b   :  { %7465 = vrot.lane.b32.xlu1 %v7444_v40, %s7810_s6  ;;  %v7524_v51 = vpack.i.bf16 %v11460_v59, %v11458_v18 }
 0x53c   :  { %7490 = vrot.lane.b32.xlu0 %v7489_v38, %s7806_s12 }
 0x53f   :  { %7470 = vrot.lane.b32.xlu1 %v7444_v40, %s7809_s5 }
 0x540   :  { %7500 = vrot.lane.b32.xlu0 %v7489_v38, %s7808_s30 }
 0x543   :  { %7475 = vrot.lane.b32.xlu1 %v7444_v40, %s7812_s8 }
 0x544   :  { %7510 = vrot.lane.b32.xlu0 %v7489_v38, %s7809_s5 }
 0x545   :  { %v3592_v9 = vpop.f32.mrb[24].mxu0 }
 0x546   :  { %v3593_v53 = vadd.f32 %v3592_v9, %v11327_v47  ;;  %v3594_v5 = vpop.f32.mrb[25].mxu0 }
 0x547   :  { %7480 = vrot.lane.b32.xlu1 %v7444_v40, %s7811_s7  ;;  %v3595_v60 = vadd.f32 %v3594_v5, %v11327_v47 }
 0x548   :  { %v3960_v36 = vmax.f32 %v3593_v53, 0.0  ;;  %7520 = vrot.lane.b32.xlu0 %v7489_v38, %s7811_s7 }
 0x549   :  { %v3961_v22 = vmax.f32 %v3595_v60, 0.0 }
 0x54a   :  { %v11442_v61 = vmul.f32 %v4014_v41, %v3960_v36  ;;  %v11513_v36 = vpop.permute.xlu0 %7415 }
 0x54b   :  { %7485 = vrot.lane.b32.xlu1 %v7489_v38, %s7807_s22  ;;  %v11500_v53 = vmul.f32 %v4018_v25, %v3961_v22  ;;  %v4054_v22 = vrot.slane %v11410_v3, %v12841_v42 }
 0x54c   :  { %v7564_v63 = vpack.i.bf16 %v11442_v61, %v11440_v49 }
 0x54e   :  { %7565 = vrot.lane.b32.xlu0 %v7564_v63, %s7807_s22  ;;  %v11521_v2 = vpop.permute.xlu0 %7420 }
 0x54f   :  { %7495 = vrot.lane.b32.xlu1 %v7489_v38, %s7802_s29  ;;  %v12594_v25 = vunpack.i.h.bf16 %v11521_v2 }
 0x552   :  { %7570 = vrot.lane.b32.xlu0 %v7564_v63, %s7806_s12 }
 0x553   :  { %7505 = vrot.lane.b32.xlu1 %v7489_v38, %s7810_s6 }
 0x556   :  { %7575 = vrot.lane.b32.xlu0 %v7564_v63, %s7802_s29 }
 0x557   :  { %7515 = vrot.lane.b32.xlu1 %v7489_v38, %s7812_s8  ;;  %v3734_v0 = vpop.f32.mrb[26].mxu0  ;;  %v3664_v38 = vadd.f32 %v11351_v33, %v11327_v47 }
 0x558   :  { %v3736_v40 = vpop.f32.mrb[27].mxu0  ;;  %v3735_v1 = vadd.f32 %v3734_v0, %v11327_v47  ;;  %v11532_v0 = vpop.permute.xlu0 %7425 }
 0x559   :  { %v3962_v9 = vmax.f32 %v3664_v38, 0.0  ;;  %v3737_v32 = vadd.f32 %v3736_v40, %v11327_v47  ;;  %v4038_v40 = vrot.slane %v11360_v39, %v12848_v14 }
 0x55a   :  { %7580 = vrot.lane.b32.xlu0 %v7564_v63, %s7808_s30  ;;  %v3964_v56 = vmax.f32 %v3735_v1, 0.0  ;;  %v4034_v1 = vrot.slane %v11360_v39, %v12847_v17  ;;  %v3948_v39 = vadd.f32 %v11379_v44, %v11327_v47 }
 0x55b   :  { %7525 = vrot.lane.b32.xlu1 %v7524_v51, %s7807_s22  ;;  %v11502_v41 = vmul.f32 %v4022_v45, %v3962_v9 }
 0x55c   :  { %v11481_v12 = vmul.f32 %v4030_v29, %v3964_v56  ;;  %v11542_v56 = vpop.permute.xlu0 %7430  ;;  %v11546_v29 = vmul.f32 %v4038_v40, %v3966_v11 }
 0x55d   :  { %v7604_v33 = vpack.i.bf16 %v11502_v41, %v11500_v53 }
 0x55e   :  { %7585 = vrot.lane.b32.xlu0 %v7564_v63, %s7810_s6  ;;  %v7644_v15 = vpack.i.bf16 %v11481_v12, %v11483_v62 }
 0x55f   :  { %7530 = vrot.lane.b32.xlu1 %v7524_v51, %s7806_s12 }
 0x562   :  { %7590 = vrot.lane.b32.xlu0 %v7564_v63, %s7809_s5 }
 0x563   :  { %7535 = vrot.lane.b32.xlu1 %v7524_v51, %s7802_s29 }
 0x566   :  { %7595 = vrot.lane.b32.xlu0 %v7564_v63, %s7812_s8 }
 0x567   :  { %7540 = vrot.lane.b32.xlu1 %v7524_v51, %s7808_s30 }
 0x569   :  { %v3876_v50 = vpop.f32.mrb[28].mxu0 }
 0x56a   :  { %v3878_v55 = vpop.f32.mrb[29].mxu0  ;;  %7600 = vrot.lane.b32.xlu0 %v7564_v63, %s7811_s7  ;;  %v3877_v5 = vadd.f32 %v3876_v50, %v11327_v47  ;;  %v4046_v63 = vrot.slane %v11410_v3, %v12844_v8  ;;  %v11557_v50 = vpop.permute.xlu0 %7435 }
 0x56b   :  { %7545 = vrot.lane.b32.xlu1 %v7524_v51, %s7810_s6  ;;  %v3879_v20 = vadd.f32 %v3878_v55, %v11327_v47  ;;  %v3970_v55 = vmax.f32 %v3948_v39, 0.0  ;;  %v7422_v47 = vunpack.i.l.bf16 %v11521_v2  ;;  %v12849_v30 = vunpack.i.h.bf16 %v11557_v50 }
 0x56c   :  { %v3968_v46 = vmax.f32 %v3877_v5, 0.0 }
 0x56d   :  { %v3969_v60 = vmax.f32 %v3879_v20, 0.0  ;;  %v4335_v43 = vsel %vm2965_vm11, %v7422_v47, %v12594_v25 }
 0x56e   :  { %7645 = vrot.lane.b32.xlu0 %v7644_v15, %s7807_s22  ;;  %v11523_v58 = vmul.f32 %v4046_v63, %v3968_v46  ;;  %v11575_v45 = vpop.permute.xlu0 %7440  ;;  %v7417_v46 = vunpack.i.l.bf16 %v11513_v36 }
 0x56f   :  { %7550 = vrot.lane.b32.xlu1 %v7524_v51, %s7809_s5 }
 0x570   :  { %v7724_v4 = vpack.i.bf16 %v11523_v58, %v11365_v28 }
 0x572   :  { %7650 = vrot.lane.b32.xlu0 %v7644_v15, %s7806_s12 }
 0x573   :  { %7555 = vrot.lane.b32.xlu1 %v7524_v51, %s7812_s8 }
 0x576   :  { %7655 = vrot.lane.b32.xlu0 %v7644_v15, %s7802_s29 }
 0x577   :  { %7560 = vrot.lane.b32.xlu1 %v7524_v51, %s7811_s7  ;;  %v3965_v51 = vmax.f32 %v3737_v32, 0.0 }
 0x579   :  { %v11544_v35 = vmul.f32 %v4034_v1, %v3965_v51 }
 0x57a   :  { %7660 = vrot.lane.b32.xlu0 %v7644_v15, %s7808_s30  ;;  %v11611_v20 = vpop.permute.xlu0 %4429 }
 0x57b   :  { %7605 = vrot.lane.b32.xlu1 %v7604_v33, %s7807_s22  ;;  %v11553_v31 = vpack.i.bf16 %v11546_v29, %v11544_v35 }
 0x57e   :  { %7665 = vrot.lane.b32.xlu0 %v7644_v15, %s7810_s6  ;;  %v11635_v25 = vpop.permute.xlu0 %4489 }
 0x57f   :  { %7610 = vrot.lane.b32.xlu1 %v7604_v33, %s7806_s12 }
 0x582   :  { %7670 = vrot.lane.b32.xlu0 %v7644_v15, %s7809_s5 }
 0x583   :  { %7615 = vrot.lane.b32.xlu1 %v7604_v33, %s7802_s29 }
 0x586   :  { %7675 = vrot.lane.b32.xlu0 %v7644_v15, %s7812_s8 }
 0x587   :  { %7620 = vrot.lane.b32.xlu1 %v7604_v33, %s7808_s30 }
 0x58a   :  { %7680 = vrot.lane.b32.xlu0 %v7644_v15, %s7811_s7  ;;  %v4050_v15 = vrot.slane %v11410_v3, %v12845_v6  ;;  %v12595_v3 = vunpack.i.h.bf16 %v11513_v36 }
 0x58b   :  { %7625 = vrot.lane.b32.xlu1 %v7604_v33, %s7810_s6 }
 0x58e   :  { %7725 = vrot.lane.b32.xlu0 %v7724_v4, %s7807_s22 }
 0x58f   :  { %7630 = vrot.lane.b32.xlu1 %v7604_v33, %s7809_s5 }
 0x592   :  { %7730 = vrot.lane.b32.xlu0 %v7724_v4, %s7806_s12 }
 0x593   :  { %7635 = vrot.lane.b32.xlu1 %v7604_v33, %s7812_s8 }
 0x596   :  { %7735 = vrot.lane.b32.xlu0 %v7724_v4, %s7802_s29 }
 0x597   :  { %7640 = vrot.lane.b32.xlu1 %v7604_v33, %s7811_s7  ;;  %v11577_v33 = vmul.f32 %v4050_v15, %v3969_v60  ;;  %v4275_v15 = vsel %vm384_vm5, %v7417_v46, %v12595_v3 }
 0x599   :  { %v7774_v3 = vpack.i.bf16 %v11577_v33, %v11523_v58 }
 0x59a   :  { %7740 = vrot.lane.b32.xlu0 %v7724_v4, %s7808_s30 }
 0x59b   :  { %7685 = vrot.lane.b32.xlu1 %v11553_v31, %s7807_s22 }
 0x59d   :  { %v11564_v38 = vpop.permute.xlu1 %7445 }
 0x59e   :  { %7745 = vrot.lane.b32.xlu0 %v7724_v4, %s7810_s6  ;;  %v7448_v44 = vunpack.i.h.bf16 %v11564_v38  ;;  %v12601_v9 = vunpack.i.l.bf16 %v11564_v38  ;;  %v11585_v4 = vmul.f32 %v4054_v22, %v3970_v55  ;;  %v6159_v55 = vpack.c.bf16 %v4335_v43, %v4275_v15 }
 0x59f   :  { %7690 = vrot.lane.b32.xlu1 %v11553_v31, %s7806_s12  ;;  %v12597_v22 = vunpack.i.h.bf16 %v11542_v56 }
 0x5a0   :  { %v4156_v51 = vsel %vm2783_vm10, %v7448_v44, %v7407_v48  ;;  %v4157_v11 = vsel %vm2783_vm10, %v12601_v9, %v7448_v44  ;;  %v11617_v48 = vpack.i.bf16 %v11585_v4, %v11577_v33  ;;  %v7432_v44 = vunpack.i.l.bf16 %v11542_v56 }
 0x5a1   :  { %v11579_v5 = vpop.permute.xlu1 %7450 }
 0x5a2   :  { %v7453_v63 = vunpack.i.h.bf16 %v11579_v5  ;;  %v12602_v32 = vunpack.i.l.bf16 %v11579_v5  ;;  %4549 = vrot.lane.b32.xlu0 %v11365_v28, %s7811_s7 }
 0x5a3   :  { %7695 = vrot.lane.b32.xlu1 %v11553_v31, %s7802_s29 }
 0x5a4   :  { %v4216_v1 = vsel %vm2844_vm9, %v7453_v63, %v7412_v13  ;;  %v4217_v40 = vsel %vm2844_vm9, %v12602_v32, %v7453_v63 }
 0x5a5   :  { %v6157_v39 = vpack.c.bf16 %v4216_v1, %v4156_v51  ;;  %v11613_v60 = vpop.permute.xlu1 %7455  ;;  %v6139_v13 = vpack.c.bf16 %v4217_v40, %v4157_v11  ;;  %v12599_v1 = vunpack.i.h.bf16 %v11532_v0  ;;  %v7427_v11 = vunpack.i.l.bf16 %v11532_v0 }
 0x5a6   :  { %7755 = vrot.lane.b32.xlu0 %v11617_v48, %s7806_s12  ;;  %v12600_v63 = vunpack.i.h.bf16 %v11613_v60 }
 0x5a7   :  { %7700 = vrot.lane.b32.xlu1 %v11553_v31, %s7808_s30  ;;  %6140 = vmatprep.subr.bf16.mxu0 %v6139_v13  ;;  %v4455_v13 = vsel %vm3087_vm12, %v7432_v44, %v12597_v22  ;;  %v4395_v10 = vsel %vm3026_vm13, %v7427_v11, %v12599_v1 }
 0x5a8   :  { %6158 = vmatpush1.bf16.msra.mxu1 %v6157_v39  ;;  %v4276_v43 = vsel %vm384_vm5, %v12600_v63, %v7417_v46  ;;  %v7437_v63 = vunpack.i.l.bf16 %v11557_v50 }
 0x5a9   :  { %6160 = vmatprep.subr.bf16.mxu1 %v6159_v55  ;;  %v11630_v51 = vpop.permute.xlu1 %7460 }
 0x5aa   :  { %v7463_v40 = vunpack.i.h.bf16 %v11630_v51  ;;  %7765 = vrot.lane.b32.xlu0 %v11617_v48, %s7808_s30  ;;  %v4515_v17 = vsel %vm3148_vm15, %v7437_v63, %v12849_v30 }
 0x5ab   :  { %7705 = vrot.lane.b32.xlu1 %v11553_v31, %s7810_s6 }
 0x5ac   :  { %v4336_v39 = vsel %vm2965_vm11, %v7463_v40, %v7422_v47  ;;  %v6163_v47 = vpack.c.bf16 %v4455_v13, %v4395_v10 }
 0x5ad   :  { %v6161_v15 = vpack.c.bf16 %v4336_v39, %v4276_v43  ;;  %v11651_v55 = vpop.permute.xlu1 %7465  ;;  %v12606_v43 = vunpack.i.h.bf16 %v11575_v45  ;;  %v7442_v39 = vunpack.i.l.bf16 %v11575_v45 }
 0x5ae   :  { %7775 = vrot.lane.b32.xlu0 %v7774_v3, %s7809_s5  ;;  %v11660_v46 = vpop.permute.xlu0 %7490  ;;  %v12607_v22 = vunpack.i.h.bf16 %v11651_v55 }
 0x5af   :  { %7710 = vrot.lane.b32.xlu1 %v11553_v31, %s7809_s5  ;;  %6162 = vmatpush1.bf16.msra.mxu1 %v6161_v15  ;;  %v4575_v15 = vsel %vm3209_vm14, %v7442_v39, %v12606_v43 }
 0x5b0   :  { %6164 = vmatprep.subr.bf16.mxu1 %v6163_v47  ;;  %v4396_v10 = vsel %vm3026_vm13, %v12607_v22, %v7427_v11 }
 0x5b1   :  { %v11667_v7 = vpop.permute.xlu1 %7470 }
 0x5b2   :  { %v7473_v9 = vunpack.i.h.bf16 %v11667_v7  ;;  %7780 = vrot.lane.b32.xlu0 %v7774_v3, %s7812_s8  ;;  %v11673_v32 = vpop.permute.xlu0 %7500 }
 0x5b3   :  { %7715 = vrot.lane.b32.xlu1 %v11553_v31, %s7812_s8 }
 0x5b4   :  { %v4456_v13 = vsel %vm3087_vm12, %v7473_v9, %v7432_v44  ;;  %v6167_v44 = vpack.c.bf16 %v4575_v15, %v4515_v17  ;;  %v12610_v17 = vunpack.i.l.bf16 %v11660_v46 }
 0x5b5   :  { %v6165_v47 = vpack.c.bf16 %v4456_v13, %v4396_v10  ;;  %v11687_v1 = vpop.permute.xlu1 %7475  ;;  %v5645_v10 = vld [vmem:[%s12434_s2 + $0x18] sm:$0xff] }
 0x5b6   :  { %7785 = vrot.lane.b32.xlu0 %v7774_v3, %s7811_s7  ;;  %v11694_v14 = vpop.permute.xlu0 %7510  ;;  %v7478_v11 = vunpack.i.h.bf16 %v11687_v1  ;;  %v7462_v3 = vunpack.i.l.bf16 %v11630_v51  ;;  %v12851_v51 = vunpack.i.l.bf16 %v11564_v38 }
 0x5b7   :  { %7720 = vrot.lane.b32.xlu1 %v11553_v31, %s7811_s7  ;;  %6166 = vmatpush1.bf16.msra.mxu1 %v6165_v47  ;;  %v7457_v47 = vunpack.i.l.bf16 %v11613_v60 }
 0x5b8   :  { %6168 = vmatprep.subr.bf16.mxu1 %v6167_v44  ;;  %v4516_v31 = vsel %vm3148_vm15, %v7478_v11, %v7437_v63  ;;  %v4337_v63 = vsel %vm2965_vm11, %v7462_v3, %v7463_v40  ;;  %v7467_v40 = vunpack.i.l.bf16 %v11651_v55 }
 0x5b9   :  { %v11702_v13 = vpop.permute.xlu1 %7480 }
 0x5ba   :  { %v7483_v30 = vunpack.i.h.bf16 %v11702_v13  ;;  %4585 = vperm.xlu0 %6667, %v5645_v10   ;;  %v11714_v43 = vpop.permute.xlu0 %7520  ;;  %v7472_v10 = vunpack.i.l.bf16 %v11667_v7 }
 0x5bb   :  { %4435 = vrot.lane.b32.xlu1 %v11585_v4, %s7809_s5 }
 0x5bc   :  { %v4576_v15 = vsel %vm3209_vm14, %v7483_v30, %v7442_v39  ;;  %v12850_v39 = vunpack.i.l.bf16 %v11579_v5 }
 0x5bd   :  { %v6169_v44 = vpack.c.bf16 %v4576_v15, %v4516_v31  ;;  %v11716_v22 = vpop.permute.xlu1 %7485 }
 0x5be   :  { %v4218_v31 = vsel %vm2844_vm9, %v12610_v17, %v12850_v39  ;;  %v12852_v7 = vunpack.i.l.bf16 %v11716_v22  ;;  %v12853_v39 = vunpack.i.h.bf16 %v11613_v60  ;;  %v12854_v60 = vunpack.i.l.bf16 %v11673_v32 }
 0x5bf   :  { %4495 = vrot.lane.b32.xlu1 %v11585_v4, %s7812_s8  ;;  %6170 = vmatpush1.bf16.msra.mxu1 %v6169_v44 }
 0x5c0   :  { %v4158_v21 = vsel %vm2783_vm10, %v12852_v7, %v12851_v51  ;;  %4678 = vmatprep.subr.mxu1 %v11337_v24  ;;  %v11739_v5 = vpop.permute.xlu0 %7565  ;;  %v4277_v17 = vsel %vm384_vm5, %v7457_v47, %v12853_v39  ;;  %v11751_v51 = vld [vmem:[%s12433_s1 + $0x18] sm:$0xff]  ;;  %v7482_v24 = vunpack.i.l.bf16 %v11702_v13  ;;  %v7477_v13 = vunpack.i.l.bf16 %v11687_v1 }
 0x5c1   :  { %v6141_v44 = vpack.c.bf16 %v4218_v31, %v4158_v21  ;;  %v11741_v6 = vpop.permute.xlu1 %7495  ;;  %v6143_v15 = vpack.c.bf16 %v4337_v63, %v4277_v17  ;;  %v4457_v21 = vsel %vm3087_vm12, %v7472_v10, %v7473_v9  ;;  %v4338_v31 = vsel %vm2965_vm11, %v12854_v60, %v7462_v3 }
 0x5c2   :  { %v12615_v38 = vunpack.i.l.bf16 %v11741_v6  ;;  %v12614_v17 = vunpack.i.l.bf16 %v11694_v14  ;;  %v12855_v3 = vunpack.i.h.bf16 %v11651_v55  ;;  %v12611_v55 = vunpack.i.l.bf16 %v11714_v43 }
 0x5c3   :  { %7750 = vrot.lane.b32.xlu1 %v11617_v48, %s7807_s22  ;;  %6142 = vmatpush1.bf16.msra.mxu0 %v6141_v44 }
 0x5c4   :  { %v4278_v63 = vsel %vm384_vm5, %v12615_v38, %v7457_v47  ;;  %4679 = vmatpush1.msra.mxu1 %v11335_v27  ;;  %6144 = vmatprep.subr.bf16.mxu0 %v6143_v15  ;;  %v11769_v44 = vpop.permute.xlu0 %7570  ;;  %v4397_v39 = vsel %vm3026_vm13, %v7467_v40, %v12855_v3  ;;  %v4577_v27 = vsel %vm3209_vm14, %v7482_v24, %v7483_v30 }
 0x5c5   :  { %v6145_v7 = vpack.c.bf16 %v4338_v31, %v4278_v63  ;;  %5647 = vmatmul.mubr.msk.f32.vlgmr.msra.gmra.mrb[30].mxu1 %vm534_vm8, %v11751_v51  ;;  %v11773_v9 = vpop.permute.xlu1 %7505  ;;  %v6147_v60 = vpack.c.bf16 %v4457_v21, %v4397_v39  ;;  %v4458_v1 = vsel %vm3087_vm12, %v12614_v17, %v7472_v10  ;;  %v4517_v30 = vsel %vm3148_vm15, %v7477_v13, %v7478_v11 }
 0x5c6   :  { %v12613_v47 = vunpack.i.l.bf16 %v11773_v9  ;;  %4868 = vmatprep.mubr.f32.mxu1 %v12648_v19  ;;  %v6151_v3 = vpack.c.bf16 %v4577_v27, %v4517_v30  ;;  %v4578_v10 = vsel %vm3209_vm14, %v12611_v55, %v7482_v24  ;;  %v7488_v27 = vunpack.i.h.bf16 %v11716_v22 }
 0x5c7   :  { %7760 = vrot.lane.b32.xlu1 %v11617_v48, %s7802_s29  ;;  %6146 = vmatpush1.bf16.msra.mxu0 %v6145_v7  ;;  %v7493_v24 = vunpack.i.h.bf16 %v11660_v46  ;;  %v12618_v30 = vunpack.i.l.bf16 %v11769_v44 }
 0x5c8   :  { %v4398_v15 = vsel %vm3026_vm13, %v12613_v47, %v7467_v40  ;;  %6148 = vmatprep.subr.bf16.mxu0 %v6147_v60  ;;  %v11794_v31 = vpop.permute.xlu0 %7575 }
 0x5c9   :  { %v6149_v21 = vpack.c.bf16 %v4458_v1, %v4398_v15  ;;  %v11796_v63 = vpop.permute.xlu1 %7515 }
 0x5ca   :  { %v12612_v7 = vunpack.i.l.bf16 %v11796_v63 }
 0x5cb   :  { %7770 = vrot.lane.b32.xlu1 %v11617_v48, %s7810_s6  ;;  %6150 = vmatpush1.bf16.msra.mxu0 %v6149_v21  ;;  %v12616_v21 = vunpack.i.l.bf16 %v11739_v5 }
 0x5cc   :  { %v4518_v40 = vsel %vm3148_vm15, %v12612_v7, %v7477_v13  ;;  %6152 = vmatprep.subr.bf16.mxu0 %v6151_v3  ;;  %v11811_v11 = vpop.permute.xlu0 %7580 }
 0x5cd   :  { %v6153_v39 = vpack.c.bf16 %v4578_v10, %v4518_v40  ;;  %v7526_v60 = vpop.permute.xlu1 %7525  ;;  %v12856_v40 = vunpack.i.h.bf16 %v11377_v23 }
 0x5ce   :  { %v7528_v1 = vunpack.i.h.bf16 %v7526_v60  ;;  %v7527_v48 = vunpack.i.l.bf16 %v7526_v60 }
 0x5cf   :  { %4555 = vrot.lane.b32.xlu1 %v11585_v4, %s7811_s7  ;;  %6154 = vmatpush1.bf16.msra.mxu0 %v6153_v39  ;;  %v4154_v60 = vsel %vm2783_vm10, %v12856_v40, %v7488_v27 }
 0x5d0   :  { %4607 = vmatprep.subr.mxu0 %v11385_v37  ;;  %v11818_v15 = vpop.permute.xlu0 %7585  ;;  %v4152_v39 = vsel %vm2783_vm10, %v7527_v48, %v7528_v1  ;;  %v4153_v37 = vsel %vm2783_vm10, %v7488_v27, %v7527_v48  ;;  %v12857_v27 = vunpack.i.h.bf16 %v11387_v34  ;;  %v7503_v34 = vunpack.i.h.bf16 %v11673_v32 }
 0x5d1   :  { %v7531_v13 = vpop.permute.xlu1 %7530 }
 0x5d2   :  { %v7533_v3 = vunpack.i.h.bf16 %v7531_v13  ;;  %v7532_v10 = vunpack.i.l.bf16 %v7531_v13  ;;  %v4151_v13 = vsel %vm2783_vm10, %v7528_v1, %v12616_v21  ;;  %v4214_v48 = vsel %vm2844_vm9, %v12857_v27, %v7493_v24 }
 0x5d3   :  { %4608 = vmatpush1.msra.mxu0 %v11381_v52  ;;  %v6173_v38 = vpack.c.bf16 %v4214_v48, %v4154_v60  ;;  %v7498_v1 = vunpack.i.h.bf16 %v11741_v6  ;;  %v12858_v60 = vunpack.i.h.bf16 %v11513_v36  ;;  %v12859_v48 = vunpack.i.h.bf16 %v11521_v2 }
 0x5d4   :  { %v4212_v55 = vsel %vm2844_vm9, %v7532_v10, %v7533_v3  ;;  %5646 = vmatmul.mubr.msk.f32.vlgmr.msra.gmra.mrb[30].mxu0 %vm534_vm8, %v11751_v51  ;;  %v4213_v23 = vsel %vm2844_vm9, %v7493_v24, %v7532_v10  ;;  %v4211_v52 = vsel %vm2844_vm9, %v7533_v3, %v12618_v30  ;;  %v11849_v7 = vpop.permute.xlu0 %7590  ;;  %v12619_v3 = vunpack.i.l.bf16 %v11794_v31 }
 0x5d5   :  { %v6189_v40 = vpack.c.bf16 %v4212_v55, %v4152_v39  ;;  %v7536_v47 = vpop.permute.xlu1 %7535  ;;  %v6171_v10 = vpack.c.bf16 %v4213_v23, %v4153_v37  ;;  %v6187_v17 = vpack.c.bf16 %v4211_v52, %v4151_v13  ;;  %4797 = vmatprep.mubr.f32.mxu0 %v12648_v19  ;;  %v12620_v39 = vunpack.i.l.bf16 %v11811_v11 }
 0x5d6   :  { %v7538_v21 = vunpack.i.h.bf16 %v7536_v47  ;;  %v7537_v8 = vunpack.i.l.bf16 %v7536_v47  ;;  %v4274_v47 = vsel %vm384_vm5, %v12858_v60, %v7498_v1  ;;  %v7508_v30 = vunpack.i.h.bf16 %v11773_v9 }
 0x5d7   :  { %6172 = vmatprep.subr.bf16.mxu0 %v6171_v10  ;;  %6188 = vmatprep.subr.bf16.mxu1 %v6187_v17  ;;  %v7513_v2 = vunpack.i.h.bf16 %v11694_v14 }
 0x5d8   :  { %6174 = vmatpush1.bf16.msra.mxu0 %v6173_v38  ;;  %6190 = vmatpush1.bf16.msra.mxu1 %v6189_v40  ;;  %v11854_v24 = vpop.permute.xlu0 %7595  ;;  %v4272_v38 = vsel %vm384_vm5, %v7537_v8, %v7538_v21  ;;  %v4273_v17 = vsel %vm384_vm5, %v7498_v1, %v7537_v8  ;;  %v4271_v36 = vsel %vm384_vm5, %v7538_v21, %v12619_v3 }
 0x5d9   :  { %v7541_v55 = vpop.permute.xlu1 %7540  ;;  %v4334_v8 = vsel %vm2965_vm11, %v12859_v48, %v7503_v34 }
 0x5da   :  { %v7543_v37 = vunpack.i.h.bf16 %v7541_v55  ;;  %v7542_v23 = vunpack.i.l.bf16 %v7541_v55  ;;  %v6177_v60 = vpack.c.bf16 %v4334_v8, %v4274_v47  ;;  %v12860_v47 = vunpack.i.h.bf16 %v11532_v0 }
 0x5dc   :  { %v4332_v13 = vsel %vm2965_vm11, %v7542_v23, %v7543_v37  ;;  %v4333_v52 = vsel %vm2965_vm11, %v7503_v34, %v7542_v23  ;;  %v4331_v27 = vsel %vm2965_vm11, %v7543_v37, %v12620_v39  ;;  %v11882_v10 = vpop.permute.xlu0 %7600  ;;  %v7518_v39 = vunpack.i.h.bf16 %v11796_v63 }
 0x5dd   :  { %v6193_v40 = vpack.c.bf16 %v4332_v13, %v4272_v38  ;;  %v7546_v1 = vpop.permute.xlu1 %7545  ;;  %v6175_v55 = vpack.c.bf16 %v4333_v52, %v4273_v17  ;;  %v6191_v23 = vpack.c.bf16 %v4331_v27, %v4271_v36  ;;  %v12621_v38 = vunpack.i.l.bf16 %v11818_v15 }
 0x5de   :  { %v7548_v21 = vunpack.i.h.bf16 %v7546_v1  ;;  %v7547_v3 = vunpack.i.l.bf16 %v7546_v1  ;;  %v12622_v13 = vunpack.i.l.bf16 %v11849_v7  ;;  %v4394_v36 = vsel %vm3026_vm13, %v12860_v47, %v7508_v30 }
 0x5df   :  { %6176 = vmatprep.subr.bf16.mxu0 %v6175_v55  ;;  %6192 = vmatprep.subr.bf16.mxu1 %v6191_v23  ;;  %v12861_v55 = vunpack.i.h.bf16 %v11542_v56  ;;  %v7523_v56 = vunpack.i.h.bf16 %v11714_v43 }
 0x5e0   :  { %6178 = vmatpush1.bf16.msra.mxu0 %v6177_v60  ;;  %6194 = vmatpush1.bf16.msra.mxu1 %v6193_v40  ;;  %v11886_v37 = vpop.permute.xlu0 %7645  ;;  %v4392_v27 = vsel %vm3026_vm13, %v7547_v3, %v7548_v21  ;;  %v4393_v48 = vsel %vm3026_vm13, %v7508_v30, %v7547_v3  ;;  %v4391_v0 = vsel %vm3026_vm13, %v7548_v21, %v12621_v38 }
 0x5e1   :  { %v7551_v34 = vpop.permute.xlu1 %7550  ;;  %v4454_v30 = vsel %vm3087_vm12, %v12861_v55, %v7513_v2 }
 0x5e2   :  { %v7553_v17 = vunpack.i.h.bf16 %v7551_v34  ;;  %v7552_v52 = vunpack.i.l.bf16 %v7551_v34  ;;  %v6181_v47 = vpack.c.bf16 %v4454_v30, %v4394_v36  ;;  %v12862_v36 = vunpack.i.h.bf16 %v11557_v50 }
 0x5e4   :  { %v4452_v8 = vsel %vm3087_vm12, %v7552_v52, %v7553_v17  ;;  %v4453_v40 = vsel %vm3087_vm12, %v7513_v2, %v7552_v52  ;;  %v4451_v1 = vsel %vm3087_vm12, %v7553_v17, %v12622_v13  ;;  %v11914_v23 = vpop.permute.xlu0 %7650  ;;  %v7568_v13 = vunpack.i.h.bf16 %v11739_v5 }
 0x5e5   :  { %v6197_v3 = vpack.c.bf16 %v4452_v8, %v4392_v27  ;;  %v7556_v60 = vpop.permute.xlu1 %7555  ;;  %v6179_v34 = vpack.c.bf16 %v4453_v40, %v4393_v48  ;;  %v6195_v52 = vpack.c.bf16 %v4451_v1, %v4391_v0  ;;  %v12623_v27 = vunpack.i.l.bf16 %v11854_v24 }
 0x5e6   :  { %v7558_v21 = vunpack.i.h.bf16 %v7556_v60  ;;  %v7557_v38 = vunpack.i.l.bf16 %v7556_v60  ;;  %v7602_v8 = vunpack.i.l.bf16 %v11882_v10  ;;  %v4514_v0 = vsel %vm3148_vm15, %v12862_v36, %v7518_v39 }
 0x5e7   :  { %6180 = vmatprep.subr.bf16.mxu0 %v6179_v34  ;;  %6196 = vmatprep.subr.bf16.mxu1 %v6195_v52  ;;  %v12863_v34 = vunpack.i.h.bf16 %v11575_v45 }
 0x5e8   :  { %6182 = vmatpush1.bf16.msra.mxu0 %v6181_v47  ;;  %6198 = vmatpush1.bf16.msra.mxu1 %v6197_v3  ;;  %v11918_v17 = vpop.permute.xlu0 %7655  ;;  %v4512_v1 = vsel %vm3148_vm15, %v7557_v38, %v7558_v21  ;;  %v4513_v55 = vsel %vm3148_vm15, %v7518_v39, %v7557_v38  ;;  %v4511_v50 = vsel %vm3148_vm15, %v7558_v21, %v12623_v27  ;;  %v7573_v21 = vunpack.i.h.bf16 %v11769_v44 }
 0x5e9   :  { %v7561_v2 = vpop.permute.xlu1 %7560  ;;  %v4574_v39 = vsel %vm3209_vm14, %v12863_v34, %v7523_v56  ;;  %v7647_v34 = vunpack.i.l.bf16 %v11886_v37 }
 0x5ea   :  { %v7563_v48 = vunpack.i.h.bf16 %v7561_v2  ;;  %v7562_v40 = vunpack.i.l.bf16 %v7561_v2  ;;  %v6185_v36 = vpack.c.bf16 %v4574_v39, %v4514_v0  ;;  %v12864_v0 = vunpack.i.l.bf16 %v11739_v5 }
 0x5ec   :  { %v4572_v30 = vsel %vm3209_vm14, %v7562_v40, %v7563_v48  ;;  %v4573_v3 = vsel %vm3209_vm14, %v7523_v56, %v7562_v40  ;;  %v4571_v60 = vsel %vm3209_vm14, %v7563_v48, %v7602_v8  ;;  %v11946_v52 = vpop.permute.xlu0 %7660 }
 0x5ed   :  { %v6201_v38 = vpack.c.bf16 %v4572_v30, %v4512_v1  ;;  %v7606_v47 = vpop.permute.xlu1 %7605  ;;  %v6183_v2 = vpack.c.bf16 %v4573_v3, %v4513_v55  ;;  %v6199_v40 = vpack.c.bf16 %v4571_v60, %v4511_v50  ;;  %v4150_v30 = vsel %vm2783_vm10, %v12864_v0, %v7568_v13 }
 0x5ee   :  { %v7607_v27 = vunpack.i.l.bf16 %v7606_v47  ;;  %v7608_v45 = vunpack.i.h.bf16 %v7606_v47  ;;  %v12865_v3 = vunpack.i.l.bf16 %v11769_v44  ;;  %v7652_v60 = vunpack.i.l.bf16 %v11914_v23 }
 0x5ef   :  { %6184 = vmatprep.subr.bf16.mxu0 %v6183_v2  ;;  %6200 = vmatprep.subr.bf16.mxu1 %v6199_v40  ;;  %v7583_v2 = vunpack.i.h.bf16 %v11811_v11  ;;  %v12624_v0 = vunpack.i.l.bf16 %v11918_v17 }
 0x5f0   :  { %6186 = vmatpush1.bf16.msra.mxu0 %v6185_v36  ;;  %6202 = vmatpush1.bf16.msra.mxu1 %v6201_v38  ;;  %v11950_v48 = vpop.permute.xlu0 %7665  ;;  %v4210_v50 = vsel %vm2844_vm9, %v12865_v3, %v7573_v21  ;;  %v4148_v44 = vsel %vm2783_vm10, %v7607_v27, %v7608_v45 }
 0x5f1   :  { %v7611_v56 = vpop.permute.xlu1 %7610  ;;  %4749 = vmatprep.subr.mxu0 %v11458_v18  ;;  %4820 = vmatprep.subr.mxu1 %v11440_v49  ;;  %v4149_v49 = vsel %vm2783_vm10, %v7568_v13, %v7607_v27  ;;  %v6205_v13 = vpack.c.bf16 %v4210_v50, %v4150_v30  ;;  %v4147_v27 = vsel %vm2783_vm10, %v7608_v45, %v7647_v34  ;;  %v7662_v45 = vunpack.i.l.bf16 %v11946_v52 }
 0x5f2   :  { %v7613_v1 = vunpack.i.h.bf16 %v7611_v56  ;;  %v7612_v55 = vunpack.i.l.bf16 %v7611_v56  ;;  %v7578_v56 = vunpack.i.h.bf16 %v11794_v31  ;;  %v12866_v50 = vunpack.i.l.bf16 %v11811_v11 }
 0x5f4   :  { %v4208_v18 = vsel %vm2844_vm9, %v7612_v55, %v7613_v1  ;;  %4750 = vmatpush1.msra.mxu0 %v11422_v16  ;;  %4821 = vmatpush1.msra.mxu1 %v11460_v59  ;;  %v4209_v5 = vsel %vm2844_vm9, %v7573_v21, %v7612_v55  ;;  %v11974_v39 = vpop.permute.xlu0 %7670  ;;  %v4207_v59 = vsel %vm2844_vm9, %v7613_v1, %v7652_v60 }
 0x5f5   :  { %v7616_v38 = vpop.permute.xlu1 %7615  ;;  %5648 = vmatmul.mubr.msk.f32.vlgmr.msra.gmra.mrb[32].mxu0 %vm534_vm8, %v11751_v51  ;;  %5649 = vmatmul.mubr.msk.f32.vlgmr.msra.gmra.mrb[32].mxu1 %vm534_vm8, %v11751_v51  ;;  %v6203_v16 = vpack.c.bf16 %v4209_v5, %v4149_v49  ;;  %v6221_v47 = vpack.c.bf16 %v4208_v18, %v4148_v44  ;;  %v6219_v21 = vpack.c.bf16 %v4207_v59, %v4147_v27  ;;  %v12867_v59 = vunpack.i.l.bf16 %v11794_v31 }
 0x5f6   :  { %4939 = vmatprep.mubr.f32.mxu0 %v12648_v19  ;;  %5010 = vmatprep.mubr.f32.mxu1 %v12648_v19  ;;  %v7618_v40 = vunpack.i.h.bf16 %v7616_v38  ;;  %v7617_v36 = vunpack.i.l.bf16 %v7616_v38  ;;  %v4330_v18 = vsel %vm2965_vm11, %v12866_v50, %v7583_v2  ;;  %v7588_v31 = vunpack.i.h.bf16 %v11818_v15 }
 0x5f7   :  { %6204 = vmatprep.subr.bf16.mxu0 %v6203_v16  ;;  %6220 = vmatprep.subr.bf16.mxu1 %v6219_v21 }
 0x5f8   :  { %6206 = vmatpush1.bf16.msra.mxu0 %v6205_v13  ;;  %v11992_v1 = vpop.permute.xlu0 %7675  ;;  %6222 = vmatpush1.bf16.msra.mxu1 %v6221_v47  ;;  %v4268_v49 = vsel %vm384_vm5, %v7617_v36, %v7618_v40  ;;  %v4269_v5 = vsel %vm384_vm5, %v7578_v56, %v7617_v36  ;;  %v4267_v11 = vsel %vm384_vm5, %v7618_v40, %v12624_v0  ;;  %v7603_v0 = vunpack.i.h.bf16 %v11882_v10 }
 0x5f9   :  { %v7621_v55 = vpop.permute.xlu1 %7620  ;;  %v4270_v13 = vsel %vm384_vm5, %v12867_v59, %v7578_v56 }
 0x5fa   :  { %v7623_v30 = vunpack.i.h.bf16 %v7621_v55  ;;  %v7622_v3 = vunpack.i.l.bf16 %v7621_v55  ;;  %v6209_v55 = vpack.c.bf16 %v4330_v18, %v4270_v13  ;;  %v12868_v18 = vunpack.i.l.bf16 %v11849_v7 }
 0x5fc   :  { %v4328_v44 = vsel %vm2965_vm11, %v7622_v3, %v7623_v30  ;;  %v4329_v38 = vsel %vm2965_vm11, %v7583_v2, %v7622_v3  ;;  %v4327_v16 = vsel %vm2965_vm11, %v7623_v30, %v7662_v45  ;;  %v12020_v27 = vpop.permute.xlu0 %7680  ;;  %v7593_v3 = vunpack.i.h.bf16 %v11849_v7 }
 0x5fd   :  { %v6225_v47 = vpack.c.bf16 %v4328_v44, %v4268_v49  ;;  %v7626_v36 = vpop.permute.xlu1 %7625  ;;  %v6207_v2 = vpack.c.bf16 %v4329_v38, %v4269_v5  ;;  %v6223_v21 = vpack.c.bf16 %v4327_v16, %v4267_v11  ;;  %v12625_v49 = vunpack.i.l.bf16 %v11950_v48 }
 0x5fe   :  { %v7628_v40 = vunpack.i.h.bf16 %v7626_v36  ;;  %v7627_v50 = vunpack.i.l.bf16 %v7626_v36  ;;  %v12627_v44 = vunpack.i.l.bf16 %v11974_v39  ;;  %v4450_v11 = vsel %vm3087_vm12, %v12868_v18, %v7593_v3 }
 0x5ff   :  { %6208 = vmatprep.subr.bf16.mxu0 %v6207_v2  ;;  %6224 = vmatprep.subr.bf16.mxu1 %v6223_v21  ;;  %v12869_v2 = vunpack.i.l.bf16 %v11818_v15  ;;  %v7598_v15 = vunpack.i.h.bf16 %v11854_v24 }
 0x600   :  { %6210 = vmatpush1.bf16.msra.mxu0 %v6209_v55  ;;  %6226 = vmatpush1.bf16.msra.mxu1 %v6225_v47  ;;  %v12024_v30 = vpop.permute.xlu0 %7725  ;;  %v4388_v16 = vsel %vm3026_vm13, %v7627_v50, %v7628_v40  ;;  %v4389_v59 = vsel %vm3026_vm13, %v7588_v31, %v7627_v50  ;;  %v4387_v7 = vsel %vm3026_vm13, %v7628_v40, %v12625_v49 }
 0x601   :  { %v7631_v56 = vpop.permute.xlu1 %7630  ;;  %v4390_v21 = vsel %vm3026_vm13, %v12869_v2, %v7588_v31 }
 0x602   :  { %v7633_v5 = vunpack.i.h.bf16 %v7631_v56  ;;  %v7632_v38 = vunpack.i.l.bf16 %v7631_v56  ;;  %v6213_v18 = vpack.c.bf16 %v4450_v11, %v4390_v21  ;;  %v4570_v11 = vsel %vm3209_vm14, %v7602_v8, %v7603_v0 }
 0x604   :  { %v4448_v13 = vsel %vm3087_vm12, %v7632_v38, %v7633_v5  ;;  %v4449_v47 = vsel %vm3087_vm12, %v7593_v3, %v7632_v38  ;;  %v4447_v36 = vsel %vm3087_vm12, %v7633_v5, %v12627_v44  ;;  %v12052_v50 = vpop.permute.xlu0 %7730 }
 0x605   :  { %v6229_v55 = vpack.c.bf16 %v4448_v13, %v4388_v16  ;;  %v7636_v56 = vpop.permute.xlu1 %7635  ;;  %v6211_v3 = vpack.c.bf16 %v4449_v47, %v4389_v59  ;;  %v6227_v38 = vpack.c.bf16 %v4447_v36, %v4387_v7  ;;  %v12626_v16 = vunpack.i.l.bf16 %v11992_v1 }
 0x606   :  { %v7638_v40 = vunpack.i.h.bf16 %v7636_v56  ;;  %v7637_v49 = vunpack.i.l.bf16 %v7636_v56  ;;  %v7682_v13 = vunpack.i.l.bf16 %v12020_v27 }
 0x607   :  { %6212 = vmatprep.subr.bf16.mxu0 %v6211_v3  ;;  %6228 = vmatprep.subr.bf16.mxu1 %v6227_v38 }
 0x608   :  { %6214 = vmatpush1.bf16.msra.mxu0 %v6213_v18  ;;  %6230 = vmatpush1.bf16.msra.mxu1 %v6229_v55  ;;  %v12056_v5 = vpop.permute.xlu0 %7735  ;;  %v4508_v7 = vsel %vm3148_vm15, %v7637_v49, %v7638_v40  ;;  %v4509_v36 = vsel %vm3148_vm15, %v7598_v15, %v7637_v49  ;;  %v4507_v10 = vsel %vm3148_vm15, %v7638_v40, %v12626_v16  ;;  %v12870_v55 = vunpack.i.l.bf16 %v11854_v24 }
 0x609   :  { %v7641_v31 = vpop.permute.xlu1 %7640  ;;  %v7653_v40 = vunpack.i.h.bf16 %v11914_v23 }
 0x60a   :  { %v7643_v59 = vunpack.i.h.bf16 %v7641_v31  ;;  %v7642_v47 = vunpack.i.l.bf16 %v7641_v31  ;;  %v4510_v49 = vsel %vm3148_vm15, %v12870_v55, %v7598_v15  ;;  %v7648_v31 = vunpack.i.h.bf16 %v11886_v37 }
 0x60c   :  { %v4568_v2 = vsel %vm3209_vm14, %v7642_v47, %v7643_v59  ;;  %v4569_v21 = vsel %vm3209_vm14, %v7603_v0, %v7642_v47  ;;  %v4567_v8 = vsel %vm3209_vm14, %v7643_v59, %v7682_v13  ;;  %v6217_v0 = vpack.c.bf16 %v4570_v11, %v4510_v49  ;;  %v12085_v47 = vpop.permute.xlu0 %7740 }
 0x60d   :  { %v6233_v56 = vpack.c.bf16 %v4568_v2, %v4508_v7  ;;  %v7686_v3 = vpop.permute.xlu1 %7685  ;;  %v6215_v38 = vpack.c.bf16 %v4569_v21, %v4509_v36  ;;  %v6231_v18 = vpack.c.bf16 %v4567_v8, %v4507_v10  ;;  %v4146_v15 = vsel %vm2783_vm10, %v7647_v34, %v7648_v31 }
 0x60e   :  { %v7688_v16 = vunpack.i.h.bf16 %v7686_v3  ;;  %v7687_v44 = vunpack.i.l.bf16 %v7686_v3  ;;  %v7727_v59 = vunpack.i.l.bf16 %v12024_v30  ;;  %v4206_v36 = vsel %vm2844_vm9, %v7652_v60, %v7653_v40 }
 0x60f   :  { %6216 = vmatprep.subr.bf16.mxu0 %v6215_v38  ;;  %6232 = vmatprep.subr.bf16.mxu1 %v6231_v18  ;;  %v7732_v2 = vunpack.i.l.bf16 %v12052_v50  ;;  %v7737_v38 = vunpack.i.l.bf16 %v12056_v5  ;;  %v7742_v18 = vunpack.i.l.bf16 %v12085_v47 }
 0x610   :  { %6218 = vmatpush1.bf16.msra.mxu0 %v6217_v0  ;;  %6234 = vmatpush1.bf16.msra.mxu1 %v6233_v56  ;;  %v12104_v37 = vpop.permute.xlu0 %7745  ;;  %v4143_v60 = vsel %vm2783_vm10, %v7688_v16, %v7727_v59  ;;  %v7658_v56 = vunpack.i.h.bf16 %v11918_v17 }
 0x611   :  { %v7691_v24 = vpop.permute.xlu1 %7690  ;;  %4891 = vmatprep.subr.mxu0 %v11500_v53  ;;  %4962 = vmatprep.subr.mxu1 %v11483_v62  ;;  %v4144_v53 = vsel %vm2783_vm10, %v7687_v44, %v7688_v16  ;;  %v4145_v62 = vsel %vm2783_vm10, %v7648_v31, %v7687_v44  ;;  %v7663_v16 = vunpack.i.h.bf16 %v11946_v52 }
 0x612   :  { %v7693_v11 = vunpack.i.h.bf16 %v7691_v24  ;;  %v7692_v7 = vunpack.i.l.bf16 %v7691_v24 }
 0x613   :  { %v4326_v24 = vsel %vm2965_vm11, %v7662_v45, %v7663_v16 }
 0x614   :  { %v4204_v34 = vsel %vm2844_vm9, %v7692_v7, %v7693_v11  ;;  %4892 = vmatpush1.msra.mxu0 %v11442_v61  ;;  %4963 = vmatpush1.msra.mxu1 %v11502_v41  ;;  %v4205_v23 = vsel %vm2844_vm9, %v7653_v40, %v7692_v7  ;;  %v4203_v61 = vsel %vm2844_vm9, %v7693_v11, %v7732_v2  ;;  %v12130_v0 = vpop.permute.xlu0 %4549 }
 0x615   :  { %v6253_v21 = vpack.c.bf16 %v4204_v34, %v4144_v53  ;;  %v7696_v10 = vpop.permute.xlu1 %7695  ;;  %5650 = vmatmul.mubr.msk.f32.vlgmr.msra.gmra.mrb[34].mxu0 %vm534_vm8, %v11751_v51  ;;  %5651 = vmatmul.mubr.msk.f32.vlgmr.msra.gmra.mrb[34].mxu1 %vm534_vm8, %v11751_v51  ;;  %v6235_v44 = vpack.c.bf16 %v4205_v23, %v4145_v62  ;;  %v6237_v41 = vpack.c.bf16 %v4206_v36, %v4146_v15  ;;  %v12871_v53 = vunpack.i.l.bf16 %v11918_v17 }
 0x616   :  { %v6251_v8 = vpack.c.bf16 %v4203_v61, %v4143_v60  ;;  %5081 = vmatprep.mubr.f32.mxu0 %v12648_v19  ;;  %5152 = vmatprep.mubr.f32.mxu1 %v12648_v19  ;;  %v7698_v55 = vunpack.i.h.bf16 %v7696_v10  ;;  %v7697_v49 = vunpack.i.l.bf16 %v7696_v10  ;;  %v7668_v17 = vunpack.i.h.bf16 %v11950_v48 }
 0x617   :  { %6236 = vmatprep.subr.bf16.mxu0 %v6235_v44  ;;  %v4266_v62 = vsel %vm384_vm5, %v12871_v53, %v7658_v56  ;;  %v7673_v44 = vunpack.i.h.bf16 %v11974_v39 }
 0x618   :  { %6252 = vmatprep.subr.bf16.mxu1 %v6251_v8  ;;  %6238 = vmatpush1.bf16.msra.mxu0 %v6237_v41  ;;  %v4264_v15 = vsel %vm384_vm5, %v7697_v49, %v7698_v55  ;;  %v4265_v11 = vsel %vm384_vm5, %v7658_v56, %v7697_v49  ;;  %v4263_v52 = vsel %vm384_vm5, %v7698_v55, %v7737_v38  ;;  %v12157_v8 = vpop.permute.xlu0 %7755  ;;  %v7747_v55 = vunpack.i.l.bf16 %v12104_v37 }
 0x619   :  { %6254 = vmatpush1.bf16.msra.mxu1 %v6253_v21  ;;  %v7701_v3 = vpop.permute.xlu1 %7700  ;;  %v6241_v10 = vpack.c.bf16 %v4326_v24, %v4266_v62 }
 0x61a   :  { %v7703_v31 = vunpack.i.h.bf16 %v7701_v3  ;;  %v7702_v40 = vunpack.i.l.bf16 %v7701_v3  ;;  %v12872_v3 = vunpack.i.l.bf16 %v11974_v39 }
 0x61c   :  { %v4324_v7 = vsel %vm2965_vm11, %v7702_v40, %v7703_v31  ;;  %v4325_v36 = vsel %vm2965_vm11, %v7663_v16, %v7702_v40  ;;  %v4323_v45 = vsel %vm2965_vm11, %v7703_v31, %v7742_v18  ;;  %v4446_v31 = vsel %vm3087_vm12, %v12872_v3, %v7673_v44 }
 0x61d   :  { %v6257_v34 = vpack.c.bf16 %v4324_v7, %v4264_v15  ;;  %v7706_v23 = vpop.permute.xlu1 %7705  ;;  %v6239_v60 = vpack.c.bf16 %v4325_v36, %v4265_v11  ;;  %v6255_v21 = vpack.c.bf16 %v4323_v45, %v4263_v52  ;;  %v12873_v36 = vunpack.i.l.bf16 %v11950_v48 }
 0x61e   :  { %v7708_v61 = vunpack.i.h.bf16 %v7706_v23  ;;  %v7707_v41 = vunpack.i.l.bf16 %v7706_v23  ;;  %v7678_v48 = vunpack.i.h.bf16 %v11992_v1 }
 0x61f   :  { %6240 = vmatprep.subr.bf16.mxu0 %v6239_v60  ;;  %6256 = vmatprep.subr.bf16.mxu1 %v6255_v21  ;;  %v4386_v52 = vsel %vm3026_vm13, %v12873_v36, %v7668_v17  ;;  %v12184_v60 = vpop.permute.xlu0 %7765  ;;  %v7683_v21 = vunpack.i.h.bf16 %v12020_v27 }
 0x620   :  { %6242 = vmatpush1.bf16.msra.mxu0 %v6241_v10  ;;  %6258 = vmatpush1.bf16.msra.mxu1 %v6257_v34  ;;  %v4384_v40 = vsel %vm3026_vm13, %v7707_v41, %v7708_v61  ;;  %v4385_v24 = vsel %vm3026_vm13, %v7668_v17, %v7707_v41  ;;  %v4383_v39 = vsel %vm3026_vm13, %v7708_v61, %v7747_v55 }
 0x621   :  { %v7711_v16 = vpop.permute.xlu1 %7710  ;;  %v6245_v23 = vpack.c.bf16 %v4446_v31, %v4386_v52 }
 0x622   :  { %v7713_v49 = vunpack.i.h.bf16 %v7711_v16  ;;  %v7712_v56 = vunpack.i.l.bf16 %v7711_v16  ;;  %v4566_v16 = vsel %vm3209_vm14, %v7682_v13, %v7683_v21 }
 0x623   :  { %v12196_v3 = vpop.permute.xlu0 %7775 }
 0x624   :  { %v4444_v15 = vsel %vm3087_vm12, %v7712_v56, %v7713_v49  ;;  %v4445_v11 = vsel %vm3087_vm12, %v7673_v44, %v7712_v56  ;;  %v4443_v7 = vsel %vm3087_vm12, %v7713_v49, %v11611_v20 }
 0x625   :  { %v6261_v45 = vpack.c.bf16 %v4444_v15, %v4384_v40  ;;  %v7716_v53 = vpop.permute.xlu1 %7715  ;;  %v6243_v62 = vpack.c.bf16 %v4445_v11, %v4385_v24  ;;  %v6259_v34 = vpack.c.bf16 %v4443_v7, %v4383_v39  ;;  %v12874_v24 = vunpack.i.l.bf16 %v11992_v1 }
 0x626   :  { %v7718_v10 = vunpack.i.h.bf16 %v7716_v53  ;;  %v7717_v44 = vunpack.i.l.bf16 %v7716_v53  ;;  %v7743_v53 = vunpack.i.h.bf16 %v12085_v47  ;;  %v7738_v1 = vunpack.i.h.bf16 %v12056_v5 }
 0x627   :  { %6244 = vmatprep.subr.bf16.mxu0 %v6243_v62  ;;  %6260 = vmatprep.subr.bf16.mxu1 %v6259_v34  ;;  %v4506_v15 = vsel %vm3148_vm15, %v12874_v24, %v7678_v48  ;;  %v7728_v62 = vunpack.i.h.bf16 %v12024_v30  ;;  %v7768_v47 = vunpack.i.h.bf16 %v12184_v60  ;;  %v7778_v24 = vunpack.i.h.bf16 %v12196_v3 }
 0x628   :  { %6246 = vmatpush1.bf16.msra.mxu0 %v6245_v23  ;;  %6262 = vmatpush1.bf16.msra.mxu1 %v6261_v45  ;;  %v4504_v49 = vsel %vm3148_vm15, %v7717_v44, %v7718_v10  ;;  %v4505_v56 = vsel %vm3148_vm15, %v7678_v48, %v7717_v44  ;;  %v4503_v27 = vsel %vm3148_vm15, %v7718_v10, %v11635_v25  ;;  %v7733_v45 = vunpack.i.h.bf16 %v12052_v50 }
 0x629   :  { %v7721_v61 = vpop.permute.xlu1 %7720  ;;  %v6249_v52 = vpack.c.bf16 %v4566_v16, %v4506_v15  ;;  %v12232_v10 = vsel %vm2965_vm11, %v7742_v18, %v7743_v53  ;;  %v7748_v44 = vunpack.i.h.bf16 %v12104_v37  ;;  %v7758_v48 = vunpack.i.h.bf16 %v12157_v8 }
 0x62a   :  { %v7723_v41 = vunpack.i.h.bf16 %v7721_v61  ;;  %v7722_v17 = vunpack.i.l.bf16 %v7721_v61  ;;  %v4202_v23 = vsel %vm2844_vm9, %v7732_v2, %v7733_v45  ;;  %v4262_v50 = vsel %vm384_vm5, %v7737_v38, %v7738_v1 }
 0x62b   :  { %v7767_v2 = vunpack.i.l.bf16 %v12184_v60  ;;  %v4382_v5 = vsel %vm3026_vm13, %v7747_v55, %v7748_v44  ;;  %v12876_v16 = vunpack.i.l.bf16 %v11660_v46 }
 0x62c   :  { %v4564_v31 = vsel %vm3209_vm14, %v7722_v17, %v7723_v41  ;;  %v4565_v40 = vsel %vm3209_vm14, %v7683_v21, %v7722_v17  ;;  %v4563_v13 = vsel %vm3209_vm14, %v7723_v41, %v12130_v0  ;;  %v12226_v21 = vpop.permute.xlu0 %7780  ;;  %v12875_v17 = vunpack.i.l.bf16 %v11716_v22 }
 0x62d   :  { %v6265_v11 = vpack.c.bf16 %v4564_v31, %v4504_v49  ;;  %v12212_v39 = vpop.permute.xlu1 %4435  ;;  %v6247_v7 = vpack.c.bf16 %v4565_v40, %v4505_v56  ;;  %v6263_v36 = vpack.c.bf16 %v4563_v13, %v4503_v27  ;;  %v4199_v49 = vsel %vm2844_vm9, %v7758_v48, %v12876_v16 }
 0x62e   :  { %v4320_v56 = vsel %vm2965_vm11, %v7767_v2, %v7768_v47  ;;  %v4321_v22 = vsel %vm2965_vm11, %v7743_v53, %v7767_v2 }
 0x62f   :  { %6248 = vmatprep.subr.bf16.mxu0 %v6247_v7  ;;  %6264 = vmatprep.subr.bf16.mxu1 %v6263_v36 }
 0x630   :  { %6250 = vmatpush1.bf16.msra.mxu0 %v6249_v52  ;;  %6266 = vmatpush1.bf16.msra.mxu1 %v6265_v11  ;;  %v7786_v61 = vpop.permute.xlu0 %7785  ;;  %v12877_v52 = vunpack.i.l.bf16 %v11673_v32 }
 0x631   :  { %v12218_v34 = vpop.permute.xlu1 %4495  ;;  %5033 = vmatprep.subr.mxu0 %v11544_v35  ;;  %5104 = vmatprep.subr.mxu1 %v11365_v28  ;;  %v7757_v35 = vunpack.i.l.bf16 %v12157_v8  ;;  %v4142_v28 = vsel %vm2783_vm10, %v7727_v59, %v7728_v62  ;;  %v7777_v8 = vunpack.i.l.bf16 %v12196_v3  ;;  %v7788_v7 = vunpack.i.h.bf16 %v7786_v61 }
 0x632   :  { %v7787_v36 = vunpack.i.l.bf16 %v7786_v61 }
 0x633   :  { %v4200_v38 = vsel %vm2844_vm9, %v7757_v35, %v7758_v48  ;;  %v4201_v60 = vsel %vm2844_vm9, %v7733_v45, %v7757_v35  ;;  %v4442_v46 = vsel %vm3087_vm12, %v11611_v20, %v7777_v8  ;;  %v4319_v45 = vsel %vm2965_vm11, %v7768_v47, %v12877_v52 }
 0x634   :  { %5034 = vmatpush1.msra.mxu0 %v11481_v12  ;;  %5105 = vmatpush1.msra.mxu1 %v11546_v29  ;;  %v6269_v12 = vpack.c.bf16 %v4202_v23, %v4142_v28  ;;  %v6273_v29 = vpack.c.bf16 %v12232_v10, %v4262_v50  ;;  %v7783_v23 = vunpack.i.h.bf16 %v12226_v21  ;;  %v7782_v28 = vunpack.i.l.bf16 %v12226_v21 }
 0x635   :  { %v7751_v18 = vpop.permute.xlu1 %7750  ;;  %5652 = vmatmul.mubr.msk.f32.vlgmr.msra.gmra.mrb[36].mxu0 %vm534_vm8, %v11751_v51  ;;  %5653 = vmatmul.mubr.msk.f32.vlgmr.msra.gmra.mrb[36].mxu1 %vm534_vm8, %v11751_v51  ;;  %v4441_v2 = vsel %vm3087_vm12, %v7777_v8, %v7778_v24  ;;  %v4561_v21 = vsel %vm3209_vm14, %v7787_v36, %v7788_v7 }
 0x636   :  { %v7753_v30 = vunpack.i.h.bf16 %v7751_v18  ;;  %v7752_v59 = vunpack.i.l.bf16 %v7751_v18  ;;  %5223 = vmatprep.mubr.f32.mxu0 %v12648_v19  ;;  %5294 = vmatprep.mubr.f32.mxu1 %v12648_v19  ;;  %v4440_v18 = vsel %vm3087_vm12, %v7778_v24, %v12212_v39 }
 0x638   :  { %v4140_v41 = vsel %vm2783_vm10, %v7752_v59, %v7753_v30  ;;  %v4141_v19 = vsel %vm2783_vm10, %v7728_v62, %v7752_v59  ;;  %v4139_v55 = vsel %vm2783_vm10, %v7753_v30, %v12875_v17  ;;  %v12878_v62 = vunpack.i.l.bf16 %v11741_v6 }
 0x639   :  { %v6285_v31 = vpack.c.bf16 %v4200_v38, %v4140_v41  ;;  %v7761_v40 = vpop.permute.xlu1 %7760  ;;  %v6267_v27 = vpack.c.bf16 %v4201_v60, %v4141_v19  ;;  %v6283_v13 = vpack.c.bf16 %v4199_v49, %v4139_v55  ;;  %v12880_v30 = vunpack.i.l.bf16 %v11773_v9 }
 0x63a   :  { %v7763_v15 = vunpack.i.h.bf16 %v7761_v40  ;;  %v7762_v11 = vunpack.i.l.bf16 %v7761_v40  ;;  %v6277_v59 = vpack.c.bf16 %v4442_v46, %v4382_v5  ;;  %v12881_v41 = vunpack.i.l.bf16 %v11796_v63 }
 0x63b   :  { %6268 = vmatprep.subr.bf16.mxu0 %v6267_v27  ;;  %6284 = vmatprep.subr.bf16.mxu1 %v6283_v13  ;;  %v12882_v9 = vunpack.i.l.bf16 %v11714_v43  ;;  %v4501_v5 = vsel %vm3148_vm15, %v7782_v28, %v7783_v23  ;;  %v4502_v63 = vsel %vm3148_vm15, %v11635_v25, %v7782_v28  ;;  %v4500_v43 = vsel %vm3148_vm15, %v7783_v23, %v12218_v34  ;;  %v12356_v25 = vpop.permute.xlu0 %4585  ;;  %v12885_v23 = vld [vmem:[#allocation2_spill] sm:$0xff] }
 0x63c   :  { %v4260_v3 = vsel %vm384_vm5, %v7762_v11, %v7763_v15  ;;  %6270 = vmatpush1.bf16.msra.mxu0 %v6269_v12  ;;  %6286 = vmatpush1.bf16.msra.mxu1 %v6285_v31  ;;  %v4261_v53 = vsel %vm384_vm5, %v7738_v1, %v7762_v11  ;;  %v4259_v20 = vsel %vm384_vm5, %v7763_v15, %v12878_v62  ;;  %v12879_v1 = vunpack.i.l.bf16 %v11694_v14 }
 0x63d   :  { %v6289_v10 = vpack.c.bf16 %v4320_v56, %v4260_v3  ;;  %v7771_v32 = vpop.permute.xlu1 %7770  ;;  %v6271_v48 = vpack.c.bf16 %v4321_v22, %v4261_v53  ;;  %v6287_v35 = vpack.c.bf16 %v4319_v45, %v4259_v20  ;;  %v4499_v37 = vsel %vm3148_vm15, %v12218_v34, %v12881_v41  ;;  %v12883_v22 = vld [vmem:[#allocation3_spill] sm:$0xff]  ;;  %v12884_v45 = vld [vmem:[#allocation4_spill] sm:$0xff] }
 0x63e   :  { %v7773_v50 = vunpack.i.h.bf16 %v7771_v32  ;;  %v7772_v47 = vunpack.i.l.bf16 %v7771_v32  ;;  %v4439_v6 = vsel %vm3087_vm12, %v12212_v39, %v12879_v1  ;;  %v5343_v49 = vrot.slane %v5656_v26, %v12842_v54 }
 0x63f   :  { %6272 = vmatprep.subr.bf16.mxu0 %v6271_v48  ;;  %6288 = vmatprep.subr.bf16.mxu1 %v6287_v35  ;;  %v7813_v13 = vmov 1966171168   ;;  %v5331_v46 = vrot.slane %v5656_v26, %v12883_v22  ;;  %v5335_v3 = vrot.slane %v5656_v26, %v12884_v45 }
 0x640   :  { %v4380_v12 = vsel %vm3026_vm13, %v7772_v47, %v7773_v50  ;;  %6274 = vmatpush1.bf16.msra.mxu0 %v6273_v29  ;;  %6290 = vmatpush1.bf16.msra.mxu1 %v6289_v10  ;;  %v4381_v14 = vsel %vm3026_vm13, %v7748_v44, %v7772_v47  ;;  %v4379_v39 = vsel %vm3026_vm13, %v7773_v50, %v12880_v30  ;;  %v5473_v24 = vunpack.c.l.s4 %v7813_v13 }
 0x641   :  { %v6293_v38 = vpack.c.bf16 %v4440_v18, %v4380_v12  ;;  %v4556_v8 = vpop.permute.xlu1 %4555  ;;  %v6275_v60 = vpack.c.bf16 %v4441_v2, %v4381_v14  ;;  %v6291_v61 = vpack.c.bf16 %v4439_v6, %v4379_v39  ;;  %v4562_v29 = vsel %vm3209_vm14, %v12130_v0, %v7787_v36  ;;  %v12886_v6 = vld [vmem:[#allocation8_spill] sm:$0xff]  ;;  %v12887_v12 = vld [vmem:[#allocation9_spill] sm:$0xff] }
 0x642   :  { %v4559_v44 = vsel %vm3209_vm14, %v4556_v8, %v12882_v9  ;;  %v4560_v19 = vsel %vm3209_vm14, %v7788_v7, %v4556_v8  ;;  %v6279_v0 = vpack.c.bf16 %v4561_v21, %v4501_v5  ;;  %v6281_v55 = vpack.c.bf16 %v4562_v29, %v4502_v63 }
 0x643   :  { %v6295_v17 = vpack.c.bf16 %v4559_v44, %v4499_v37  ;;  %6276 = vmatprep.subr.bf16.mxu0 %v6275_v60  ;;  %6292 = vmatprep.subr.bf16.mxu1 %v6291_v61  ;;  %v6297_v16 = vpack.c.bf16 %v4560_v19, %v4500_v43  ;;  %v5474_v36 = vunpack.c.0.s8 %v5473_v24  ;;  %v5347_v18 = vrot.slane %v5656_v26, %v12886_v6  ;;  %v12889_v61 = vld [vmem:[#allocation10_spill] sm:$0xff] }
 0x644   :  { %6278 = vmatpush1.bf16.msra.mxu0 %v6277_v59  ;;  %6294 = vmatpush1.bf16.msra.mxu1 %v6293_v38  ;;  %v5355_v14 = vrot.slane %v5656_v26, %v12887_v12  ;;  %v12888_v38 = vld [vmem:[#allocation6_spill] sm:$0xff]  ;;  %v5359_v29 = vrot.slane %v5656_v26, %v12889_v61 }
 0x645   :  { %6280 = vmatprep.subr.bf16.mxu0 %v6279_v0  ;;  %6296 = vmatprep.subr.bf16.mxu1 %v6295_v17  ;;  %v12367_v10 = vsub.s32 %v5474_v36, %v12885_v23  ;;  %v5351_v8 = vrot.slane %v5656_v26, %v12888_v38 }
 0x648   :  { %6282 = vmatpush1.bf16.msra.mxu0 %v6281_v55  ;;  %6298 = vmatpush1.bf16.msra.mxu1 %v6297_v16 }
 0x649   :  { %5175 = vmatprep.subr.mxu0 %v11577_v33  ;;  %5246 = vmatprep.subr.mxu1 %v11420_v57  ;;  %v5339_v57 = vrot.slane %v5656_v26, %v12841_v42 }
 0x64c   :  { %5176 = vmatpush1.msra.mxu0 %v11523_v58  ;;  %5247 = vmatpush1.msra.mxu1 %v11585_v4 }
 0x64d   :  { %5654 = vmatmul.mubr.msk.f32.vlgmr.msra.gmra.mrb[38].mxu0 %vm534_vm8, %v11751_v51  ;;  %5655 = vmatmul.mubr.msk.f32.vlgmr.msra.gmra.mrb[38].mxu1 %vm534_vm8, %v11751_v51 }
 0x698   :  { %v4728_v34 = vpop.f32.mrb[30].mxu1 }
 0x699   :  { %v4729_v33 = vadd.f32 %v4728_v34, %v12356_v25  ;;  %v4730_v58 = vpop.f32.mrb[31].mxu1 }
 0x69a   :  { %v4731_v4 = vadd.f32 %v4730_v58, %v12356_v25  ;;  %v5657_v58 = vld [vmem:[%s12435_s3 + $0x44] sm:$0xff] }
 0x69b   :  { %v5303_v56 = vmax.f32 %v4729_v33, 0.0 }
 0x69c   :  { %v5304_v31 = vmax.f32 %v4731_v4, 0.0 }
 0x69d   :  { %v5430_v40 = vmul.f32 %v5339_v57, %v5303_v56 }
 0x69e   :  { %v5431_v51 = vmul.f32 %v5343_v49, %v5304_v31  ;;  %v5363_v31 = vrot.slane %v5657_v58, %v12883_v22 }
 0x6a0   :  { %v5469_v27 = vcombine.low %v5430_v40, %v5431_v51  ;;  %v5371_v51 = vrot.slane %v5657_v58, %v12841_v42 }
 0x6a2   :  { %v5485_v35 = vrot.slane %v5469_v27, %v12367_v10 }
 0x6a7   :  { %v4657_v15 = vpop.f32.mrb[30].mxu0 }
 0x6a8   :  { %v4658_v11 = vadd.f32 %v4657_v15, %v12356_v25  ;;  %v4659_v7 = vpop.f32.mrb[31].mxu0  ;;  %v5367_v15 = vrot.slane %v5657_v58, %v12884_v45 }
 0x6a9   :  { %v4660_v52 = vadd.f32 %v4659_v7, %v12356_v25 }
 0x6aa   :  { %v5301_v53 = vmax.f32 %v4658_v11, 0.0 }
 0x6ab   :  { %v5302_v62 = vmax.f32 %v4660_v52, 0.0 }
 0x6ac   :  { %v5428_v20 = vmul.f32 %v5331_v46, %v5301_v53  ;;  %v5375_v46 = vrot.slane %v5657_v58, %v12842_v54 }
 0x6ad   :  { %v5429_v32 = vmul.f32 %v5335_v3, %v5302_v62 }
 0x6af   :  { %v5468_v48 = vcombine.low %v5428_v20, %v5429_v32 }
 0x6b1   :  { %v5478_v28 = vrot.slane %v5468_v48, %v12367_v10 }
 0x6b3   :  { %v5500_v50 = vcombine.low %v5478_v28, %v5485_v35 }
 0x6b5   :  { %v5508_v33 = vrot.slane %v5500_v50, %v12367_v10 }
 0x6c8   :  { %v4799_v47 = vpop.f32.mrb[32].mxu0  ;;  %v4870_v2 = vpop.f32.mrb[32].mxu1 }
 0x6c9   :  { %v4800_v1 = vadd.f32 %v4799_v47, %v12356_v25  ;;  %v4871_v21 = vadd.f32 %v4870_v2, %v12356_v25  ;;  %v4801_v30 = vpop.f32.mrb[33].mxu0  ;;  %v4872_v39 = vpop.f32.mrb[33].mxu1 }
 0x6ca   :  { %v4802_v59 = vadd.f32 %v4801_v30, %v12356_v25  ;;  %v4873_v60 = vadd.f32 %v4872_v39, %v12356_v25 }
 0x6cb   :  { %v5305_v41 = vmax.f32 %v4800_v1, 0.0  ;;  %v5307_v37 = vmax.f32 %v4871_v21, 0.0 }
 0x6cc   :  { %v5306_v9 = vmax.f32 %v4802_v59, 0.0  ;;  %v5308_v44 = vmax.f32 %v4873_v60, 0.0 }
 0x6cd   :  { %v5432_v5 = vmul.f32 %v5347_v18, %v5305_v41  ;;  %v5434_v19 = vmul.f32 %v5355_v14, %v5307_v37  ;;  %v5379_v18 = vrot.slane %v5657_v58, %v12886_v6  ;;  %v5387_v14 = vrot.slane %v5657_v58, %v12887_v12 }
 0x6ce   :  { %v5433_v17 = vmul.f32 %v5351_v8, %v5306_v9  ;;  %v5435_v0 = vmul.f32 %v5359_v29, %v5308_v44  ;;  %v5383_v8 = vrot.slane %v5657_v58, %v12888_v38  ;;  %v5391_v29 = vrot.slane %v5657_v58, %v12889_v61 }
 0x6d0   :  { %v5470_v63 = vcombine.low %v5432_v5, %v5433_v17  ;;  %v5471_v43 = vcombine.low %v5434_v19, %v5435_v0 }
 0x6d2   :  { %v5492_v55 = vrot.slane %v5470_v63, %v12367_v10  ;;  %v5499_v16 = vrot.slane %v5471_v43, %v12367_v10 }
 0x6d4   :  { %v5501_v34 = vcombine.low %v5492_v55, %v5499_v16 }
 0x6d6   :  { %v5515_v57 = vrot.slane %v5501_v34, %v12367_v10  ;;  %v5658_v34 = vld [vmem:[%s12435_s3 + $0x4c] sm:$0xf] }
 0x6d7   :  { %v5395_v58 = vrot.slane %v5658_v34, %v12883_v22 }
 0x6d8   :  { %v5516_v26 = vcombine.low %v5508_v33, %v5515_v57 }
 0x6da   :  { %5593 = vst [vmem:[%s12436_s4] sm:$0xff] %v5516_v26 }
 0x6e8   :  { %v4941_v4 = vpop.f32.mrb[34].mxu0  ;;  %v5012_v49 = vpop.f32.mrb[34].mxu1 }
 0x6e9   :  { %v4942_v56 = vadd.f32 %v4941_v4, %v12356_v25  ;;  %v5013_v40 = vadd.f32 %v5012_v49, %v12356_v25  ;;  %v4943_v27 = vpop.f32.mrb[35].mxu0  ;;  %v5014_v13 = vpop.f32.mrb[35].mxu1  ;;  %v5403_v49 = vrot.slane %v5658_v34, %v12841_v42 }
 0x6ea   :  { %v4944_v24 = vadd.f32 %v4943_v27, %v12356_v25  ;;  %v5015_v11 = vadd.f32 %v5014_v13, %v12356_v25  ;;  %v5407_v13 = vrot.slane %v5658_v34, %v12842_v54 }
 0x6eb   :  { %v5309_v7 = vmax.f32 %v4942_v56, 0.0  ;;  %v5311_v36 = vmax.f32 %v5013_v40, 0.0 }
 0x6ec   :  { %v5310_v52 = vmax.f32 %v4944_v24, 0.0  ;;  %v5312_v3 = vmax.f32 %v5015_v11, 0.0 }
 0x6ed   :  { %v5436_v53 = vmul.f32 %v5363_v31, %v5309_v7  ;;  %v5438_v62 = vmul.f32 %v5371_v51, %v5311_v36  ;;  %v5399_v51 = vrot.slane %v5658_v34, %v12884_v45  ;;  %v12890_v45 = vlaneseq }
 0x6ee   :  { %v5437_v20 = vmul.f32 %v5367_v15, %v5310_v52  ;;  %v5439_v23 = vmul.f32 %v5375_v46, %v5312_v3 }
 0x6ef   :  { %vm5597_vm0 = vcmp.lt.s32.totalorder %v12890_v45, 512 }
 0x6f0   :  { %v5517_v32 = vcombine.low %v5436_v53, %v5437_v20  ;;  %v5518_v48 = vcombine.low %v5438_v62, %v5439_v23 }
 0x6f2   :  { %v5527_v35 = vrot.slane %v5517_v32, %v12367_v10  ;;  %v5534_v28 = vrot.slane %v5518_v48, %v12367_v10 }
 0x6f4   :  { %v5549_v50 = vcombine.low %v5527_v35, %v5534_v28 }
 0x6f6   :  { %v5557_v38 = vrot.slane %v5549_v50, %v12367_v10 }
 0x708   :  { %v5083_v47 = vpop.f32.mrb[36].mxu0  ;;  %v5154_v2 = vpop.f32.mrb[36].mxu1 }
 0x709   :  { %v5084_v1 = vadd.f32 %v5083_v47, %v12356_v25  ;;  %v5155_v21 = vadd.f32 %v5154_v2, %v12356_v25  ;;  %v5085_v30 = vpop.f32.mrb[37].mxu0  ;;  %v5156_v39 = vpop.f32.mrb[37].mxu1 }
 0x70a   :  { %v5086_v59 = vadd.f32 %v5085_v30, %v12356_v25  ;;  %v5157_v60 = vadd.f32 %v5156_v39, %v12356_v25 }
 0x70b   :  { %v5313_v41 = vmax.f32 %v5084_v1, 0.0  ;;  %v5315_v37 = vmax.f32 %v5155_v21, 0.0 }
 0x70c   :  { %v5314_v9 = vmax.f32 %v5086_v59, 0.0  ;;  %v5316_v44 = vmax.f32 %v5157_v60, 0.0 }
 0x70d   :  { %v5440_v5 = vmul.f32 %v5379_v18, %v5313_v41  ;;  %v5442_v6 = vmul.f32 %v5387_v14, %v5315_v37 }
 0x70e   :  { %v5441_v19 = vmul.f32 %v5383_v8, %v5314_v9  ;;  %v5443_v17 = vmul.f32 %v5391_v29, %v5316_v44 }
 0x710   :  { %v5519_v0 = vcombine.low %v5440_v5, %v5441_v19  ;;  %v5520_v12 = vcombine.low %v5442_v6, %v5443_v17 }
 0x712   :  { %v5541_v63 = vrot.slane %v5519_v0, %v12367_v10  ;;  %v5548_v43 = vrot.slane %v5520_v12, %v12367_v10 }
 0x714   :  { %v5550_v55 = vcombine.low %v5541_v63, %v5548_v43 }
 0x716   :  { %v5564_v16 = vrot.slane %v5550_v55, %v12367_v10 }
 0x718   :  { %v5565_v61 = vcombine.low %v5557_v38, %v5564_v16 }
 0x71a   :  { %5594 = vst [vmem:[%s12436_s4 + $0x8] sm:$0xff] %v5565_v61 }
 0x720   :  { %v5225_v33 = vpop.f32.mrb[38].mxu0  ;;  %v5296_v57 = vpop.f32.mrb[38].mxu1 }
 0x721   :  { %v5226_v26 = vadd.f32 %v5225_v33, %v12356_v25  ;;  %v5297_v4 = vadd.f32 %v5296_v57, %v12356_v25  ;;  %v5227_v56 = vpop.f32.mrb[39].mxu0  ;;  %v5298_v31 = vpop.f32.mrb[39].mxu1 }
 0x722   :  { %v5228_v40 = vadd.f32 %v5227_v56, %v12356_v25  ;;  %v5299_v27 = vadd.f32 %v5298_v31, %v12356_v25 }
 0x723   :  { %v5317_v24 = vmax.f32 %v5226_v26, 0.0  ;;  %v5319_v15 = vmax.f32 %v5297_v4, 0.0 }
 0x724   :  { %v5318_v11 = vmax.f32 %v5228_v40, 0.0  ;;  %v5320_v46 = vmax.f32 %v5299_v27, 0.0 }
 0x725   :  { %v5444_v7 = vmul.f32 %v5395_v58, %v5317_v24  ;;  %v5446_v22 = vmul.f32 %v5403_v49, %v5319_v15 }
 0x726   :  { %v5445_v36 = vmul.f32 %v5399_v51, %v5318_v11  ;;  %v5447_v52 = vmul.f32 %v5407_v13, %v5320_v46 }
 0x728   :  { %v5566_v3 = vcombine.low %v5444_v7, %v5445_v36  ;;  %v5567_v42 = vcombine.low %v5446_v22, %v5447_v52 }
 0x72a   :  { %v5574_v53 = vrot.slane %v5566_v3, %v12367_v10  ;;  %v5581_v62 = vrot.slane %v5567_v42, %v12367_v10 }
 0x72c   :  { %v5582_v20 = vcombine.low %v5574_v53, %v5581_v62 }
 0x72e   :  { %v5589_v25 = vrot.slane %v5582_v20, %v12367_v10 }
 0x730   :  { %5599 = vst.msk [vmem:[%s12436_s4 + $0x10] sm:$0xf] %vm5597_vm0, %v5589_v25 }

</bundles_post_ra>
